<compile_context>
chip_gen: v5e
topology: v5e:2x2
jax: 0.10.0
libtpu: 0.0.40
codegen_flags: <defaults>
</compile_context>

<pallas_src>
import jax
import jax.numpy as jnp
from jax.experimental import pallas as pl
from jax.experimental.pallas import tpu as pltpu


def _round_up(n, m):
    return ((n + m - 1) // m) * m


def _gru_kernel(x_ref,        # (T, Bt, I)   time-major input tile
                wih0_ref,     # (I,  3Hp)    gate-major, 128-lane-aligned
                whh0_ref,     # (Hp, 3Hp)
                b0_ref,       # (1,  3Hp)    [bihr+bhhr | bihz+bhhz | bihn]
                bhn0_ref,     # (1,  Hp)     layer-0 hh n-gate bias (inside r*(...))
                wih1_ref,     # (Hp, 3Hp)
                whh1_ref,     # (Hp, 3Hp)
                b1_ref,       # (1,  3Hp)
                bhn1_ref,     # (1,  Hp)
                wfc_ref,      # (Hp, Ip)
                bfc_ref,      # (1,  Ip)     padded cols = -1e30 (masked in softmax)
                out_ref):     # (Bt, Ip)     log-probabilities (lane-dense)
    T, Bt, I = x_ref.shape
    Hp = whh0_ref.shape[0]
    mm_dtype = wih0_ref.dtype            # f32, or bf16 on v6e/v7x

    # ---- hoisted layer-0 input projection: one matmul for all timesteps ----
    # x is already time-major, so per-step slices below are contiguous row blocks.
    x_flat = x_ref[...].reshape(T * Bt, I).astype(mm_dtype)
    gi0_all = (jnp.dot(x_flat, wih0_ref[...], preferred_element_type=jnp.float32)
               + b0_ref[...])                                   # (T*Bt, 3Hp), f32

    # load step-invariant weights/biases once
    whh0 = whh0_ref[...]
    bhn0 = bhn0_ref[...]
    wih1 = wih1_ref[...]
    whh1 = whh1_ref[...]
    b1 = b1_ref[...]
    bhn1 = bhn1_ref[...]

    h0 = jnp.zeros((Bt, Hp), jnp.float32)
    h1 = jnp.zeros((Bt, Hp), jnp.float32)

    # ---- fused 2-layer recurrence, fully unrolled (T static & small) ----
    for t in range(T):
        # Both recurrent matmuls depend only on the previous step's states, so the
        # h1 path no longer waits on the freshly computed h0 (false dep removed).
        gh0 = jnp.dot(h0.astype(mm_dtype), whh0, preferred_element_type=jnp.float32)
        gh1 = jnp.dot(h1.astype(mm_dtype), whh1, preferred_element_type=jnp.float32)

        # layer 0
        gi0 = gi0_all[t * Bt:(t + 1) * Bt, :]                   # contiguous rows
        rz0 = jax.nn.sigmoid(gi0[:, :2 * Hp] + gh0[:, :2 * Hp]) # one EUP pass r,z
        r0 = rz0[:, :Hp]
        z0 = rz0[:, Hp:]
        n0 = jnp.tanh(gi0[:, 2 * Hp:] + r0 * (gh0[:, 2 * Hp:] + bhn0))
        h0 = n0 + z0 * (h0 - n0)                                 # (1-z)*n + z*h

        # layer 1 (input = h0 of this step; recurrent part gh1 already issued)
        gi1 = (jnp.dot(h0.astype(mm_dtype), wih1, preferred_element_type=jnp.float32)
               + b1)
        rz1 = jax.nn.sigmoid(gi1[:, :2 * Hp] + gh1[:, :2 * Hp])
        r1 = rz1[:, :Hp]
        z1 = rz1[:, Hp:]
        n1 = jnp.tanh(gi1[:, 2 * Hp:] + r1 * (gh1[:, 2 * Hp:] + bhn1))
        h1 = n1 + z1 * (h1 - n1)

    # ---- final fully connected + LogSoftmax(dim=1), lane-dense output ----
    logits = jnp.dot(h1.astype(mm_dtype), wfc_ref[...],
                     preferred_element_type=jnp.float32) + bfc_ref[...]
    m = jnp.max(logits, axis=1, keepdims=True)                  # padded cols ~ -1e30
    shifted = logits - m
    lse = jnp.log(jnp.sum(jnp.exp(shifted), axis=1, keepdims=True))
    out_ref[...] = shifted - lse


def prepare_params(params, matmul_dtype=jnp.float32):
    """One-time conversion of PyTorch-layout params to the kernel layout.

    PyTorch: weight_ih_l{k}: (3H, in), weight_hh_l{k}: (3H, H), biases (3H,),
    gate order [r, z, n].  Kernel layout: gate-major, each gate padded to a
    128-lane block (Hp), inputs of recurrent mats row-padded H -> Hp.
    Pass matmul_dtype=jnp.bfloat16 on v6e/v7x for single-pass MXU ops (f32 acc);
    keep f32 on v5e.
    """
    H = params["w_hh0"].shape[1]
    I = params["w_ih0"].shape[1]
    Hp = max(_round_up(H, 128), 128)
    Ip = max(_round_up(I, 128), 128)

    def gate_cols(w_t):                       # (in, 3H) -> (in, 3Hp), lane-aligned
        out = jnp.zeros((w_t.shape[0], 3 * Hp), jnp.float32)
        for g in range(3):
            out = out.at[:, g * Hp:g * Hp + H].set(w_t[:, g * H:(g + 1) * H])
        return out

    def gate_bias(b):                         # (3H,) -> (1, 3Hp)
        out = jnp.zeros((1, 3 * Hp), jnp.float32)
        for g in range(3):
            out = out.at[0, g * Hp:g * Hp + H].set(b[g * H:(g + 1) * H])
        return out

    def pad_rows(w, rows_to):                 # zero-pad leading dim H -> Hp
        return jnp.zeros((rows_to, w.shape[1]), w.dtype).at[:w.shape[0], :].set(w)

    f32 = jnp.float32

    # layer 0
    wih0 = gate_cols(params["w_ih0"].T.astype(f32))                      # (I, 3Hp)
    whh0 = pad_rows(gate_cols(params["w_hh0"].T.astype(f32)), Hp)        # (Hp, 3Hp)
    bih0 = params["b_ih0"].astype(f32)
    bhh0 = params["b_hh0"].astype(f32)
    b0 = gate_bias(jnp.concatenate([bih0[:2 * H] + bhh0[:2 * H], bih0[2 * H:]]))
    bhn0 = jnp.zeros((1, Hp), f32).at[0, :H].set(bhh0[2 * H:])

    # layer 1
    wih1 = pad_rows(gate_cols(params["w_ih1"].T.astype(f32)), Hp)        # (Hp, 3Hp)
    whh1 = pad_rows(gate_cols(params["w_hh1"].T.astype(f32)), Hp)        # (Hp, 3Hp)
    bih1 = params["b_ih1"].astype(f32)
    bhh1 = params["b_hh1"].astype(f32)
    b1 = gate_bias(jnp.concatenate([bih1[:2 * H] + bhh1[:2 * H], bih1[2 * H:]]))
    bhn1 = jnp.zeros((1, Hp), f32).at[0, :H].set(bhh1[2 * H:])

    # last fully connected: lane-dense Ip output; padded logits get -1e30 bias so
    # they never affect the log-softmax max / sum.
    wfc = jnp.zeros((Hp, Ip), f32).at[:H, :I].set(params["w_fc"].T.astype(f32))
    bfc = jnp.full((1, Ip), -1e30, f32).at[0, :I].set(params["b_fc"].astype(f32))

    md = matmul_dtype
    return dict(wih0=wih0.astype(md), whh0=whh0.astype(md),
                b0=b0, bhn0=bhn0,
                wih1=wih1.astype(md), whh1=whh1.astype(md),
                b1=b1, bhn1=bhn1,
                wfc=wfc.astype(md), bfc=bfc,
                meta=jnp.array([I], jnp.int32))


def _pick_batch_tile(B):
    for bt in (256, 128, 64, 32, 16, 8):
        if B % bt == 0:
            return bt
    return B


@jax.jit
def mygru_forward(x, prepped):
    """x: (B, T, I) float32, batch-first  ->  (B, I) log-probabilities."""
    B, T, I = x.shape
    Hp = prepped["whh0"].shape[0]
    Ip = prepped["wfc"].shape[1]
    Bt = _pick_batch_tile(B)

    # time-major once (outside the recurrence) so per-step slices are contiguous
    x_tm = jnp.transpose(x, (1, 0, 2))                           # (T, B, I)

    weights = (prepped["wih0"], prepped["whh0"], prepped["b0"], prepped["bhn0"],
               prepped["wih1"], prepped["whh1"], prepped["b1"], prepped["bhn1"],
               prepped["wfc"], prepped["bfc"])

    def full_spec(a):
        return pl.BlockSpec(tuple(a.shape), lambda b: (0,) * a.ndim)

    out_padded = pl.pallas_call(
        _gru_kernel,
        out_shape=jax.ShapeDtypeStruct((B, Ip), jnp.float32),
        grid=(B // Bt,),
        in_specs=[pl.BlockSpec((T, Bt, I), lambda b: (0, b, 0))]
                 + [full_spec(w) for w in weights],
        out_specs=pl.BlockSpec((Bt, Ip), lambda b: (b, 0)),
        compiler_params=pltpu.CompilerParams(
            dimension_semantics=("parallel",)),
    )(x_tm, *weights)

    return out_padded[:, :I]


def init_params(key, input_size, hidden_size):
    """Deterministic init matching the nn.GRU / nn.Linear parameter shapes."""
    H, I = hidden_size, input_size
    k = 1.0 / jnp.sqrt(jnp.float32(H))
    keys = jax.random.split(key, 10)
    u = lambda kk, shape: jax.random.uniform(kk, shape, jnp.float32, -k, k)
    return {
        "w_ih0": u(keys[0], (3 * H, I)),
        "w_hh0": u(keys[1], (3 * H, H)),
        "b_ih0": u(keys[2], (3 * H,)),
        "b_hh0": u(keys[3], (3 * H,)),
        "w_ih1": u(keys[4], (3 * H, H)),
        "w_hh1": u(keys[5], (3 * H, H)),
        "b_ih1": u(keys[6], (3 * H,)),
        "b_hh1": u(keys[7], (3 * H,)),
        "w_fc": u(keys[8], (I, H)),
        "b_fc": u(keys[9], (I,)),
    }


def _ref_forward(x, params):
    """Pure-JAX reference of MYGRU.forward (eval mode)."""
    B, T, I = x.shape
    H = params["w_hh0"].shape[1]
    hp = jax.lax.Precision.HIGHEST

    def cell(x_t, h, wih, whh, bih, bhh):
        gi = jnp.dot(x_t, wih.T, precision=hp) + bih
        gh = jnp.dot(h, whh.T, precision=hp) + bhh
        r = jax.nn.sigmoid(gi[:, :H] + gh[:, :H])
        z = jax.nn.sigmoid(gi[:, H:2 * H] + gh[:, H:2 * H])
        n = jnp.tanh(gi[:, 2 * H:] + r * gh[:, 2 * H:])
        return (1.0 - z) * n + z * h

    h0 = jnp.zeros((B, H), jnp.float32)
    h1 = jnp.zeros((B, H), jnp.float32)
    for t in range(T):
        h0 = cell(x[:, t, :], h0, params["w_ih0"], params["w_hh0"],
                  params["b_ih0"], params["b_hh0"])
        h1 = cell(h0, h1, params["w_ih1"], params["w_hh1"],
                  params["b_ih1"], params["b_hh1"])
    logits = jnp.dot(h1, params["w_fc"].T, precision=hp) + params["b_fc"]
    return jax.nn.log_softmax(logits, axis=1)


if __name__ == "__main__":
    # Small shapes consistent with the module: input_size = alphabet size,
    # hidden_size_generator = 32, num_layers_generator = 2, seq len = 8.
    B, T, I, H = 2, 8, 16, 32

    key = jax.random.PRNGKey(0)
    kx, kp = jax.random.split(key)
    x = jax.random.normal(kx, (B, T, I), jnp.float32)
    params = init_params(kp, I, H)
    ref = _ref_forward(x, params)

    # f32 matmul operands (v5e-safe default)
    prepped = prepare_params(params)
    out = jax.block_until_ready(mygru_forward(x, prepped))
    assert out.shape == (B, I)
    assert jnp.allclose(jnp.sum(jnp.exp(out), axis=1), 1.0, atol=1e-4)
    assert jnp.allclose(out, ref, atol=1e-3, rtol=1e-3), \
        float(jnp.max(jnp.abs(out - ref)))

    # bf16 matmul operands (v6e/v7x option), f32 accumulation & gate math.
    prepped_bf16 = prepare_params(params, matmul_dtype=jnp.bfloat16)
    out_bf16 = jax.block_until_ready(mygru_forward(x, prepped_bf16))
    assert out_bf16.shape == (B, I)
    assert bool(jnp.all(jnp.isfinite(out_bf16)))
    assert jnp.allclose(jnp.sum(jnp.exp(out_bf16), axis=1), 1.0, atol=1e-2)
    assert jnp.allclose(out_bf16, ref, atol=2e-1), \
        float(jnp.max(jnp.abs(out_bf16 - ref)))

    print("KERNEL_OK")
</pallas_src>

<mosaic_0001>
module attributes {stable_mosaic.version = 11 : i64} {
  func.func @_gru_kernel(%arg0: i32, %arg1: memref<8x2x16xf32, #tpu.memory_space<vmem>>, %arg2: memref<16x384xf32, #tpu.memory_space<vmem>>, %arg3: memref<128x384xf32, #tpu.memory_space<vmem>>, %arg4: memref<1x384xf32, #tpu.memory_space<vmem>>, %arg5: memref<1x128xf32, #tpu.memory_space<vmem>>, %arg6: memref<128x384xf32, #tpu.memory_space<vmem>>, %arg7: memref<128x384xf32, #tpu.memory_space<vmem>>, %arg8: memref<1x384xf32, #tpu.memory_space<vmem>>, %arg9: memref<1x128xf32, #tpu.memory_space<vmem>>, %arg10: memref<128x128xf32, #tpu.memory_space<vmem>>, %arg11: memref<1x128xf32, #tpu.memory_space<vmem>>, %arg12: memref<2x128xf32, #tpu.memory_space<vmem>>) attributes {dimension_semantics = [#tpu.dimension_semantics<parallel>], iteration_bounds = array<i64: 1>, scalar_prefetch = 0 : i64, scratch_operands = 0 : i64, tpu.core_type = #tpu.core_type<tc>, window_params = [{transform_indices = @transform_0, window_bounds = array<i64: 8, 2, 16>}, {pipeline_mode = #tpu.pipeline_mode<synchronous>, transform_indices = @transform_1, window_bounds = array<i64: 16, 384>}, {pipeline_mode = #tpu.pipeline_mode<synchronous>, transform_indices = @transform_2, window_bounds = array<i64: 128, 384>}, {pipeline_mode = #tpu.pipeline_mode<synchronous>, transform_indices = @transform_3, window_bounds = array<i64: 1, 384>}, {pipeline_mode = #tpu.pipeline_mode<synchronous>, transform_indices = @transform_4, window_bounds = array<i64: 1, 128>}, {pipeline_mode = #tpu.pipeline_mode<synchronous>, transform_indices = @transform_5, window_bounds = array<i64: 128, 384>}, {pipeline_mode = #tpu.pipeline_mode<synchronous>, transform_indices = @transform_6, window_bounds = array<i64: 128, 384>}, {pipeline_mode = #tpu.pipeline_mode<synchronous>, transform_indices = @transform_7, window_bounds = array<i64: 1, 384>}, {pipeline_mode = #tpu.pipeline_mode<synchronous>, transform_indices = @transform_8, window_bounds = array<i64: 1, 128>}, {pipeline_mode = #tpu.pipeline_mode<synchronous>, transform_indices = @transform_9, window_bounds = array<i64: 128, 128>}, {pipeline_mode = #tpu.pipeline_mode<synchronous>, transform_indices = @transform_10, window_bounds = array<i64: 1, 128>}, {transform_indices = @transform_11, window_bounds = array<i64: 2, 128>}]} {
    %c0 = arith.constant 0 : index
    %c0_0 = arith.constant 0 : index
    %c0_1 = arith.constant 0 : index
    %0 = vector.load %arg1[%c0, %c0_0, %c0_1] : memref<8x2x16xf32, #tpu.memory_space<vmem>>, vector<8x2x16xf32>
    %1 = vector.shape_cast %0 : vector<8x2x16xf32> to vector<16x16xf32>
    %c0_2 = arith.constant 0 : index
    %c0_3 = arith.constant 0 : index
    %2 = vector.load %arg2[%c0_2, %c0_3] : memref<16x384xf32, #tpu.memory_space<vmem>>, vector<16x384xf32>
    %cst = arith.constant dense<0.000000e+00> : vector<16x384xf32>
    %3 = tpu.matmul %1, %2, %cst {dimension_numbers = #tpu.dot_dimension_numbers<[1], [0], [0], [1], [0, 0, 1, 1], [], []>} : vector<16x16xf32>, vector<16x384xf32>, vector<16x384xf32> -> vector<16x384xf32>
    %c0_4 = arith.constant 0 : index
    %c0_5 = arith.constant 0 : index
    %4 = vector.load %arg4[%c0_4, %c0_5] : memref<1x384xf32, #tpu.memory_space<vmem>>, vector<1x384xf32>
    %5 = vector.broadcast %4 : vector<1x384xf32> to vector<16x384xf32>
    %6 = arith.addf %3, %5 : vector<16x384xf32>
    %c0_6 = arith.constant 0 : index
    %c0_7 = arith.constant 0 : index
    %7 = vector.load %arg3[%c0_6, %c0_7] : memref<128x384xf32, #tpu.memory_space<vmem>>, vector<128x384xf32>
    %c0_8 = arith.constant 0 : index
    %c0_9 = arith.constant 0 : index
    %8 = vector.load %arg5[%c0_8, %c0_9] : memref<1x128xf32, #tpu.memory_space<vmem>>, vector<1x128xf32>
    %c0_10 = arith.constant 0 : index
    %c0_11 = arith.constant 0 : index
    %9 = vector.load %arg6[%c0_10, %c0_11] : memref<128x384xf32, #tpu.memory_space<vmem>>, vector<128x384xf32>
    %c0_12 = arith.constant 0 : index
    %c0_13 = arith.constant 0 : index
    %10 = vector.load %arg7[%c0_12, %c0_13] : memref<128x384xf32, #tpu.memory_space<vmem>>, vector<128x384xf32>
    %c0_14 = arith.constant 0 : index
    %c0_15 = arith.constant 0 : index
    %11 = vector.load %arg8[%c0_14, %c0_15] : memref<1x384xf32, #tpu.memory_space<vmem>>, vector<1x384xf32>
    %c0_16 = arith.constant 0 : index
    %c0_17 = arith.constant 0 : index
    %12 = vector.load %arg9[%c0_16, %c0_17] : memref<1x128xf32, #tpu.memory_space<vmem>>, vector<1x128xf32>
    %cst_18 = arith.constant 0.000000e+00 : f32
    %13 = vector.broadcast %cst_18 : f32 to vector<2x128xf32>
    %cst_19 = arith.constant 0.000000e+00 : f32
    %14 = vector.broadcast %cst_19 : f32 to vector<2x128xf32>
    %cst_20 = arith.constant dense<0.000000e+00> : vector<2x384xf32>
    %15 = tpu.matmul %13, %7, %cst_20 {dimension_numbers = #tpu.dot_dimension_numbers<[1], [0], [0], [1], [0, 0, 1, 1], [], []>} : vector<2x128xf32>, vector<128x384xf32>, vector<2x384xf32> -> vector<2x384xf32>
    %cst_21 = arith.constant dense<0.000000e+00> : vector<2x384xf32>
    %16 = tpu.matmul %14, %10, %cst_21 {dimension_numbers = #tpu.dot_dimension_numbers<[1], [0], [0], [1], [0, 0, 1, 1], [], []>} : vector<2x128xf32>, vector<128x384xf32>, vector<2x384xf32> -> vector<2x384xf32>
    %17 = vector.extract_strided_slice %6 {offsets = [0, 0], sizes = [2, 384], strides = [1, 1]} : vector<16x384xf32> to vector<2x384xf32>
    %18 = vector.extract_strided_slice %17 {offsets = [0, 0], sizes = [2, 256], strides = [1, 1]} : vector<2x384xf32> to vector<2x256xf32>
    %19 = vector.extract_strided_slice %15 {offsets = [0, 0], sizes = [2, 256], strides = [1, 1]} : vector<2x384xf32> to vector<2x256xf32>
    %20 = arith.addf %18, %19 : vector<2x256xf32>
    %21 = arith.negf %20 : vector<2x256xf32>
    %22 = math.exp %21 : vector<2x256xf32>
    %cst_22 = arith.constant 1.000000e+00 : f32
    %23 = vector.broadcast %cst_22 : f32 to vector<2x256xf32>
    %24 = arith.addf %23, %22 : vector<2x256xf32>
    %25 = arith.divf %23, %24 : vector<2x256xf32>
    %26 = vector.extract_strided_slice %25 {offsets = [0, 0], sizes = [2, 128], strides = [1, 1]} : vector<2x256xf32> to vector<2x128xf32>
    %27 = vector.extract_strided_slice %25 {offsets = [0, 128], sizes = [2, 128], strides = [1, 1]} : vector<2x256xf32> to vector<2x128xf32>
    %28 = vector.extract_strided_slice %17 {offsets = [0, 256], sizes = [2, 128], strides = [1, 1]} : vector<2x384xf32> to vector<2x128xf32>
    %29 = vector.extract_strided_slice %15 {offsets = [0, 256], sizes = [2, 128], strides = [1, 1]} : vector<2x384xf32> to vector<2x128xf32>
    %30 = vector.broadcast %8 : vector<1x128xf32> to vector<2x128xf32>
    %31 = arith.addf %29, %30 : vector<2x128xf32>
    %32 = arith.mulf %26, %31 : vector<2x128xf32>
    %33 = arith.addf %28, %32 : vector<2x128xf32>
    %34 = math.tanh %33 : vector<2x128xf32>
    %35 = arith.subf %13, %34 : vector<2x128xf32>
    %36 = arith.mulf %27, %35 : vector<2x128xf32>
    %37 = arith.addf %34, %36 : vector<2x128xf32>
    %cst_23 = arith.constant dense<0.000000e+00> : vector<2x384xf32>
    %38 = tpu.matmul %37, %9, %cst_23 {dimension_numbers = #tpu.dot_dimension_numbers<[1], [0], [0], [1], [0, 0, 1, 1], [], []>} : vector<2x128xf32>, vector<128x384xf32>, vector<2x384xf32> -> vector<2x384xf32>
    %39 = vector.broadcast %11 : vector<1x384xf32> to vector<2x384xf32>
    %40 = arith.addf %38, %39 : vector<2x384xf32>
    %41 = vector.extract_strided_slice %40 {offsets = [0, 0], sizes = [2, 256], strides = [1, 1]} : vector<2x384xf32> to vector<2x256xf32>
    %42 = vector.extract_strided_slice %16 {offsets = [0, 0], sizes = [2, 256], strides = [1, 1]} : vector<2x384xf32> to vector<2x256xf32>
    %43 = arith.addf %41, %42 : vector<2x256xf32>
    %44 = arith.negf %43 : vector<2x256xf32>
    %45 = math.exp %44 : vector<2x256xf32>
    %cst_24 = arith.constant 1.000000e+00 : f32
    %46 = vector.broadcast %cst_24 : f32 to vector<2x256xf32>
    %47 = arith.addf %46, %45 : vector<2x256xf32>
    %48 = arith.divf %46, %47 : vector<2x256xf32>
    %49 = vector.extract_strided_slice %48 {offsets = [0, 0], sizes = [2, 128], strides = [1, 1]} : vector<2x256xf32> to vector<2x128xf32>
    %50 = vector.extract_strided_slice %48 {offsets = [0, 128], sizes = [2, 128], strides = [1, 1]} : vector<2x256xf32> to vector<2x128xf32>
    %51 = vector.extract_strided_slice %40 {offsets = [0, 256], sizes = [2, 128], strides = [1, 1]} : vector<2x384xf32> to vector<2x128xf32>
    %52 = vector.extract_strided_slice %16 {offsets = [0, 256], sizes = [2, 128], strides = [1, 1]} : vector<2x384xf32> to vector<2x128xf32>
    %53 = vector.broadcast %12 : vector<1x128xf32> to vector<2x128xf32>
    %54 = arith.addf %52, %53 : vector<2x128xf32>
    %55 = arith.mulf %49, %54 : vector<2x128xf32>
    %56 = arith.addf %51, %55 : vector<2x128xf32>
    %57 = math.tanh %56 : vector<2x128xf32>
    %58 = arith.subf %14, %57 : vector<2x128xf32>
    %59 = arith.mulf %50, %58 : vector<2x128xf32>
    %60 = arith.addf %57, %59 : vector<2x128xf32>
    %cst_25 = arith.constant dense<0.000000e+00> : vector<2x384xf32>
    %61 = tpu.matmul %37, %7, %cst_25 {dimension_numbers = #tpu.dot_dimension_numbers<[1], [0], [0], [1], [0, 0, 1, 1], [], []>} : vector<2x128xf32>, vector<128x384xf32>, vector<2x384xf32> -> vector<2x384xf32>
    %cst_26 = arith.constant dense<0.000000e+00> : vector<2x384xf32>
    %62 = tpu.matmul %60, %10, %cst_26 {dimension_numbers = #tpu.dot_dimension_numbers<[1], [0], [0], [1], [0, 0, 1, 1], [], []>} : vector<2x128xf32>, vector<128x384xf32>, vector<2x384xf32> -> vector<2x384xf32>
    %63 = vector.extract_strided_slice %6 {offsets = [2, 0], sizes = [2, 384], strides = [1, 1]} : vector<16x384xf32> to vector<2x384xf32>
    %64 = vector.extract_strided_slice %63 {offsets = [0, 0], sizes = [2, 256], strides = [1, 1]} : vector<2x384xf32> to vector<2x256xf32>
    %65 = vector.extract_strided_slice %61 {offsets = [0, 0], sizes = [2, 256], strides = [1, 1]} : vector<2x384xf32> to vector<2x256xf32>
    %66 = arith.addf %64, %65 : vector<2x256xf32>
    %67 = arith.negf %66 : vector<2x256xf32>
    %68 = math.exp %67 : vector<2x256xf32>
    %cst_27 = arith.constant 1.000000e+00 : f32
    %69 = vector.broadcast %cst_27 : f32 to vector<2x256xf32>
    %70 = arith.addf %69, %68 : vector<2x256xf32>
    %71 = arith.divf %69, %70 : vector<2x256xf32>
    %72 = vector.extract_strided_slice %71 {offsets = [0, 0], sizes = [2, 128], strides = [1, 1]} : vector<2x256xf32> to vector<2x128xf32>
    %73 = vector.extract_strided_slice %71 {offsets = [0, 128], sizes = [2, 128], strides = [1, 1]} : vector<2x256xf32> to vector<2x128xf32>
    %74 = vector.extract_strided_slice %63 {offsets = [0, 256], sizes = [2, 128], strides = [1, 1]} : vector<2x384xf32> to vector<2x128xf32>
    %75 = vector.extract_strided_slice %61 {offsets = [0, 256], sizes = [2, 128], strides = [1, 1]} : vector<2x384xf32> to vector<2x128xf32>
    %76 = vector.broadcast %8 : vector<1x128xf32> to vector<2x128xf32>
    %77 = arith.addf %75, %76 : vector<2x128xf32>
    %78 = arith.mulf %72, %77 : vector<2x128xf32>
    %79 = arith.addf %74, %78 : vector<2x128xf32>
    %80 = math.tanh %79 : vector<2x128xf32>
    %81 = arith.subf %37, %80 : vector<2x128xf32>
    %82 = arith.mulf %73, %81 : vector<2x128xf32>
    %83 = arith.addf %80, %82 : vector<2x128xf32>
    %cst_28 = arith.constant dense<0.000000e+00> : vector<2x384xf32>
    %84 = tpu.matmul %83, %9, %cst_28 {dimension_numbers = #tpu.dot_dimension_numbers<[1], [0], [0], [1], [0, 0, 1, 1], [], []>} : vector<2x128xf32>, vector<128x384xf32>, vector<2x384xf32> -> vector<2x384xf32>
    %85 = vector.broadcast %11 : vector<1x384xf32> to vector<2x384xf32>
    %86 = arith.addf %84, %85 : vector<2x384xf32>
    %87 = vector.extract_strided_slice %86 {offsets = [0, 0], sizes = [2, 256], strides = [1, 1]} : vector<2x384xf32> to vector<2x256xf32>
    %88 = vector.extract_strided_slice %62 {offsets = [0, 0], sizes = [2, 256], strides = [1, 1]} : vector<2x384xf32> to vector<2x256xf32>
    %89 = arith.addf %87, %88 : vector<2x256xf32>
    %90 = arith.negf %89 : vector<2x256xf32>
    %91 = math.exp %90 : vector<2x256xf32>
    %cst_29 = arith.constant 1.000000e+00 : f32
    %92 = vector.broadcast %cst_29 : f32 to vector<2x256xf32>
    %93 = arith.addf %92, %91 : vector<2x256xf32>
    %94 = arith.divf %92, %93 : vector<2x256xf32>
    %95 = vector.extract_strided_slice %94 {offsets = [0, 0], sizes = [2, 128], strides = [1, 1]} : vector<2x256xf32> to vector<2x128xf32>
    %96 = vector.extract_strided_slice %94 {offsets = [0, 128], sizes = [2, 128], strides = [1, 1]} : vector<2x256xf32> to vector<2x128xf32>
    %97 = vector.extract_strided_slice %86 {offsets = [0, 256], sizes = [2, 128], strides = [1, 1]} : vector<2x384xf32> to vector<2x128xf32>
    %98 = vector.extract_strided_slice %62 {offsets = [0, 256], sizes = [2, 128], strides = [1, 1]} : vector<2x384xf32> to vector<2x128xf32>
    %99 = vector.broadcast %12 : vector<1x128xf32> to vector<2x128xf32>
    %100 = arith.addf %98, %99 : vector<2x128xf32>
    %101 = arith.mulf %95, %100 : vector<2x128xf32>
    %102 = arith.addf %97, %101 : vector<2x128xf32>
    %103 = math.tanh %102 : vector<2x128xf32>
    %104 = arith.subf %60, %103 : vector<2x128xf32>
    %105 = arith.mulf %96, %104 : vector<2x128xf32>
    %106 = arith.addf %103, %105 : vector<2x128xf32>
    %cst_30 = arith.constant dense<0.000000e+00> : vector<2x384xf32>
    %107 = tpu.matmul %83, %7, %cst_30 {dimension_numbers = #tpu.dot_dimension_numbers<[1], [0], [0], [1], [0, 0, 1, 1], [], []>} : vector<2x128xf32>, vector<128x384xf32>, vector<2x384xf32> -> vector<2x384xf32>
    %cst_31 = arith.constant dense<0.000000e+00> : vector<2x384xf32>
    %108 = tpu.matmul %106, %10, %cst_31 {dimension_numbers = #tpu.dot_dimension_numbers<[1], [0], [0], [1], [0, 0, 1, 1], [], []>} : vector<2x128xf32>, vector<128x384xf32>, vector<2x384xf32> -> vector<2x384xf32>
    %109 = vector.extract_strided_slice %6 {offsets = [4, 0], sizes = [2, 384], strides = [1, 1]} : vector<16x384xf32> to vector<2x384xf32>
    %110 = vector.extract_strided_slice %109 {offsets = [0, 0], sizes = [2, 256], strides = [1, 1]} : vector<2x384xf32> to vector<2x256xf32>
    %111 = vector.extract_strided_slice %107 {offsets = [0, 0], sizes = [2, 256], strides = [1, 1]} : vector<2x384xf32> to vector<2x256xf32>
    %112 = arith.addf %110, %111 : vector<2x256xf32>
    %113 = arith.negf %112 : vector<2x256xf32>
    %114 = math.exp %113 : vector<2x256xf32>
    %cst_32 = arith.constant 1.000000e+00 : f32
    %115 = vector.broadcast %cst_32 : f32 to vector<2x256xf32>
    %116 = arith.addf %115, %114 : vector<2x256xf32>
    %117 = arith.divf %115, %116 : vector<2x256xf32>
    %118 = vector.extract_strided_slice %117 {offsets = [0, 0], sizes = [2, 128], strides = [1, 1]} : vector<2x256xf32> to vector<2x128xf32>
    %119 = vector.extract_strided_slice %117 {offsets = [0, 128], sizes = [2, 128], strides = [1, 1]} : vector<2x256xf32> to vector<2x128xf32>
    %120 = vector.extract_strided_slice %109 {offsets = [0, 256], sizes = [2, 128], strides = [1, 1]} : vector<2x384xf32> to vector<2x128xf32>
    %121 = vector.extract_strided_slice %107 {offsets = [0, 256], sizes = [2, 128], strides = [1, 1]} : vector<2x384xf32> to vector<2x128xf32>
    %122 = vector.broadcast %8 : vector<1x128xf32> to vector<2x128xf32>
    %123 = arith.addf %121, %122 : vector<2x128xf32>
    %124 = arith.mulf %118, %123 : vector<2x128xf32>
    %125 = arith.addf %120, %124 : vector<2x128xf32>
    %126 = math.tanh %125 : vector<2x128xf32>
    %127 = arith.subf %83, %126 : vector<2x128xf32>
    %128 = arith.mulf %119, %127 : vector<2x128xf32>
    %129 = arith.addf %126, %128 : vector<2x128xf32>
    %cst_33 = arith.constant dense<0.000000e+00> : vector<2x384xf32>
    %130 = tpu.matmul %129, %9, %cst_33 {dimension_numbers = #tpu.dot_dimension_numbers<[1], [0], [0], [1], [0, 0, 1, 1], [], []>} : vector<2x128xf32>, vector<128x384xf32>, vector<2x384xf32> -> vector<2x384xf32>
    %131 = vector.broadcast %11 : vector<1x384xf32> to vector<2x384xf32>
    %132 = arith.addf %130, %131 : vector<2x384xf32>
    %133 = vector.extract_strided_slice %132 {offsets = [0, 0], sizes = [2, 256], strides = [1, 1]} : vector<2x384xf32> to vector<2x256xf32>
    %134 = vector.extract_strided_slice %108 {offsets = [0, 0], sizes = [2, 256], strides = [1, 1]} : vector<2x384xf32> to vector<2x256xf32>
    %135 = arith.addf %133, %134 : vector<2x256xf32>
    %136 = arith.negf %135 : vector<2x256xf32>
    %137 = math.exp %136 : vector<2x256xf32>
    %cst_34 = arith.constant 1.000000e+00 : f32
    %138 = vector.broadcast %cst_34 : f32 to vector<2x256xf32>
    %139 = arith.addf %138, %137 : vector<2x256xf32>
    %140 = arith.divf %138, %139 : vector<2x256xf32>
    %141 = vector.extract_strided_slice %140 {offsets = [0, 0], sizes = [2, 128], strides = [1, 1]} : vector<2x256xf32> to vector<2x128xf32>
    %142 = vector.extract_strided_slice %140 {offsets = [0, 128], sizes = [2, 128], strides = [1, 1]} : vector<2x256xf32> to vector<2x128xf32>
    %143 = vector.extract_strided_slice %132 {offsets = [0, 256], sizes = [2, 128], strides = [1, 1]} : vector<2x384xf32> to vector<2x128xf32>
    %144 = vector.extract_strided_slice %108 {offsets = [0, 256], sizes = [2, 128], strides = [1, 1]} : vector<2x384xf32> to vector<2x128xf32>
    %145 = vector.broadcast %12 : vector<1x128xf32> to vector<2x128xf32>
    %146 = arith.addf %144, %145 : vector<2x128xf32>
    %147 = arith.mulf %141, %146 : vector<2x128xf32>
    %148 = arith.addf %143, %147 : vector<2x128xf32>
    %149 = math.tanh %148 : vector<2x128xf32>
    %150 = arith.subf %106, %149 : vector<2x128xf32>
    %151 = arith.mulf %142, %150 : vector<2x128xf32>
    %152 = arith.addf %149, %151 : vector<2x128xf32>
    %cst_35 = arith.constant dense<0.000000e+00> : vector<2x384xf32>
    %153 = tpu.matmul %129, %7, %cst_35 {dimension_numbers = #tpu.dot_dimension_numbers<[1], [0], [0], [1], [0, 0, 1, 1], [], []>} : vector<2x128xf32>, vector<128x384xf32>, vector<2x384xf32> -> vector<2x384xf32>
    %cst_36 = arith.constant dense<0.000000e+00> : vector<2x384xf32>
    %154 = tpu.matmul %152, %10, %cst_36 {dimension_numbers = #tpu.dot_dimension_numbers<[1], [0], [0], [1], [0, 0, 1, 1], [], []>} : vector<2x128xf32>, vector<128x384xf32>, vector<2x384xf32> -> vector<2x384xf32>
    %155 = vector.extract_strided_slice %6 {offsets = [6, 0], sizes = [2, 384], strides = [1, 1]} : vector<16x384xf32> to vector<2x384xf32>
    %156 = vector.extract_strided_slice %155 {offsets = [0, 0], sizes = [2, 256], strides = [1, 1]} : vector<2x384xf32> to vector<2x256xf32>
    %157 = vector.extract_strided_slice %153 {offsets = [0, 0], sizes = [2, 256], strides = [1, 1]} : vector<2x384xf32> to vector<2x256xf32>
    %158 = arith.addf %156, %157 : vector<2x256xf32>
    %159 = arith.negf %158 : vector<2x256xf32>
    %160 = math.exp %159 : vector<2x256xf32>
    %cst_37 = arith.constant 1.000000e+00 : f32
    %161 = vector.broadcast %cst_37 : f32 to vector<2x256xf32>
    %162 = arith.addf %161, %160 : vector<2x256xf32>
    %163 = arith.divf %161, %162 : vector<2x256xf32>
    %164 = vector.extract_strided_slice %163 {offsets = [0, 0], sizes = [2, 128], strides = [1, 1]} : vector<2x256xf32> to vector<2x128xf32>
    %165 = vector.extract_strided_slice %163 {offsets = [0, 128], sizes = [2, 128], strides = [1, 1]} : vector<2x256xf32> to vector<2x128xf32>
    %166 = vector.extract_strided_slice %155 {offsets = [0, 256], sizes = [2, 128], strides = [1, 1]} : vector<2x384xf32> to vector<2x128xf32>
    %167 = vector.extract_strided_slice %153 {offsets = [0, 256], sizes = [2, 128], strides = [1, 1]} : vector<2x384xf32> to vector<2x128xf32>
    %168 = vector.broadcast %8 : vector<1x128xf32> to vector<2x128xf32>
    %169 = arith.addf %167, %168 : vector<2x128xf32>
    %170 = arith.mulf %164, %169 : vector<2x128xf32>
    %171 = arith.addf %166, %170 : vector<2x128xf32>
    %172 = math.tanh %171 : vector<2x128xf32>
    %173 = arith.subf %129, %172 : vector<2x128xf32>
    %174 = arith.mulf %165, %173 : vector<2x128xf32>
    %175 = arith.addf %172, %174 : vector<2x128xf32>
    %cst_38 = arith.constant dense<0.000000e+00> : vector<2x384xf32>
    %176 = tpu.matmul %175, %9, %cst_38 {dimension_numbers = #tpu.dot_dimension_numbers<[1], [0], [0], [1], [0, 0, 1, 1], [], []>} : vector<2x128xf32>, vector<128x384xf32>, vector<2x384xf32> -> vector<2x384xf32>
    %177 = vector.broadcast %11 : vector<1x384xf32> to vector<2x384xf32>
    %178 = arith.addf %176, %177 : vector<2x384xf32>
    %179 = vector.extract_strided_slice %178 {offsets = [0, 0], sizes = [2, 256], strides = [1, 1]} : vector<2x384xf32> to vector<2x256xf32>
    %180 = vector.extract_strided_slice %154 {offsets = [0, 0], sizes = [2, 256], strides = [1, 1]} : vector<2x384xf32> to vector<2x256xf32>
    %181 = arith.addf %179, %180 : vector<2x256xf32>
    %182 = arith.negf %181 : vector<2x256xf32>
    %183 = math.exp %182 : vector<2x256xf32>
    %cst_39 = arith.constant 1.000000e+00 : f32
    %184 = vector.broadcast %cst_39 : f32 to vector<2x256xf32>
    %185 = arith.addf %184, %183 : vector<2x256xf32>
    %186 = arith.divf %184, %185 : vector<2x256xf32>
    %187 = vector.extract_strided_slice %186 {offsets = [0, 0], sizes = [2, 128], strides = [1, 1]} : vector<2x256xf32> to vector<2x128xf32>
    %188 = vector.extract_strided_slice %186 {offsets = [0, 128], sizes = [2, 128], strides = [1, 1]} : vector<2x256xf32> to vector<2x128xf32>
    %189 = vector.extract_strided_slice %178 {offsets = [0, 256], sizes = [2, 128], strides = [1, 1]} : vector<2x384xf32> to vector<2x128xf32>
    %190 = vector.extract_strided_slice %154 {offsets = [0, 256], sizes = [2, 128], strides = [1, 1]} : vector<2x384xf32> to vector<2x128xf32>
    %191 = vector.broadcast %12 : vector<1x128xf32> to vector<2x128xf32>
    %192 = arith.addf %190, %191 : vector<2x128xf32>
    %193 = arith.mulf %187, %192 : vector<2x128xf32>
    %194 = arith.addf %189, %193 : vector<2x128xf32>
    %195 = math.tanh %194 : vector<2x128xf32>
    %196 = arith.subf %152, %195 : vector<2x128xf32>
    %197 = arith.mulf %188, %196 : vector<2x128xf32>
    %198 = arith.addf %195, %197 : vector<2x128xf32>
    %cst_40 = arith.constant dense<0.000000e+00> : vector<2x384xf32>
    %199 = tpu.matmul %175, %7, %cst_40 {dimension_numbers = #tpu.dot_dimension_numbers<[1], [0], [0], [1], [0, 0, 1, 1], [], []>} : vector<2x128xf32>, vector<128x384xf32>, vector<2x384xf32> -> vector<2x384xf32>
    %cst_41 = arith.constant dense<0.000000e+00> : vector<2x384xf32>
    %200 = tpu.matmul %198, %10, %cst_41 {dimension_numbers = #tpu.dot_dimension_numbers<[1], [0], [0], [1], [0, 0, 1, 1], [], []>} : vector<2x128xf32>, vector<128x384xf32>, vector<2x384xf32> -> vector<2x384xf32>
    %201 = vector.extract_strided_slice %6 {offsets = [8, 0], sizes = [2, 384], strides = [1, 1]} : vector<16x384xf32> to vector<2x384xf32>
    %202 = vector.extract_strided_slice %201 {offsets = [0, 0], sizes = [2, 256], strides = [1, 1]} : vector<2x384xf32> to vector<2x256xf32>
    %203 = vector.extract_strided_slice %199 {offsets = [0, 0], sizes = [2, 256], strides = [1, 1]} : vector<2x384xf32> to vector<2x256xf32>
    %204 = arith.addf %202, %203 : vector<2x256xf32>
    %205 = arith.negf %204 : vector<2x256xf32>
    %206 = math.exp %205 : vector<2x256xf32>
    %cst_42 = arith.constant 1.000000e+00 : f32
    %207 = vector.broadcast %cst_42 : f32 to vector<2x256xf32>
    %208 = arith.addf %207, %206 : vector<2x256xf32>
    %209 = arith.divf %207, %208 : vector<2x256xf32>
    %210 = vector.extract_strided_slice %209 {offsets = [0, 0], sizes = [2, 128], strides = [1, 1]} : vector<2x256xf32> to vector<2x128xf32>
    %211 = vector.extract_strided_slice %209 {offsets = [0, 128], sizes = [2, 128], strides = [1, 1]} : vector<2x256xf32> to vector<2x128xf32>
    %212 = vector.extract_strided_slice %201 {offsets = [0, 256], sizes = [2, 128], strides = [1, 1]} : vector<2x384xf32> to vector<2x128xf32>
    %213 = vector.extract_strided_slice %199 {offsets = [0, 256], sizes = [2, 128], strides = [1, 1]} : vector<2x384xf32> to vector<2x128xf32>
    %214 = vector.broadcast %8 : vector<1x128xf32> to vector<2x128xf32>
    %215 = arith.addf %213, %214 : vector<2x128xf32>
    %216 = arith.mulf %210, %215 : vector<2x128xf32>
    %217 = arith.addf %212, %216 : vector<2x128xf32>
    %218 = math.tanh %217 : vector<2x128xf32>
    %219 = arith.subf %175, %218 : vector<2x128xf32>
    %220 = arith.mulf %211, %219 : vector<2x128xf32>
    %221 = arith.addf %218, %220 : vector<2x128xf32>
    %cst_43 = arith.constant dense<0.000000e+00> : vector<2x384xf32>
    %222 = tpu.matmul %221, %9, %cst_43 {dimension_numbers = #tpu.dot_dimension_numbers<[1], [0], [0], [1], [0, 0, 1, 1], [], []>} : vector<2x128xf32>, vector<128x384xf32>, vector<2x384xf32> -> vector<2x384xf32>
    %223 = vector.broadcast %11 : vector<1x384xf32> to vector<2x384xf32>
    %224 = arith.addf %222, %223 : vector<2x384xf32>
    %225 = vector.extract_strided_slice %224 {offsets = [0, 0], sizes = [2, 256], strides = [1, 1]} : vector<2x384xf32> to vector<2x256xf32>
    %226 = vector.extract_strided_slice %200 {offsets = [0, 0], sizes = [2, 256], strides = [1, 1]} : vector<2x384xf32> to vector<2x256xf32>
    %227 = arith.addf %225, %226 : vector<2x256xf32>
    %228 = arith.negf %227 : vector<2x256xf32>
    %229 = math.exp %228 : vector<2x256xf32>
    %cst_44 = arith.constant 1.000000e+00 : f32
    %230 = vector.broadcast %cst_44 : f32 to vector<2x256xf32>
    %231 = arith.addf %230, %229 : vector<2x256xf32>
    %232 = arith.divf %230, %231 : vector<2x256xf32>
    %233 = vector.extract_strided_slice %232 {offsets = [0, 0], sizes = [2, 128], strides = [1, 1]} : vector<2x256xf32> to vector<2x128xf32>
    %234 = vector.extract_strided_slice %232 {offsets = [0, 128], sizes = [2, 128], strides = [1, 1]} : vector<2x256xf32> to vector<2x128xf32>
    %235 = vector.extract_strided_slice %224 {offsets = [0, 256], sizes = [2, 128], strides = [1, 1]} : vector<2x384xf32> to vector<2x128xf32>
    %236 = vector.extract_strided_slice %200 {offsets = [0, 256], sizes = [2, 128], strides = [1, 1]} : vector<2x384xf32> to vector<2x128xf32>
    %237 = vector.broadcast %12 : vector<1x128xf32> to vector<2x128xf32>
    %238 = arith.addf %236, %237 : vector<2x128xf32>
    %239 = arith.mulf %233, %238 : vector<2x128xf32>
    %240 = arith.addf %235, %239 : vector<2x128xf32>
    %241 = math.tanh %240 : vector<2x128xf32>
    %242 = arith.subf %198, %241 : vector<2x128xf32>
    %243 = arith.mulf %234, %242 : vector<2x128xf32>
    %244 = arith.addf %241, %243 : vector<2x128xf32>
    %cst_45 = arith.constant dense<0.000000e+00> : vector<2x384xf32>
    %245 = tpu.matmul %221, %7, %cst_45 {dimension_numbers = #tpu.dot_dimension_numbers<[1], [0], [0], [1], [0, 0, 1, 1], [], []>} : vector<2x128xf32>, vector<128x384xf32>, vector<2x384xf32> -> vector<2x384xf32>
    %cst_46 = arith.constant dense<0.000000e+00> : vector<2x384xf32>
    %246 = tpu.matmul %244, %10, %cst_46 {dimension_numbers = #tpu.dot_dimension_numbers<[1], [0], [0], [1], [0, 0, 1, 1], [], []>} : vector<2x128xf32>, vector<128x384xf32>, vector<2x384xf32> -> vector<2x384xf32>
    %247 = vector.extract_strided_slice %6 {offsets = [10, 0], sizes = [2, 384], strides = [1, 1]} : vector<16x384xf32> to vector<2x384xf32>
    %248 = vector.extract_strided_slice %247 {offsets = [0, 0], sizes = [2, 256], strides = [1, 1]} : vector<2x384xf32> to vector<2x256xf32>
    %249 = vector.extract_strided_slice %245 {offsets = [0, 0], sizes = [2, 256], strides = [1, 1]} : vector<2x384xf32> to vector<2x256xf32>
    %250 = arith.addf %248, %249 : vector<2x256xf32>
    %251 = arith.negf %250 : vector<2x256xf32>
    %252 = math.exp %251 : vector<2x256xf32>
    %cst_47 = arith.constant 1.000000e+00 : f32
    %253 = vector.broadcast %cst_47 : f32 to vector<2x256xf32>
    %254 = arith.addf %253, %252 : vector<2x256xf32>
    %255 = arith.divf %253, %254 : vector<2x256xf32>
    %256 = vector.extract_strided_slice %255 {offsets = [0, 0], sizes = [2, 128], strides = [1, 1]} : vector<2x256xf32> to vector<2x128xf32>
    %257 = vector.extract_strided_slice %255 {offsets = [0, 128], sizes = [2, 128], strides = [1, 1]} : vector<2x256xf32> to vector<2x128xf32>
    %258 = vector.extract_strided_slice %247 {offsets = [0, 256], sizes = [2, 128], strides = [1, 1]} : vector<2x384xf32> to vector<2x128xf32>
    %259 = vector.extract_strided_slice %245 {offsets = [0, 256], sizes = [2, 128], strides = [1, 1]} : vector<2x384xf32> to vector<2x128xf32>
    %260 = vector.broadcast %8 : vector<1x128xf32> to vector<2x128xf32>
    %261 = arith.addf %259, %260 : vector<2x128xf32>
    %262 = arith.mulf %256, %261 : vector<2x128xf32>
    %263 = arith.addf %258, %262 : vector<2x128xf32>
    %264 = math.tanh %263 : vector<2x128xf32>
    %265 = arith.subf %221, %264 : vector<2x128xf32>
    %266 = arith.mulf %257, %265 : vector<2x128xf32>
    %267 = arith.addf %264, %266 : vector<2x128xf32>
    %cst_48 = arith.constant dense<0.000000e+00> : vector<2x384xf32>
    %268 = tpu.matmul %267, %9, %cst_48 {dimension_numbers = #tpu.dot_dimension_numbers<[1], [0], [0], [1], [0, 0, 1, 1], [], []>} : vector<2x128xf32>, vector<128x384xf32>, vector<2x384xf32> -> vector<2x384xf32>
    %269 = vector.broadcast %11 : vector<1x384xf32> to vector<2x384xf32>
    %270 = arith.addf %268, %269 : vector<2x384xf32>
    %271 = vector.extract_strided_slice %270 {offsets = [0, 0], sizes = [2, 256], strides = [1, 1]} : vector<2x384xf32> to vector<2x256xf32>
    %272 = vector.extract_strided_slice %246 {offsets = [0, 0], sizes = [2, 256], strides = [1, 1]} : vector<2x384xf32> to vector<2x256xf32>
    %273 = arith.addf %271, %272 : vector<2x256xf32>
    %274 = arith.negf %273 : vector<2x256xf32>
    %275 = math.exp %274 : vector<2x256xf32>
    %cst_49 = arith.constant 1.000000e+00 : f32
    %276 = vector.broadcast %cst_49 : f32 to vector<2x256xf32>
    %277 = arith.addf %276, %275 : vector<2x256xf32>
    %278 = arith.divf %276, %277 : vector<2x256xf32>
    %279 = vector.extract_strided_slice %278 {offsets = [0, 0], sizes = [2, 128], strides = [1, 1]} : vector<2x256xf32> to vector<2x128xf32>
    %280 = vector.extract_strided_slice %278 {offsets = [0, 128], sizes = [2, 128], strides = [1, 1]} : vector<2x256xf32> to vector<2x128xf32>
    %281 = vector.extract_strided_slice %270 {offsets = [0, 256], sizes = [2, 128], strides = [1, 1]} : vector<2x384xf32> to vector<2x128xf32>
    %282 = vector.extract_strided_slice %246 {offsets = [0, 256], sizes = [2, 128], strides = [1, 1]} : vector<2x384xf32> to vector<2x128xf32>
    %283 = vector.broadcast %12 : vector<1x128xf32> to vector<2x128xf32>
    %284 = arith.addf %282, %283 : vector<2x128xf32>
    %285 = arith.mulf %279, %284 : vector<2x128xf32>
    %286 = arith.addf %281, %285 : vector<2x128xf32>
    %287 = math.tanh %286 : vector<2x128xf32>
    %288 = arith.subf %244, %287 : vector<2x128xf32>
    %289 = arith.mulf %280, %288 : vector<2x128xf32>
    %290 = arith.addf %287, %289 : vector<2x128xf32>
    %cst_50 = arith.constant dense<0.000000e+00> : vector<2x384xf32>
    %291 = tpu.matmul %267, %7, %cst_50 {dimension_numbers = #tpu.dot_dimension_numbers<[1], [0], [0], [1], [0, 0, 1, 1], [], []>} : vector<2x128xf32>, vector<128x384xf32>, vector<2x384xf32> -> vector<2x384xf32>
    %cst_51 = arith.constant dense<0.000000e+00> : vector<2x384xf32>
    %292 = tpu.matmul %290, %10, %cst_51 {dimension_numbers = #tpu.dot_dimension_numbers<[1], [0], [0], [1], [0, 0, 1, 1], [], []>} : vector<2x128xf32>, vector<128x384xf32>, vector<2x384xf32> -> vector<2x384xf32>
    %293 = vector.extract_strided_slice %6 {offsets = [12, 0], sizes = [2, 384], strides = [1, 1]} : vector<16x384xf32> to vector<2x384xf32>
    %294 = vector.extract_strided_slice %293 {offsets = [0, 0], sizes = [2, 256], strides = [1, 1]} : vector<2x384xf32> to vector<2x256xf32>
    %295 = vector.extract_strided_slice %291 {offsets = [0, 0], sizes = [2, 256], strides = [1, 1]} : vector<2x384xf32> to vector<2x256xf32>
    %296 = arith.addf %294, %295 : vector<2x256xf32>
    %297 = arith.negf %296 : vector<2x256xf32>
    %298 = math.exp %297 : vector<2x256xf32>
    %cst_52 = arith.constant 1.000000e+00 : f32
    %299 = vector.broadcast %cst_52 : f32 to vector<2x256xf32>
    %300 = arith.addf %299, %298 : vector<2x256xf32>
    %301 = arith.divf %299, %300 : vector<2x256xf32>
    %302 = vector.extract_strided_slice %301 {offsets = [0, 0], sizes = [2, 128], strides = [1, 1]} : vector<2x256xf32> to vector<2x128xf32>
    %303 = vector.extract_strided_slice %301 {offsets = [0, 128], sizes = [2, 128], strides = [1, 1]} : vector<2x256xf32> to vector<2x128xf32>
    %304 = vector.extract_strided_slice %293 {offsets = [0, 256], sizes = [2, 128], strides = [1, 1]} : vector<2x384xf32> to vector<2x128xf32>
    %305 = vector.extract_strided_slice %291 {offsets = [0, 256], sizes = [2, 128], strides = [1, 1]} : vector<2x384xf32> to vector<2x128xf32>
    %306 = vector.broadcast %8 : vector<1x128xf32> to vector<2x128xf32>
    %307 = arith.addf %305, %306 : vector<2x128xf32>
    %308 = arith.mulf %302, %307 : vector<2x128xf32>
    %309 = arith.addf %304, %308 : vector<2x128xf32>
    %310 = math.tanh %309 : vector<2x128xf32>
    %311 = arith.subf %267, %310 : vector<2x128xf32>
    %312 = arith.mulf %303, %311 : vector<2x128xf32>
    %313 = arith.addf %310, %312 : vector<2x128xf32>
    %cst_53 = arith.constant dense<0.000000e+00> : vector<2x384xf32>
    %314 = tpu.matmul %313, %9, %cst_53 {dimension_numbers = #tpu.dot_dimension_numbers<[1], [0], [0], [1], [0, 0, 1, 1], [], []>} : vector<2x128xf32>, vector<128x384xf32>, vector<2x384xf32> -> vector<2x384xf32>
    %315 = vector.broadcast %11 : vector<1x384xf32> to vector<2x384xf32>
    %316 = arith.addf %314, %315 : vector<2x384xf32>
    %317 = vector.extract_strided_slice %316 {offsets = [0, 0], sizes = [2, 256], strides = [1, 1]} : vector<2x384xf32> to vector<2x256xf32>
    %318 = vector.extract_strided_slice %292 {offsets = [0, 0], sizes = [2, 256], strides = [1, 1]} : vector<2x384xf32> to vector<2x256xf32>
    %319 = arith.addf %317, %318 : vector<2x256xf32>
    %320 = arith.negf %319 : vector<2x256xf32>
    %321 = math.exp %320 : vector<2x256xf32>
    %cst_54 = arith.constant 1.000000e+00 : f32
    %322 = vector.broadcast %cst_54 : f32 to vector<2x256xf32>
    %323 = arith.addf %322, %321 : vector<2x256xf32>
    %324 = arith.divf %322, %323 : vector<2x256xf32>
    %325 = vector.extract_strided_slice %324 {offsets = [0, 0], sizes = [2, 128], strides = [1, 1]} : vector<2x256xf32> to vector<2x128xf32>
    %326 = vector.extract_strided_slice %324 {offsets = [0, 128], sizes = [2, 128], strides = [1, 1]} : vector<2x256xf32> to vector<2x128xf32>
    %327 = vector.extract_strided_slice %316 {offsets = [0, 256], sizes = [2, 128], strides = [1, 1]} : vector<2x384xf32> to vector<2x128xf32>
    %328 = vector.extract_strided_slice %292 {offsets = [0, 256], sizes = [2, 128], strides = [1, 1]} : vector<2x384xf32> to vector<2x128xf32>
    %329 = vector.broadcast %12 : vector<1x128xf32> to vector<2x128xf32>
    %330 = arith.addf %328, %329 : vector<2x128xf32>
    %331 = arith.mulf %325, %330 : vector<2x128xf32>
    %332 = arith.addf %327, %331 : vector<2x128xf32>
    %333 = math.tanh %332 : vector<2x128xf32>
    %334 = arith.subf %290, %333 : vector<2x128xf32>
    %335 = arith.mulf %326, %334 : vector<2x128xf32>
    %336 = arith.addf %333, %335 : vector<2x128xf32>
    %cst_55 = arith.constant dense<0.000000e+00> : vector<2x384xf32>
    %337 = tpu.matmul %313, %7, %cst_55 {dimension_numbers = #tpu.dot_dimension_numbers<[1], [0], [0], [1], [0, 0, 1, 1], [], []>} : vector<2x128xf32>, vector<128x384xf32>, vector<2x384xf32> -> vector<2x384xf32>
    %cst_56 = arith.constant dense<0.000000e+00> : vector<2x384xf32>
    %338 = tpu.matmul %336, %10, %cst_56 {dimension_numbers = #tpu.dot_dimension_numbers<[1], [0], [0], [1], [0, 0, 1, 1], [], []>} : vector<2x128xf32>, vector<128x384xf32>, vector<2x384xf32> -> vector<2x384xf32>
    %339 = vector.extract_strided_slice %6 {offsets = [14, 0], sizes = [2, 384], strides = [1, 1]} : vector<16x384xf32> to vector<2x384xf32>
    %340 = vector.extract_strided_slice %339 {offsets = [0, 0], sizes = [2, 256], strides = [1, 1]} : vector<2x384xf32> to vector<2x256xf32>
    %341 = vector.extract_strided_slice %337 {offsets = [0, 0], sizes = [2, 256], strides = [1, 1]} : vector<2x384xf32> to vector<2x256xf32>
    %342 = arith.addf %340, %341 : vector<2x256xf32>
    %343 = arith.negf %342 : vector<2x256xf32>
    %344 = math.exp %343 : vector<2x256xf32>
    %cst_57 = arith.constant 1.000000e+00 : f32
    %345 = vector.broadcast %cst_57 : f32 to vector<2x256xf32>
    %346 = arith.addf %345, %344 : vector<2x256xf32>
    %347 = arith.divf %345, %346 : vector<2x256xf32>
    %348 = vector.extract_strided_slice %347 {offsets = [0, 0], sizes = [2, 128], strides = [1, 1]} : vector<2x256xf32> to vector<2x128xf32>
    %349 = vector.extract_strided_slice %347 {offsets = [0, 128], sizes = [2, 128], strides = [1, 1]} : vector<2x256xf32> to vector<2x128xf32>
    %350 = vector.extract_strided_slice %339 {offsets = [0, 256], sizes = [2, 128], strides = [1, 1]} : vector<2x384xf32> to vector<2x128xf32>
    %351 = vector.extract_strided_slice %337 {offsets = [0, 256], sizes = [2, 128], strides = [1, 1]} : vector<2x384xf32> to vector<2x128xf32>
    %352 = vector.broadcast %8 : vector<1x128xf32> to vector<2x128xf32>
    %353 = arith.addf %351, %352 : vector<2x128xf32>
    %354 = arith.mulf %348, %353 : vector<2x128xf32>
    %355 = arith.addf %350, %354 : vector<2x128xf32>
    %356 = math.tanh %355 : vector<2x128xf32>
    %357 = arith.subf %313, %356 : vector<2x128xf32>
    %358 = arith.mulf %349, %357 : vector<2x128xf32>
    %359 = arith.addf %356, %358 : vector<2x128xf32>
    %cst_58 = arith.constant dense<0.000000e+00> : vector<2x384xf32>
    %360 = tpu.matmul %359, %9, %cst_58 {dimension_numbers = #tpu.dot_dimension_numbers<[1], [0], [0], [1], [0, 0, 1, 1], [], []>} : vector<2x128xf32>, vector<128x384xf32>, vector<2x384xf32> -> vector<2x384xf32>
    %361 = vector.broadcast %11 : vector<1x384xf32> to vector<2x384xf32>
    %362 = arith.addf %360, %361 : vector<2x384xf32>
    %363 = vector.extract_strided_slice %362 {offsets = [0, 0], sizes = [2, 256], strides = [1, 1]} : vector<2x384xf32> to vector<2x256xf32>
    %364 = vector.extract_strided_slice %338 {offsets = [0, 0], sizes = [2, 256], strides = [1, 1]} : vector<2x384xf32> to vector<2x256xf32>
    %365 = arith.addf %363, %364 : vector<2x256xf32>
    %366 = arith.negf %365 : vector<2x256xf32>
    %367 = math.exp %366 : vector<2x256xf32>
    %cst_59 = arith.constant 1.000000e+00 : f32
    %368 = vector.broadcast %cst_59 : f32 to vector<2x256xf32>
    %369 = arith.addf %368, %367 : vector<2x256xf32>
    %370 = arith.divf %368, %369 : vector<2x256xf32>
    %371 = vector.extract_strided_slice %370 {offsets = [0, 0], sizes = [2, 128], strides = [1, 1]} : vector<2x256xf32> to vector<2x128xf32>
    %372 = vector.extract_strided_slice %370 {offsets = [0, 128], sizes = [2, 128], strides = [1, 1]} : vector<2x256xf32> to vector<2x128xf32>
    %373 = vector.extract_strided_slice %362 {offsets = [0, 256], sizes = [2, 128], strides = [1, 1]} : vector<2x384xf32> to vector<2x128xf32>
    %374 = vector.extract_strided_slice %338 {offsets = [0, 256], sizes = [2, 128], strides = [1, 1]} : vector<2x384xf32> to vector<2x128xf32>
    %375 = vector.broadcast %12 : vector<1x128xf32> to vector<2x128xf32>
    %376 = arith.addf %374, %375 : vector<2x128xf32>
    %377 = arith.mulf %371, %376 : vector<2x128xf32>
    %378 = arith.addf %373, %377 : vector<2x128xf32>
    %379 = math.tanh %378 : vector<2x128xf32>
    %380 = arith.subf %336, %379 : vector<2x128xf32>
    %381 = arith.mulf %372, %380 : vector<2x128xf32>
    %382 = arith.addf %379, %381 : vector<2x128xf32>
    %c0_60 = arith.constant 0 : index
    %c0_61 = arith.constant 0 : index
    %383 = vector.load %arg10[%c0_60, %c0_61] : memref<128x128xf32, #tpu.memory_space<vmem>>, vector<128x128xf32>
    %cst_62 = arith.constant dense<0.000000e+00> : vector<2x128xf32>
    %384 = tpu.matmul %382, %383, %cst_62 {dimension_numbers = #tpu.dot_dimension_numbers<[1], [0], [0], [1], [0, 0, 1, 1], [], []>} : vector<2x128xf32>, vector<128x128xf32>, vector<2x128xf32> -> vector<2x128xf32>
    %c0_63 = arith.constant 0 : index
    %c0_64 = arith.constant 0 : index
    %385 = vector.load %arg11[%c0_63, %c0_64] : memref<1x128xf32, #tpu.memory_space<vmem>>, vector<1x128xf32>
    %386 = vector.broadcast %385 : vector<1x128xf32> to vector<2x128xf32>
    %387 = arith.addf %384, %386 : vector<2x128xf32>
    %cst_65 = arith.constant dense<0xFF800000> : vector<2xf32>
    %388 = vector.multi_reduction <maximumf>, %387, %cst_65 [1] : vector<2x128xf32> to vector<2xf32>
    %389 = vector.shape_cast %388 : vector<2xf32> to vector<2x1xf32>
    %390 = vector.broadcast %389 : vector<2x1xf32> to vector<2x128xf32>
    %391 = arith.subf %387, %390 : vector<2x128xf32>
    %392 = math.exp %391 : vector<2x128xf32>
    %cst_66 = arith.constant dense<0.000000e+00> : vector<2xf32>
    %393 = vector.multi_reduction <add>, %392, %cst_66 [1] : vector<2x128xf32> to vector<2xf32>
    %394 = vector.shape_cast %393 : vector<2xf32> to vector<2x1xf32>
    %395 = math.log %394 : vector<2x1xf32>
    %396 = vector.broadcast %395 : vector<2x1xf32> to vector<2x128xf32>
    %397 = arith.subf %391, %396 : vector<2x128xf32>
    %c0_67 = arith.constant 0 : index
    %c0_68 = arith.constant 0 : index
    %398 = vector.load %arg12[%c0_67, %c0_68] : memref<2x128xf32, #tpu.memory_space<vmem>>, vector<2x128xf32>
    tpu.vector_store %arg12[%c0_67, %c0_68], %397 {strides = array<i32>} : memref<2x128xf32, #tpu.memory_space<vmem>>, vector<2x128xf32>,
    return
  }
  func.func @transform_0(%arg0: i32) -> (i32, i32, i32) {
    %c0_i32 = arith.constant 0 : i32
    %c0_i32_0 = arith.constant 0 : i32
    %c0_i32_1 = arith.constant 0 : i32
    return %c0_i32, %arg0, %c0_i32_0 : i32, i32, i32
  }
  func.func @transform_1(%arg0: i32) -> (i32, i32) {
    %c0_i32 = arith.constant 0 : i32
    %c0_i32_0 = arith.constant 0 : i32
    %c0_i32_1 = arith.constant 0 : i32
    return %c0_i32, %c0_i32_0 : i32, i32
  }
  func.func @transform_2(%arg0: i32) -> (i32, i32) {
    %c0_i32 = arith.constant 0 : i32
    %c0_i32_0 = arith.constant 0 : i32
    %c0_i32_1 = arith.constant 0 : i32
    return %c0_i32, %c0_i32_0 : i32, i32
  }
  func.func @transform_3(%arg0: i32) -> (i32, i32) {
    %c0_i32 = arith.constant 0 : i32
    %c0_i32_0 = arith.constant 0 : i32
    %c0_i32_1 = arith.constant 0 : i32
    return %c0_i32, %c0_i32_0 : i32, i32
  }
  func.func @transform_4(%arg0: i32) -> (i32, i32) {
    %c0_i32 = arith.constant 0 : i32
    %c0_i32_0 = arith.constant 0 : i32
    %c0_i32_1 = arith.constant 0 : i32
    return %c0_i32, %c0_i32_0 : i32, i32
  }
  func.func @transform_5(%arg0: i32) -> (i32, i32) {
    %c0_i32 = arith.constant 0 : i32
    %c0_i32_0 = arith.constant 0 : i32
    %c0_i32_1 = arith.constant 0 : i32
    return %c0_i32, %c0_i32_0 : i32, i32
  }
  func.func @transform_6(%arg0: i32) -> (i32, i32) {
    %c0_i32 = arith.constant 0 : i32
    %c0_i32_0 = arith.constant 0 : i32
    %c0_i32_1 = arith.constant 0 : i32
    return %c0_i32, %c0_i32_0 : i32, i32
  }
  func.func @transform_7(%arg0: i32) -> (i32, i32) {
    %c0_i32 = arith.constant 0 : i32
    %c0_i32_0 = arith.constant 0 : i32
    %c0_i32_1 = arith.constant 0 : i32
    return %c0_i32, %c0_i32_0 : i32, i32
  }
  func.func @transform_8(%arg0: i32) -> (i32, i32) {
    %c0_i32 = arith.constant 0 : i32
    %c0_i32_0 = arith.constant 0 : i32
    %c0_i32_1 = arith.constant 0 : i32
    return %c0_i32, %c0_i32_0 : i32, i32
  }
  func.func @transform_9(%arg0: i32) -> (i32, i32) {
    %c0_i32 = arith.constant 0 : i32
    %c0_i32_0 = arith.constant 0 : i32
    %c0_i32_1 = arith.constant 0 : i32
    return %c0_i32, %c0_i32_0 : i32, i32
  }
  func.func @transform_10(%arg0: i32) -> (i32, i32) {
    %c0_i32 = arith.constant 0 : i32
    %c0_i32_0 = arith.constant 0 : i32
    %c0_i32_1 = arith.constant 0 : i32
    return %c0_i32, %c0_i32_0 : i32, i32
  }
  func.func @transform_11(%arg0: i32) -> (i32, i32) {
    %c0_i32 = arith.constant 0 : i32
    %c0_i32_0 = arith.constant 0 : i32
    return %arg0, %c0_i32 : i32, i32
  }
}

</mosaic_0001>

<bundles_post_ra>
// kernel: mygru_forward.1
= control target key start
LH: loop header
LB: loop body
LE: loop exit
PB: predicated region body
PF: predicated region fallthrough
CT: control target
= control target key end

     0   :  { %16 = vsyncpa [#allocation3], 0  ;;  %s6320_s0 = inlined_call_operand.vmem [shape: f32[8,2,16], index: 0, kind: input, shape index: {}]   ;;  %s6321_s1 = inlined_call_operand.hbm [shape: f32[16,384], index: 1, kind: input, shape index: {}]   ;;  %s6322_s2 = inlined_call_operand.hbm [shape: f32[128,384], index: 2, kind: input, shape index: {}]   ;;  %s6323_s3 = inlined_call_operand.vmem [shape: f32[1,384], index: 3, kind: input, shape index: {}]   ;;  %s6324_s4 = inlined_call_operand.vmem [shape: f32[1,128], index: 4, kind: input, shape index: {}]   ;;  %s6325_s5 = inlined_call_operand.hbm [shape: f32[128,384], index: 5, kind: input, shape index: {}]   ;;  %s6326_s6 = inlined_call_operand.hbm [shape: f32[128,384], index: 6, kind: input, shape index: {}]   ;;  %s6327_s7 = inlined_call_operand.vmem [shape: f32[1,384], index: 7, kind: input, shape index: {}]   ;;  %s6328_s8 = inlined_call_operand.vmem [shape: f32[1,128], index: 8, kind: input, shape index: {}]   ;;  %s6329_s9 = inlined_call_operand.hbm [shape: f32[128,128], index: 9, kind: input, shape index: {}]   ;;  %s6330_s10 = inlined_call_operand.vmem [shape: f32[1,128], index: 10, kind: input, shape index: {}]   ;;  %s6331_s11 = inlined_call_operand.hbm [shape: f32[2,128], index: 11, kind: output, shape index: {}]  }
   0x1   :  { %17 = vsyncpa [#allocation6], 0 }
   0x2   :  { %18 = vsyncpa [#allocation9], 0 }
   0x3   :  { %19 = vsyncpa [#allocation4], 0  ;;  %s39_s19 = sshll.u32 %s6322_s2, 4  ;;  %s3582_s20 = smov [#allocation5]   ;;  %s40_s19 = int_to_ptr.hbm [resolvable:$true] %s39_s19 }
   0x4   :  { %s41_s21 = sshll.u32 %s3582_s20, 4  ;;  %s69_s24 = sshll.u32 %s6326_s6, 4  ;;  %s42_s21 = int_to_ptr.vmem [resolvable:$true] %s41_s21  ;;  %s70_s24 = int_to_ptr.hbm [resolvable:$true] %s69_s24 }
   0x5   :  { %s3583_s25 = smov 384   ;;  %s3584_s26 = smov 24  }
   0x6   :  { %47 = dma.hbm_to_vmem [thread:$0]  %s40_s19, 6144, %s42_s21, [#allocation6], %s3583_s25, %s3583_s25, %s3584_s26  }
   0x7   :  { %s3585_s27 = smov [#allocation8]   ;;  %s26_s12 = sshll.u32 %s6321_s1, 4  ;;  %s27_s12 = int_to_ptr.hbm [resolvable:$true] %s26_s12 }
   0x8   :  { %s71_s28 = sshll.u32 %s3585_s27, 4  ;;  %s56_s14 = sshll.u32 %s6325_s5, 4  ;;  %s72_s28 = int_to_ptr.vmem [resolvable:$true] %s71_s28  ;;  %s57_s14 = int_to_ptr.hbm [resolvable:$true] %s56_s14 }
   0x9   :  { %77 = dma.hbm_to_vmem [thread:$0]  %s70_s24, 6144, %s72_s28, [#allocation9], %s3583_s25, %s3583_s25, %s3584_s26  }
   0xa   :  { %s3586_s15 = smov [#allocation2]   ;;  %s3587_s6 = smov [#allocation7]  }
   0xb   :  { %s28_s16 = sshll.u32 %s3586_s15, 4  ;;  %s58_s17 = sshll.u32 %s3587_s6, 4  ;;  %s29_s16 = int_to_ptr.vmem [resolvable:$true] %s28_s16  ;;  %s59_s17 = int_to_ptr.vmem [resolvable:$true] %s58_s17 }
   0xc   :  { %34 = dma.hbm_to_vmem [thread:$0]  %s27_s12, 768, %s29_s16, [#allocation3], %s3583_s25, %s3583_s25, %s3584_s26  }
   0xd   :  { %s86_s20 = sshll.u32 %s6329_s9, 4  ;;  %s3588_s1 = smov [#allocation10]   ;;  %s87_s20 = int_to_ptr.hbm [resolvable:$true] %s86_s20 }
   0xe   :  { %64 = dma.hbm_to_vmem [thread:$0]  %s57_s14, 6144, %s59_s17, [#allocation6], %s3583_s25, %s3583_s25, %s3584_s26  }
   0xf   :  { %s88_s21 = sshll.u32 %s3588_s1, 4  ;;  %s3589_s22 = smov 128   ;;  %s89_s21 = int_to_ptr.vmem [resolvable:$true] %s88_s21 }
  0x10   :  { %s3590_s23 = smov 8  }
  0x11   :  { %94 = dma.hbm_to_vmem [thread:$0]  %s87_s20, 2048, %s89_s21, [#allocation9], %s3589_s22, %s3589_s22, %s3590_s23  }
  0x12   :  { %3574 = dma.done.wait [#allocation3], 768  }
  0x13   :  { %3575 = vsyncadd [#allocation3], 4294966528 }
  0x14   :  { %3576 = dma.done.wait [#allocation6], 12288  }
  0x15   :  { %3577 = vsyncadd [#allocation6], 4294955008 }
  0x16   :  { %3578 = dma.done.wait [#allocation9], 8192  }
  0x17   :  { %3579 = vsyncadd [#allocation9], 4294959104  ;;  %v3668_v0 = vld [vmem:[#allocation5 + $0x168] sm:$0xff]  ;;  %v3670_v1 = vld [vmem:[#allocation5 + $0x150] sm:$0xff]  ;;  %vm164_vm0 = vcmask 130048   ;;  %v6334_v57 = vmov 0.0  }
  0x18   :  { %v128_v2 = vld [vmem:[#allocation2 + $0x18] sm:$0xff]  ;;  %385 = vmatpush.msra.mxu3 %v3668_v0  ;;  %v125_v3 = vld [vmem:[#allocation2] sm:$0xff]  ;;  %v3673_v4 = vld [vmem:[#allocation5 + $0x138] sm:$0xff]  ;;  %s3592_s29 = smov [#allocation11]  }
  0x19   :  { %183 = vmatpush.msra.mxu0 %v128_v2  ;;  %v3675_v5 = vld [vmem:[#allocation5 + $0x170] sm:$0xff]  ;;  %v3678_v6 = vld [vmem:[#allocation5 + $0x158] sm:$0xff]  ;;  %v3680_v7 = vld [vmem:[#allocation5 + $0x120] sm:$0xff]  ;;  %s2763_s30 = sshll.u32 %s3592_s29, 4  ;;  %s2764_s30 = int_to_ptr.vmem [resolvable:$true] %s2763_s30 }
  0x1a   :  { %386 = vmatpush.msra.mxu3 %v3670_v1  ;;  %v3684_v8 = vld [vmem:[#allocation5 + $0x140] sm:$0xff]  ;;  %v3686_v9 = vld [vmem:[#allocation5 + $0x108] sm:$0xff]  ;;  %v3701_v14 = vld [vmem:[#allocation5 + $0xf0] sm:$0xff] }
  0x1b   :  { %184 = vmatpush.msra.mxu0 %v125_v3  ;;  %v3689_v10 = vld [vmem:[#allocation5 + $0x128] sm:$0xff]  ;;  %v3708_v16 = vld [vmem:[#allocation5 + $0x110] sm:$0xff]  ;;  %v3710_v17 = vld [vmem:[#allocation5 + $0xd8] sm:$0xff] }
  0x1c   :  { %387 = vmatpush.msra.mxu3 %v3673_v4  ;;  %v117_v11 = vld [vmem:[%s6320_s0] sm:$0x3]  ;;  %v118_v12 = vld [vmem:[%s6320_s0 + $0x2] sm:$0x3]  ;;  %v119_v13 = vld [vmem:[%s6320_s0 + $0x4] sm:$0x3] }
  0x1d   :  { %405 = vmatpush.msrb.mxu0 %v3675_v5  ;;  %v120_v15 = vld [vmem:[%s6320_s0 + $0x6] sm:$0x3]  ;;  %147 = vst [vmem:[#allocation1] ss:$4 sm:$0xff] %v117_v11  ;;  %v3713_v18 = vld [vmem:[#allocation5 + $0xc0] sm:$0xff]  ;;  %v3715_v19 = vld [vmem:[#allocation5 + $0xf8] sm:$0xff] }
  0x1e   :  { %388 = vmatpush.msra.mxu3 %v3680_v7  ;;  %149 = vst [vmem:[#allocation1 + $0x1] ss:$4 sm:$0xff] %v118_v12  ;;  %v121_v20 = vld [vmem:[%s6320_s0 + $0x8] sm:$0x3]  ;;  %v122_v21 = vld [vmem:[%s6320_s0 + $0xa] sm:$0x3] }
  0x1f   :  { %406 = vmatpush.msrb.mxu0 %v3678_v6  ;;  %151 = vst [vmem:[#allocation1 + $0x2] ss:$4 sm:$0xff] %v119_v13  ;;  %v123_v22 = vld [vmem:[%s6320_s0 + $0xc] sm:$0x3]  ;;  %v124_v23 = vld [vmem:[%s6320_s0 + $0xe] sm:$0x3] }
  0x20   :  { %389 = vmatpush.msra.mxu3 %v3686_v9  ;;  %153 = vst [vmem:[#allocation1 + $0x3] ss:$4 sm:$0xff] %v120_v15  ;;  %v3732_v24 = vld [vmem:[#allocation5 + $0xe0] sm:$0xff]  ;;  %v129_v25 = vld [vmem:[#allocation2 + $0x20] sm:$0xff]  ;;  %v3734_v26 = vld [vmem:[#allocation5 + $0xa8] sm:$0xff] }
  0x21   :  { %407 = vmatpush.msrb.mxu0 %v3684_v8  ;;  %155 = vst [vmem:[#allocation1 + $0x20] ss:$4 sm:$0xff] %v121_v20  ;;  %206 = vmatpush.msra.mxu1 %v129_v25  ;;  %v126_v27 = vld [vmem:[#allocation2 + $0x8] sm:$0xff]  ;;  %v3738_v28 = vld [vmem:[#allocation5 + $0xc8] sm:$0xff]  ;;  %v3742_v30 = vld [vmem:[#allocation5 + $0x90] sm:$0xff] }
  0x22   :  { %390 = vmatpush.msra.mxu3 %v3701_v14  ;;  %157 = vst [vmem:[#allocation1 + $0x21] ss:$4 sm:$0xff] %v122_v21  ;;  %v3740_v29 = vld [vmem:[#allocation5 + $0x178] sm:$0xff]  ;;  %v3746_v31 = vld [vmem:[#allocation5 + $0xb0] sm:$0xff]  ;;  %v3752_v34 = vld [vmem:[#allocation5 + $0x160] sm:$0xff] }
  0x23   :  { %408 = vmatpush.msrb.mxu0 %v3689_v10  ;;  %159 = vst [vmem:[#allocation1 + $0x22] ss:$4 sm:$0xff] %v123_v22  ;;  %207 = vmatpush.msra.mxu1 %v126_v27  ;;  %v3749_v32 = vld [vmem:[#allocation5 + $0x78] sm:$0xff]  ;;  %v3758_v37 = vld [vmem:[#allocation5 + $0x60] sm:$0xff]  ;;  %v3762_v38 = vld [vmem:[#allocation5 + $0x148] sm:$0xff] }
  0x24   :  { %391 = vmatpush.msra.mxu3 %v3710_v17  ;;  %161 = vst [vmem:[#allocation1 + $0x23] ss:$4 sm:$0xff] %v124_v23  ;;  %v3756_v35 = vld [vmem:[#allocation5 + $0x98] sm:$0xff]  ;;  %v3765_v39 = vld [vmem:[#allocation5 + $0x80] sm:$0xff]  ;;  %v3768_v41 = vld [vmem:[#allocation5 + $0x48] sm:$0xff] }
  0x25   :  { %409 = vmatpush.msrb.mxu0 %v3708_v16  ;;  %425 = vmatpush.msrb.mxu1 %v3740_v29  ;;  %v130_v36 = vld [vmem:[#allocation2 + $0x28] sm:$0xff]  ;;  %v127_v40 = vld [vmem:[#allocation2 + $0x10] sm:$0xff]  ;;  %v3771_v42 = vld [vmem:[#allocation5 + $0x130] sm:$0xff] }
  0x26   :  { %392 = vmatpush.msra.mxu3 %v3713_v18  ;;  %229 = vmatpush.msra.mxu2 %v130_v36  ;;  %v3774_v43 = vld [vmem:[#allocation5 + $0x68] sm:$0xff]  ;;  %v3777_v44 = vld [vmem:[#allocation5 + $0x30] sm:$0xff]  ;;  %v3784_v47 = vld [vmem:[#allocation5 + $0x118] sm:$0xff] }
  0x27   :  { %410 = vmatpush.msrb.mxu0 %v3715_v19  ;;  %v162_v33 = vld.sshfl [vmem:[#allocation1] sm:$0xff pattern:$0x73625140]  ;;  %426 = vmatpush.msrb.mxu1 %v3752_v34  ;;  %v3781_v46 = vld [vmem:[#allocation5 + $0x50] sm:$0xff]  ;;  %v3786_v48 = vld [vmem:[#allocation5 + $0x18] sm:$0xff] }
  0x28   :  { %393 = vmatpush.msra.mxu3 %v3734_v26  ;;  %2777 = vmatmul.msk.f32.vlgmr.msra.gmra.mxu0 %vm164_vm0, %v162_v33  ;;  %v3792_v49 = vld [vmem:[#allocation5 + $0x38] sm:$0xff]  ;;  %v3794_v50 = vld [vmem:[#allocation5 + $0x100] sm:$0xff]  ;;  %v3800_v52 = vld [vmem:[#allocation8 + $0x168] sm:$0xff] }
  0x29   :  { %411 = vmatpush.msrb.mxu0 %v3732_v24  ;;  %2779 = vmatmul.msk.f32.vlgmr.msra.gmra.mxu1 %vm164_vm0, %v162_v33  ;;  %v3796_v51 = vld [vmem:[#allocation5] sm:$0xff]  ;;  %v3808_v54 = vld [vmem:[#allocation5 + $0xe8] sm:$0xff]  ;;  %v3810_v55 = vld [vmem:[#allocation8 + $0x150] sm:$0xff] }
  0x2a   :  { %394 = vmatpush.msra.mxu3 %v3742_v30  ;;  %427 = vmatpush.msrb.mxu1 %v3762_v38  ;;  %v3803_v53 = vld [vmem:[#allocation5 + $0x20] sm:$0xff]  ;;  %v3813_v56 = vld [vmem:[#allocation5 + $0x8] sm:$0xff]  ;;  %v3818_v58 = vld [vmem:[#allocation5 + $0xd0] sm:$0xff] }
  0x2b   :  { %412 = vmatpush.msrb.mxu0 %v3738_v28  ;;  %v163_v45 = vld.sshfl [vmem:[#allocation1 + $0x20] sm:$0xff pattern:$0x73625140]  ;;  %230 = vmatpush.msra.mxu2 %v127_v40  ;;  %6665 = vst [vmem:[#allocation16_spill] sm:$0xff] %v3803_v53  ;;  %v3822_v59 = vld [vmem:[#allocation8 + $0x138] sm:$0xff]  ;;  %v3830_v61 = vld [vmem:[#allocation8 + $0x120] sm:$0xff] }
  0x2c   :  { %395 = vmatpush.msra.mxu3 %v3749_v32  ;;  %428 = vmatpush.msrb.mxu1 %v3771_v42  ;;  %6666 = vst [vmem:[#allocation17_spill] sm:$0xff] %v3813_v56  ;;  %v3825_v60 = vld [vmem:[#allocation5 + $0xb8] sm:$0xff]  ;;  %v3832_v62 = vld [vmem:[#allocation5 + $0xa0] sm:$0xff]  ;;  %v3836_v63 = vld [vmem:[#allocation8 + $0x108] sm:$0xff] }
  0x2d   :  { %413 = vmatpush.msrb.mxu0 %v3746_v31  ;;  %2781 = vmatmul.msk.f32.vlgmr.msra.gmra.mxu2 %vm164_vm0, %v162_v33  ;;  %6667 = vst [vmem:[#allocation18_spill] sm:$0xff] %v3830_v61  ;;  %v3838_v2 = vld [vmem:[#allocation5 + $0x88] sm:$0xff]  ;;  %v3842_v3 = vld [vmem:[#allocation8 + $0xf0] sm:$0xff]  ;;  %v3848_v12 = vld [vmem:[#allocation8 + $0xd8] sm:$0xff] }
  0x2e   :  { %396 = vmatpush.msra.mxu3 %v3758_v37  ;;  %429 = vmatpush.msrb.mxu1 %v3784_v47  ;;  %6668 = vst [vmem:[#allocation19_spill] sm:$0xff] %v3836_v63  ;;  %v3844_v11 = vld [vmem:[#allocation5 + $0x70] sm:$0xff]  ;;  %v3850_v13 = vld [vmem:[#allocation5 + $0x58] sm:$0xff]  ;;  %v3854_v15 = vld [vmem:[#allocation8 + $0xc0] sm:$0xff] }
  0x2f   :  { %414 = vmatpush.msrb.mxu0 %v3756_v35  ;;  %445 = vmatpush.msrb.mxu2 %v3800_v52  ;;  %6669 = vst [vmem:[#allocation20_spill] sm:$0xff] %v3842_v3  ;;  %v3856_v20 = vld [vmem:[#allocation5 + $0x40] sm:$0xff]  ;;  %v3860_v21 = vld [vmem:[#allocation8 + $0xa8] sm:$0xff]  ;;  %v3866_v23 = vld [vmem:[#allocation8 + $0x90] sm:$0xff] }
  0x30   :  { %397 = vmatpush.msra.mxu3 %v3768_v41  ;;  %2778 = vmatmul.msk.f32.gmra.mxu0 %vm164_vm0, %v163_v45  ;;  %6670 = vst [vmem:[#allocation21_spill] sm:$0xff] %v3848_v12  ;;  %v3862_v22 = vld [vmem:[#allocation5 + $0x28] sm:$0xff]  ;;  %v3868_v25 = vld [vmem:[#allocation5 + $0x10] sm:$0xff]  ;;  %v3872_v27 = vld [vmem:[#allocation8 + $0x78] sm:$0xff] }
  0x31   :  { %415 = vmatpush.msrb.mxu0 %v3765_v39  ;;  %2780 = vmatmul.msk.f32.gmra.mxu1 %vm164_vm0, %v163_v45  ;;  %6671 = vst [vmem:[#allocation22_spill] sm:$0xff] %v3854_v15  ;;  %v3878_v33 = vld [vmem:[#allocation8 + $0x60] sm:$0xff]  ;;  %v3880_v36 = vld [vmem:[#allocation8 + $0x170] sm:$0xff]  ;;  %v3882_v40 = vld [vmem:[#allocation8 + $0x178] sm:$0xff] }
  0x32   :  { %398 = vmatpush.msra.mxu3 %v3777_v44  ;;  %430 = vmatpush.msrb.mxu1 %v3794_v50  ;;  %6672 = vst [vmem:[#allocation23_spill] sm:$0xff] %v3860_v21 }
  0x33   :  { %416 = vmatpush.msrb.mxu0 %v3774_v43  ;;  %446 = vmatpush.msrb.mxu2 %v3810_v55  ;;  %6673 = vst [vmem:[#allocation24_spill] sm:$0xff] %v3862_v22 }
  0x34   :  { %399 = vmatpush.msra.mxu3 %v3786_v48  ;;  %431 = vmatpush.msrb.mxu1 %v3808_v54  ;;  %6674 = vst [vmem:[#allocation25_spill] sm:$0xff] %v3866_v23 }
  0x35   :  { %417 = vmatpush.msrb.mxu0 %v3781_v46  ;;  %2782 = vmatmul.msk.f32.gmra.mxu2 %vm164_vm0, %v163_v45  ;;  %6675 = vst [vmem:[#allocation26_spill] sm:$0xff] %v3868_v25  ;;  %v3886_v45 = vld [vmem:[#allocation8 + $0x48] sm:$0xff] }
  0x36   :  { %400 = vmatpush.msra.mxu3 %v3796_v51  ;;  %432 = vmatpush.msrb.mxu1 %v3818_v58  ;;  %6676 = vst [vmem:[#allocation27_spill] sm:$0xff] %v3872_v27 }
  0x37   :  { %418 = vmatpush.msrb.mxu0 %v3792_v49  ;;  %401 = vmatmul.f32.vlgmr.msra.gmra.mxu3 %v6334_v57  ;;  %6677 = vst [vmem:[#allocation28_spill] sm:$0xff] %v3878_v33 }
  0x38   :  { %447 = vmatpush.msrb.mxu2 %v3822_v59  ;;  %433 = vmatpush.msrb.mxu1 %v3825_v60  ;;  %6678 = vst [vmem:[#allocation29_spill] sm:$0xff] %v3882_v40 }
  0x39   :  { %419 = vmatpush.msrb.mxu0 %v3803_v53  ;;  %465 = vmatpush.msrb.mxu3 %v3880_v36  ;;  %6679 = vst [vmem:[#allocation30_spill] sm:$0xff] %v3886_v45 }
  0x3a   :  { %448 = vmatpush.msrb.mxu2 %v3830_v61  ;;  %434 = vmatpush.msrb.mxu1 %v3832_v62  ;;  %v4083_v61 = vld [vmem:[#allocation7 + $0x38] sm:$0xff] }
  0x3b   :  { %420 = vmatpush.msrb.mxu0 %v3813_v56  ;;  %v3942_v56 = vld [vmem:[#allocation7 + $0x138] sm:$0xff]  ;;  %6742 = vst [vmem:[#allocation92_spill] sm:$0xff] %v4083_v61 }
  0x3c   :  { %421 = vmatmul.f32.vlgmr.msrb.gmra.mxu0 %v6334_v57  ;;  %449 = vmatpush.msrb.mxu2 %v3836_v63  ;;  %v3928_v63 = vld [vmem:[#allocation8 + $0x100] sm:$0xff]  ;;  %6697 = vst [vmem:[#allocation48_spill] sm:$0xff] %v3942_v56 }
  0x3d   :  { %435 = vmatpush.msrb.mxu1 %v3838_v2  ;;  %485 = vmatpush.msra.mxu0 %v3882_v40  ;;  %v3908_v40 = vld [vmem:[#allocation8 + $0x128] sm:$0xff]  ;;  %6692 = vst [vmem:[#allocation43_spill] sm:$0xff] %v3928_v63 }
  0x3e   :  { %450 = vmatpush.msrb.mxu2 %v3842_v3  ;;  %6684 = vst [vmem:[#allocation35_spill] sm:$0xff] %v3908_v40  ;;  %v3918_v3 = vld [vmem:[#allocation8 + $0x118] sm:$0xff] }
  0x3f   :  { %436 = vmatpush.msrb.mxu1 %v3844_v11  ;;  %6688 = vst [vmem:[#allocation39_spill] sm:$0xff] %v3918_v3 }
  0x40   :  { %451 = vmatpush.msrb.mxu2 %v3848_v12  ;;  %v3910_v12 = vld [vmem:[#allocation8 + $0x130] sm:$0xff] }
  0x41   :  { %437 = vmatpush.msrb.mxu1 %v3850_v13  ;;  %6685 = vst [vmem:[#allocation36_spill] sm:$0xff] %v3910_v12 }
  0x42   :  { %452 = vmatpush.msrb.mxu2 %v3854_v15  ;;  %v3899_v15 = vld [vmem:[#allocation8 + $0x148] sm:$0xff] }
  0x43   :  { %438 = vmatpush.msrb.mxu1 %v3856_v20  ;;  %6682 = vst [vmem:[#allocation33_spill] sm:$0xff] %v3899_v15 }
  0x44   :  { %453 = vmatpush.msrb.mxu2 %v3860_v21  ;;  %v3888_v21 = vld [vmem:[#allocation8 + $0x158] sm:$0xff] }
  0x45   :  { %439 = vmatpush.msrb.mxu1 %v3862_v22  ;;  %466 = vmatpush.msrb.mxu3 %v3888_v21 }
  0x46   :  { %454 = vmatpush.msrb.mxu2 %v3866_v23  ;;  %v3890_v23 = vld [vmem:[#allocation8 + $0x160] sm:$0xff] }
  0x47   :  { %440 = vmatpush.msrb.mxu1 %v3868_v25  ;;  %6680 = vst [vmem:[#allocation31_spill] sm:$0xff] %v3890_v23  ;;  %486 = vmatpush.msra.mxu0 %v3890_v23  ;;  %v3916_v23 = vld [vmem:[#allocation8 + $0x110] sm:$0xff]  ;;  %v3934_v25 = vld [vmem:[#allocation7 + $0x158] sm:$0xff] }
  0x48   :  { %441 = vmatmul.f32.vlgmr.msrb.gmra.mxu1 %v6334_v57  ;;  %455 = vmatpush.msrb.mxu2 %v3872_v27  ;;  %v3893_v57 = vld [vmem:[#allocation8 + $0x30] sm:$0xff]  ;;  %v3895_v27 = vld [vmem:[#allocation8 + $0x140] sm:$0xff]  ;;  %6687 = vst [vmem:[#allocation38_spill] sm:$0xff] %v3916_v23 }
  0x49   :  { %6681 = vst [vmem:[#allocation32_spill] sm:$0xff] %v3893_v57  ;;  %467 = vmatpush.msrb.mxu3 %v3895_v27  ;;  %487 = vmatpush.msra.mxu0 %v3899_v15  ;;  %v3924_v15 = vld [vmem:[#allocation7 + $0x170] sm:$0xff] }
  0x4a   :  { %456 = vmatpush.msrb.mxu2 %v3878_v33  ;;  %v3902_v33 = vld [vmem:[#allocation8 + $0x18] sm:$0xff]  ;;  %6690 = vst [vmem:[#allocation41_spill] sm:$0xff] %v3924_v15 }
  0x4b   :  { %6683 = vst [vmem:[#allocation34_spill] sm:$0xff] %v3902_v33  ;;  %468 = vmatpush.msrb.mxu3 %v3908_v40  ;;  %488 = vmatpush.msra.mxu0 %v3910_v12  ;;  %v3932_v12 = vld [vmem:[#allocation7 + $0x150] sm:$0xff] }
  0x4c   :  { %457 = vmatpush.msrb.mxu2 %v3886_v45  ;;  %v3912_v45 = vld [vmem:[#allocation8] sm:$0xff]  ;;  %6693 = vst [vmem:[#allocation44_spill] sm:$0xff] %v3932_v12  ;;  %v4073_v40 = vld [vmem:[#allocation7 + $0x50] sm:$0xff] }
  0x4d   :  { %6686 = vst [vmem:[#allocation37_spill] sm:$0xff] %v3912_v45  ;;  %469 = vmatpush.msrb.mxu3 %v3916_v23  ;;  %489 = vmatpush.msra.mxu0 %v3918_v3  ;;  %v3946_v23 = vld [vmem:[#allocation7 + $0x140] sm:$0xff]  ;;  %v3953_v3 = vld [vmem:[#allocation8 + $0xc8] sm:$0xff] }
  0x4e   :  { %458 = vmatpush.msrb.mxu2 %v3893_v57  ;;  %v3920_v57 = vld [vmem:[#allocation7 + $0x168] sm:$0xff]  ;;  %6694 = vst [vmem:[#allocation45_spill] sm:$0xff] %v3934_v25 }
  0x4f   :  { %6689 = vst [vmem:[#allocation40_spill] sm:$0xff] %v3920_v57  ;;  %562 = vmatpush.msra.mxu1 %v3920_v57  ;;  %v3940_v57 = vld [vmem:[#allocation8 + $0xe8] sm:$0xff]  ;;  %490 = vmatpush.msra.mxu0 %v3928_v63 }
  0x50   :  { %459 = vmatpush.msrb.mxu2 %v3902_v33  ;;  %v3926_v33 = vld [vmem:[#allocation8 + $0xf8] sm:$0xff]  ;;  %6696 = vst [vmem:[#allocation47_spill] sm:$0xff] %v3940_v57  ;;  %v3962_v63 = vld [vmem:[#allocation7 + $0x128] sm:$0xff] }
  0x51   :  { %6691 = vst [vmem:[#allocation42_spill] sm:$0xff] %v3926_v33  ;;  %563 = vmatpush.msra.mxu1 %v3932_v12  ;;  %470 = vmatpush.msrb.mxu3 %v3926_v33  ;;  %v3957_v12 = vld [vmem:[#allocation7 + $0x120] sm:$0xff]  ;;  %v6702_v33 = vmov 0.0  }
  0x52   :  { %460 = vmatpush.msrb.mxu2 %v3912_v45  ;;  %v3938_v45 = vld [vmem:[#allocation8 + $0xe0] sm:$0xff]  ;;  %6698 = vst [vmem:[#allocation49_spill] sm:$0xff] %v3946_v23  ;;  %491 = vmatpush.msra.mxu0 %v3940_v57  ;;  %v3966_v57 = vld [vmem:[#allocation8 + $0xb0] sm:$0xff] }
  0x53   :  { %6695 = vst [vmem:[#allocation46_spill] sm:$0xff] %v3938_v45  ;;  %564 = vmatpush.msra.mxu1 %v3942_v56  ;;  %471 = vmatpush.msrb.mxu3 %v3938_v45  ;;  %v3974_v56 = vld [vmem:[#allocation7 + $0x110] sm:$0xff]  ;;  %v4056_v45 = vld [vmem:[#allocation7 + $0x60] sm:$0xff] }
  0x54   :  { %582 = vmatpush.msra.mxu2 %v3924_v15  ;;  %6699 = vst [vmem:[#allocation50_spill] sm:$0xff] %v3953_v3  ;;  %v3955_v15 = vld [vmem:[#allocation8 + $0xd0] sm:$0xff] }
  0x55   :  { %6700 = vst [vmem:[#allocation51_spill] sm:$0xff] %v3955_v15  ;;  %461 = vmatmul.f32.vlgmr.msrb.gmra.mxu2 %v6702_v33  ;;  %472 = vmatpush.msrb.mxu3 %v3953_v3  ;;  %v3986_v3 = vld [vmem:[#allocation7 + $0xf8] sm:$0xff] }
  0x56   :  { %583 = vmatpush.msra.mxu2 %v3934_v25  ;;  %6701 = vst [vmem:[#allocation52_spill] sm:$0xff] %v3957_v12  ;;  %492 = vmatpush.msra.mxu0 %v3955_v15  ;;  %v3970_v25 = vld [vmem:[#allocation7 + $0x108] sm:$0xff]  ;;  %v3978_v15 = vld [vmem:[#allocation8 + $0x98] sm:$0xff] }
  0x57   :  { %6703 = vst [vmem:[#allocation53_spill] sm:$0xff] %v3962_v63  ;;  %565 = vmatpush.msra.mxu1 %v3957_v12  ;;  %473 = vmatpush.msrb.mxu3 %v3966_v57  ;;  %v3980_v12 = vld [vmem:[#allocation8 + $0xa0] sm:$0xff] }
  0x58   :  { %584 = vmatpush.msra.mxu2 %v3946_v23  ;;  %6704 = vst [vmem:[#allocation54_spill] sm:$0xff] %v3966_v57  ;;  %v3968_v23 = vld [vmem:[#allocation8 + $0xb8] sm:$0xff]  ;;  %v3998_v57 = vld [vmem:[#allocation7 + $0xe0] sm:$0xff] }
  0x59   :  { %6705 = vst [vmem:[#allocation55_spill] sm:$0xff] %v3968_v23  ;;  %493 = vmatpush.msra.mxu0 %v3968_v23  ;;  %566 = vmatpush.msra.mxu1 %v3970_v25  ;;  %v3990_v23 = vld [vmem:[#allocation8 + $0x80] sm:$0xff] }
  0x5a   :  { %585 = vmatpush.msra.mxu2 %v3962_v63  ;;  %6706 = vst [vmem:[#allocation56_spill] sm:$0xff] %v3970_v25  ;;  %v3982_v63 = vld [vmem:[#allocation7 + $0xf0] sm:$0xff]  ;;  %474 = vmatpush.msrb.mxu3 %v3978_v15  ;;  %v3992_v25 = vld [vmem:[#allocation8 + $0x88] sm:$0xff] }
  0x5b   :  { %6707 = vst [vmem:[#allocation57_spill] sm:$0xff] %v3974_v56  ;;  %494 = vmatpush.msra.mxu0 %v3980_v12  ;;  %567 = vmatpush.msra.mxu1 %v3982_v63 }
  0x5c   :  { %586 = vmatpush.msra.mxu2 %v3974_v56  ;;  %6708 = vst [vmem:[#allocation58_spill] sm:$0xff] %v3978_v15  ;;  %v3994_v56 = vld [vmem:[#allocation7 + $0xd8] sm:$0xff]  ;;  %475 = vmatpush.msrb.mxu3 %v3990_v23  ;;  %v4010_v15 = vld [vmem:[#allocation7 + $0xc8] sm:$0xff] }
  0x5d   :  { %6709 = vst [vmem:[#allocation59_spill] sm:$0xff] %v3980_v12  ;;  %495 = vmatpush.msra.mxu0 %v3992_v25  ;;  %568 = vmatpush.msra.mxu1 %v3994_v56  ;;  %v4002_v12 = vld [vmem:[#allocation8 + $0x68] sm:$0xff] }
  0x5e   :  { %6710 = vst [vmem:[#allocation60_spill] sm:$0xff] %v3982_v63  ;;  %587 = vmatpush.msra.mxu2 %v3986_v3  ;;  %v4004_v63 = vld [vmem:[#allocation8 + $0x70] sm:$0xff]  ;;  %476 = vmatpush.msrb.mxu3 %v4002_v12 }
  0x5f   :  { %6711 = vst [vmem:[#allocation61_spill] sm:$0xff] %v3986_v3  ;;  %v4006_v3 = vld [vmem:[#allocation7 + $0xc0] sm:$0xff]  ;;  %496 = vmatpush.msra.mxu0 %v4004_v63 }
  0x60   :  { %6712 = vst [vmem:[#allocation62_spill] sm:$0xff] %v3990_v23  ;;  %588 = vmatpush.msra.mxu2 %v3998_v57  ;;  %569 = vmatpush.msra.mxu1 %v4006_v3  ;;  %v4022_v23 = vld [vmem:[#allocation7 + $0xb0] sm:$0xff] }
  0x61   :  { %6713 = vst [vmem:[#allocation63_spill] sm:$0xff] %v3992_v25  ;;  %v4014_v25 = vld [vmem:[#allocation8 + $0x50] sm:$0xff] }
  0x62   :  { %6714 = vst [vmem:[#allocation64_spill] sm:$0xff] %v3994_v56  ;;  %589 = vmatpush.msra.mxu2 %v4010_v15  ;;  %v4016_v56 = vld [vmem:[#allocation8 + $0x58] sm:$0xff]  ;;  %477 = vmatpush.msrb.mxu3 %v4014_v25 }
  0x63   :  { %6715 = vst [vmem:[#allocation65_spill] sm:$0xff] %v3998_v57  ;;  %v4018_v57 = vld [vmem:[#allocation7 + $0xa8] sm:$0xff]  ;;  %497 = vmatpush.msra.mxu0 %v4016_v56 }
  0x64   :  { %6716 = vst [vmem:[#allocation66_spill] sm:$0xff] %v4002_v12  ;;  %570 = vmatpush.msra.mxu1 %v4018_v57  ;;  %590 = vmatpush.msra.mxu2 %v4022_v23  ;;  %v4034_v12 = vld [vmem:[#allocation7 + $0x98] sm:$0xff] }
  0x65   :  { %6717 = vst [vmem:[#allocation67_spill] sm:$0xff] %v4004_v63  ;;  %v4026_v63 = vld [vmem:[#allocation8 + $0x38] sm:$0xff] }
  0x66   :  { %6718 = vst [vmem:[#allocation68_spill] sm:$0xff] %v4006_v3  ;;  %v4028_v3 = vld [vmem:[#allocation8 + $0x40] sm:$0xff]  ;;  %478 = vmatpush.msrb.mxu3 %v4026_v63  ;;  %591 = vmatpush.msra.mxu2 %v4034_v12 }
  0x67   :  { %6719 = vst [vmem:[#allocation69_spill] sm:$0xff] %v4010_v15  ;;  %v4030_v15 = vld [vmem:[#allocation7 + $0x90] sm:$0xff]  ;;  %498 = vmatpush.msra.mxu0 %v4028_v3 }
  0x68   :  { %6720 = vst [vmem:[#allocation70_spill] sm:$0xff] %v4014_v25  ;;  %571 = vmatpush.msra.mxu1 %v4030_v15 }
  0x69   :  { %6721 = vst [vmem:[#allocation71_spill] sm:$0xff] %v4016_v56  ;;  %v4040_v56 = vld [vmem:[#allocation8 + $0x20] sm:$0xff] }
  0x6a   :  { %6722 = vst [vmem:[#allocation72_spill] sm:$0xff] %v4018_v57  ;;  %v4044_v57 = vld [vmem:[#allocation7 + $0x78] sm:$0xff]  ;;  %479 = vmatpush.msrb.mxu3 %v4040_v56 }
  0x6b   :  { %6723 = vst [vmem:[#allocation73_spill] sm:$0xff] %v4022_v23  ;;  %v4042_v23 = vld [vmem:[#allocation8 + $0x28] sm:$0xff]  ;;  %572 = vmatpush.msra.mxu1 %v4044_v57 }
  0x6c   :  { %6724 = vst [vmem:[#allocation74_spill] sm:$0xff] %v4026_v63  ;;  %499 = vmatpush.msra.mxu0 %v4042_v23  ;;  %v4048_v63 = vld [vmem:[#allocation7 + $0x80] sm:$0xff] }
  0x6d   :  { %6725 = vst [vmem:[#allocation75_spill] sm:$0xff] %v4028_v3  ;;  %592 = vmatpush.msra.mxu2 %v4048_v63  ;;  %573 = vmatpush.msra.mxu1 %v4056_v45 }
  0x6e   :  { %6726 = vst [vmem:[#allocation76_spill] sm:$0xff] %v4030_v15  ;;  %v4052_v15 = vld [vmem:[#allocation8 + $0x8] sm:$0xff] }
  0x6f   :  { %6727 = vst [vmem:[#allocation77_spill] sm:$0xff] %v4034_v12  ;;  %v4054_v12 = vld [vmem:[#allocation8 + $0x10] sm:$0xff]  ;;  %480 = vmatpush.msrb.mxu3 %v4052_v15 }
  0x70   :  { %6728 = vst [vmem:[#allocation78_spill] sm:$0xff] %v4040_v56  ;;  %500 = vmatpush.msra.mxu0 %v4054_v12  ;;  %v4060_v56 = vld [vmem:[#allocation7 + $0x68] sm:$0xff]  ;;  %481 = vmatmul.f32.vlgmr.msrb.gmra.mxu3 %v6702_v33 }
  0x71   :  { %6729 = vst [vmem:[#allocation79_spill] sm:$0xff] %v4042_v23  ;;  %v4062_v23 = vld [vmem:[#allocation7 + $0x178] sm:$0xff]  ;;  %593 = vmatpush.msra.mxu2 %v4060_v56  ;;  %501 = vmatmul.f32.vlgmr.msra.gmra.mxu0 %v6702_v33 }
  0x72   :  { %6730 = vst [vmem:[#allocation80_spill] sm:$0xff] %v4044_v57  ;;  %v4067_v57 = vld [vmem:[%s6323_s3] sm:$0x7]  ;;  %602 = vmatpush.msra.mxu3 %v4062_v23  ;;  %672 = vmatpush.msrb.mxu0 %v3668_v0  ;;  %v4092_v0 = vld [vmem:[#allocation7 + $0x18] sm:$0xff] }
  0x73   :  { %6731 = vst [vmem:[#allocation81_spill] sm:$0xff] %v4048_v63  ;;  %v4071_v63 = vld [vmem:[#allocation7 + $0x48] sm:$0xff]  ;;  %594 = vmatpush.msra.mxu2 %v4073_v40  ;;  %v134_v22 = vperm.slane %v4067_v57, 1 }
  0x74   :  { %6732 = vst [vmem:[#allocation82_spill] sm:$0xff] %v4052_v15  ;;  %574 = vmatpush.msra.mxu1 %v4071_v63  ;;  %v4081_v15 = vld [vmem:[#allocation7 + $0x30] sm:$0xff]  ;;  %673 = vmatpush.msrb.mxu0 %v3670_v1 }
  0x75   :  { %6733 = vst [vmem:[#allocation83_spill] sm:$0xff] %v4054_v12  ;;  %v4077_v12 = vld [vmem:[#allocation7 + $0x160] sm:$0xff]  ;;  %595 = vmatpush.msra.mxu2 %v4083_v61  ;;  %v4101_v1 = vld [vmem:[#allocation7 + $0x130] sm:$0xff] }
  0x76   :  { %6734 = vst [vmem:[#allocation84_spill] sm:$0xff] %v4056_v45  ;;  %603 = vmatpush.msra.mxu3 %v4077_v12  ;;  %v4088_v45 = vld [vmem:[#allocation7 + $0x148] sm:$0xff]  ;;  %575 = vmatpush.msra.mxu1 %v4081_v15  ;;  %v4105_v61 = vld [vmem:[#allocation7] sm:$0xff] }
  0x77   :  { %6735 = vst [vmem:[#allocation85_spill] sm:$0xff] %v4060_v56  ;;  %v133_v56 = vperm.slane %v4067_v57, 0  ;;  %674 = vmatpush.msrb.mxu0 %v3673_v4 }
  0x78   :  { %6736 = vst [vmem:[#allocation86_spill] sm:$0xff] %v4062_v23  ;;  %604 = vmatpush.msra.mxu3 %v4088_v45  ;;  %576 = vmatpush.msra.mxu1 %v4092_v0 }
  0x79   :  { %6737 = vst [vmem:[#allocation87_spill] sm:$0xff] %v4067_v57  ;;  %675 = vmatpush.msrb.mxu0 %v3680_v7  ;;  %v4127_v7 = vld [vmem:[#allocation7 + $0xe8] sm:$0xff] }
  0x7a   :  { %6738 = vst [vmem:[#allocation88_spill] sm:$0xff] %v4071_v63  ;;  %605 = vmatpush.msra.mxu3 %v4101_v1  ;;  %577 = vmatpush.msra.mxu1 %v4105_v61 }
  0x7b   :  { %6739 = vst [vmem:[#allocation89_spill] sm:$0xff] %v4073_v40  ;;  %v4094_v40 = vld [vmem:[#allocation7 + $0x20] sm:$0xff]  ;;  %676 = vmatpush.msrb.mxu0 %v3686_v9 }
  0x7c   :  { %6740 = vst [vmem:[#allocation90_spill] sm:$0xff] %v4077_v12  ;;  %596 = vmatpush.msra.mxu2 %v4094_v40  ;;  %692 = vmatpush.msrb.mxu1 %v3675_v5  ;;  %v4137_v5 = vld [vmem:[#allocation7 + $0xd0] sm:$0xff] }
  0x7d   :  { %6741 = vst [vmem:[#allocation91_spill] sm:$0xff] %v4081_v15  ;;  %v4107_v15 = vld [vmem:[#allocation7 + $0x8] sm:$0xff]  ;;  %677 = vmatpush.msrb.mxu0 %v3701_v14 }
  0x7e   :  { %597 = vmatpush.msra.mxu2 %v4107_v15  ;;  %693 = vmatpush.msrb.mxu1 %v3678_v6  ;;  %v4143_v6 = vld [vmem:[#allocation7 + $0xb8] sm:$0xff] }
  0x7f   :  { %678 = vmatpush.msrb.mxu0 %v3710_v17 }
  0x80   :  { %712 = vmatpush.msrb.mxu2 %v3740_v29  ;;  %694 = vmatpush.msrb.mxu1 %v3684_v8  ;;  %v4150_v8 = vld [vmem:[#allocation7 + $0xa0] sm:$0xff] }
  0x81   :  { %679 = vmatpush.msrb.mxu0 %v3713_v18  ;;  %v4156_v18 = vld [vmem:[#allocation7 + $0x88] sm:$0xff] }
  0x82   :  { %713 = vmatpush.msrb.mxu2 %v3752_v34  ;;  %695 = vmatpush.msrb.mxu1 %v3689_v10  ;;  %v4162_v10 = vld [vmem:[#allocation7 + $0x70] sm:$0xff] }
  0x83   :  { %680 = vmatpush.msrb.mxu0 %v3734_v26  ;;  %v4168_v26 = vld [vmem:[#allocation7 + $0x58] sm:$0xff] }
  0x84   :  { %714 = vmatpush.msrb.mxu2 %v3762_v38  ;;  %696 = vmatpush.msrb.mxu1 %v3708_v16 }
  0x85   :  { %681 = vmatpush.msrb.mxu0 %v3742_v30 }
  0x86   :  { %715 = vmatpush.msrb.mxu2 %v3771_v42  ;;  %697 = vmatpush.msrb.mxu1 %v3715_v19  ;;  %v4174_v19 = vld [vmem:[#allocation7 + $0x40] sm:$0xff]  ;;  %v4188_v42 = vld [vmem:[#allocation7 + $0x10] sm:$0xff] }
  0x87   :  { %682 = vmatpush.msrb.mxu0 %v3749_v32  ;;  %6748 = vst [vmem:[#allocation98_spill] sm:$0xff] %v4188_v42 }
  0x88   :  { %716 = vmatpush.msrb.mxu2 %v3784_v47  ;;  %698 = vmatpush.msrb.mxu1 %v3732_v24 }
  0x89   :  { %683 = vmatpush.msrb.mxu0 %v3758_v37 }
  0x8a   :  { %717 = vmatpush.msrb.mxu2 %v3794_v50  ;;  %699 = vmatpush.msrb.mxu1 %v3738_v28  ;;  %v4182_v28 = vld [vmem:[#allocation7 + $0x28] sm:$0xff] }
  0x8b   :  { %684 = vmatpush.msrb.mxu0 %v3768_v41  ;;  %6747 = vst [vmem:[#allocation97_spill] sm:$0xff] %v4182_v28 }
  0x8c   :  { %718 = vmatpush.msrb.mxu2 %v3808_v54  ;;  %700 = vmatpush.msrb.mxu1 %v3746_v31 }
  0x8d   :  { %685 = vmatpush.msrb.mxu0 %v3777_v44 }
  0x8e   :  { %719 = vmatpush.msrb.mxu2 %v3818_v58  ;;  %701 = vmatpush.msrb.mxu1 %v3756_v35 }
  0x8f   :  { %686 = vmatpush.msrb.mxu0 %v3786_v48 }
  0x90   :  { %720 = vmatpush.msrb.mxu2 %v3825_v60  ;;  %702 = vmatpush.msrb.mxu1 %v3765_v39 }
  0x91   :  { %687 = vmatpush.msrb.mxu0 %v3796_v51 }
  0x92   :  { %721 = vmatpush.msrb.mxu2 %v3832_v62  ;;  %703 = vmatpush.msrb.mxu1 %v3774_v43  ;;  %v6750_v62 = vld [vmem:[#allocation16_spill] sm:$0xff] }
  0x93   :  { %752 = vmatpush.msra.mxu0 %v3880_v36 }
  0x94   :  { %722 = vmatpush.msrb.mxu2 %v3838_v2  ;;  %704 = vmatpush.msrb.mxu1 %v3781_v46  ;;  %v6751_v2 = vld [vmem:[#allocation24_spill] sm:$0xff] }
  0x95   :  { %753 = vmatpush.msra.mxu0 %v3888_v21  ;;  %v6752_v21 = vld [vmem:[#allocation18_spill] sm:$0xff] }
  0x96   :  { %723 = vmatpush.msrb.mxu2 %v3844_v11  ;;  %705 = vmatpush.msrb.mxu1 %v3792_v49 }
  0x97   :  { %754 = vmatpush.msra.mxu0 %v3895_v27  ;;  %v6755_v27 = vld [vmem:[#allocation26_spill] sm:$0xff] }
  0x98   :  { %724 = vmatpush.msrb.mxu2 %v3850_v13  ;;  %706 = vmatpush.msrb.mxu1 %v6750_v62 }
  0x9a   :  { %725 = vmatpush.msrb.mxu2 %v3856_v20  ;;  %v6421_v20 = vperm.slane %v4067_v57, 2 }
  0x9c   :  { %726 = vmatpush.msrb.mxu2 %v6751_v2  ;;  %v6763_v2 = vld [vmem:[#allocation50_spill] sm:$0xff] }
  0x9e   :  { %727 = vmatpush.msrb.mxu2 %v6755_v27  ;;  %v6766_v27 = vld [vmem:[#allocation25_spill] sm:$0xff] }
  0xa5   :  { %v4036_v25 = vpop.f32.mrf.mxu0 }
  0xa6   :  { %v209_v3 = vpop.f32.mrf.mxu1 }
  0xa7   :  { %v4117_v4 = vadd.f32 %v209_v3, %v134_v22 }
  0xa9   :  { %6745 = vst [vmem:[#allocation95_spill] sm:$0xff] %v4117_v4 }
  0xad   :  { %v189_v23 = vpop.f32.mrf.mxu0 }
  0xae   :  { %v4096_v63 = vadd.f32 %v189_v23, %v133_v56  ;;  %v212_v12 = vpop.f32.mrf.mxu1  ;;  %v4113_v23 = vld [vmem:[#allocation7 + $0x118] sm:$0xff] }
  0xaf   :  { %v4109_v53 = vadd.f32 %v212_v12, %v134_v22  ;;  %606 = vmatpush.msra.mxu3 %v4113_v23  ;;  %v4130_v12 = vadd.f32 %v4036_v25, %v133_v56  ;;  %v6753_v22 = vld [vmem:[#allocation35_spill] sm:$0xff]  ;;  %v6754_v25 = vld [vmem:[#allocation17_spill] sm:$0xff] }
  0xb0   :  { %6743 = vst [vmem:[#allocation93_spill] sm:$0xff] %v4096_v63  ;;  %v4121_v63 = vld [vmem:[#allocation7 + $0x100] sm:$0xff]  ;;  %755 = vmatpush.msra.mxu0 %v6753_v22  ;;  %707 = vmatpush.msrb.mxu1 %v6754_v25 }
  0xb1   :  { %6744 = vst [vmem:[#allocation94_spill] sm:$0xff] %v4109_v53  ;;  %607 = vmatpush.msra.mxu3 %v4121_v63 }
  0xb2   :  { %6746 = vst [vmem:[#allocation96_spill] sm:$0xff] %v4130_v12 }
  0xb3   :  { %608 = vmatpush.msra.mxu3 %v4127_v7 }
  0xb5   :  { %609 = vmatpush.msra.mxu3 %v4137_v5 }
  0xb7   :  { %610 = vmatpush.msra.mxu3 %v4143_v6 }
  0xb9   :  { %v422_v3 = vpop.f32.mrf.mxu0  ;;  %611 = vmatpush.msra.mxu3 %v4150_v8 }
  0xba   :  { %v506_v9 = vadd.f32 %v422_v3, %v4117_v4  ;;  %v402_v14 = vpop.f32.mrf.mxu3  ;;  %v6756_v3 = vld [vmem:[#allocation19_spill] sm:$0xff] }
  0xbb   :  { %v505_v34 = vadd.f32 %v402_v14, %v4130_v12  ;;  %612 = vmatpush.msra.mxu3 %v4156_v18 }
  0xbc   :  { %v2784_v29 = vmul.f32 -1.442695, %v506_v9  ;;  %v6757_v9 = vld [vmem:[#allocation38_spill] sm:$0xff] }
  0xbd   :  { %v2783_v17 = vmul.f32 -1.442695, %v505_v34  ;;  %613 = vmatpush.msra.mxu3 %v4162_v10  ;;  %756 = vmatpush.msra.mxu0 %v6757_v9  ;;  %v6769_v9 = vld [vmem:[#allocation62_spill] sm:$0xff] }
  0xbe   :  { %2829 = vpow2.f32 %v2784_v29 }
  0xbf   :  { %2831 = vpow2.f32 %v2783_v17  ;;  %614 = vmatpush.msra.mxu3 %v4168_v26 }
  0xc1   :  { %615 = vmatpush.msra.mxu3 %v4174_v19 }
  0xc3   :  { %616 = vmatpush.msra.mxu3 %v4182_v28 }
  0xc4   :  { %v2830_v16 = vpop.eup %2829 }
  0xc5   :  { %v2832_v24 = vpop.eup %2831  ;;  %v4176_v30 = vadd.f32 1.0, %v2830_v16  ;;  %617 = vmatpush.msra.mxu3 %v4188_v42  ;;  %v6758_v16 = vld [vmem:[#allocation20_spill] sm:$0xff] }
  0xc6   :  { %v513_v38 = vadd.f32 1.0, %v2832_v24  ;;  %v6759_v24 = vld [vmem:[#allocation42_spill] sm:$0xff] }
  0xc7   :  { %732 = vmatpush.msrb.mxu3 %v3800_v52  ;;  %v4212_v52 = vld [vmem:[%s6324_s4] ss:$0 sm:$0xff]  ;;  %757 = vmatpush.msra.mxu0 %v6759_v24  ;;  %vm535_vm5 = vweird.f32 %v4176_v30 }
  0xc8   :  { %2833 = vrcp.f32 %v513_v38  ;;  %6749 = vst [vmem:[#allocation99_spill] sm:$0xff] %v4212_v52  ;;  %v526_v60 = vand.u32 2147483648, %v513_v38  ;;  %v524_v13 = vand.u32 2147483647, %v513_v38  ;;  %vm520_vm2 = vweird.f32 %v513_v38 }
  0xc9   :  { %2835 = vrcp.f32 %v4176_v30  ;;  %733 = vmatpush.msrb.mxu3 %v3810_v55  ;;  %v442_v55 = vpop.f32.mrf.mxu1 }
  0xca   :  { %v548_v36 = vadd.f32 %v4212_v52, %v442_v55  ;;  %v527_v29 = vor.u32 1.1754944e-38, %v526_v60  ;;  %vm525_vm4 = vcmp.eq.f32.partialorder %v524_v13, 8.507059e+37  ;;  %v6761_v55 = vld [vmem:[#allocation46_spill] sm:$0xff]  ;;  %v6764_v13 = vld [vmem:[#allocation23_spill] sm:$0xff] }
  0xcb   :  { %734 = vmatpush.msrb.mxu3 %v3822_v59  ;;  %v232_v59 = vpop.f32.mrf.mxu2  ;;  %758 = vmatpush.msra.mxu0 %v6761_v55  ;;  %v6774_v55 = vld [vmem:[#allocation32_spill] sm:$0xff] }
  0xcc   :  { %v4230_v17 = vadd.f32 %v232_v59, %v6421_v20  ;;  %v539_v59 = vand.u32 2147483647, %v4176_v30 }
  0xcd   :  { %735 = vmatpush.msrb.mxu3 %v6752_v21  ;;  %759 = vmatpush.msra.mxu0 %v6763_v2  ;;  %v6765_v21 = vld [vmem:[#allocation54_spill] sm:$0xff]  ;;  %v6778_v2 = vld [vmem:[#allocation29_spill] sm:$0xff] }
  0xce   :  { %v2834_v47 = vpop.eup %2833  ;;  %vm540_vm8 = vcmp.eq.f32.partialorder %v539_v59, 8.507059e+37  ;;  %v6783_v59 = vld [vmem:[#allocation44_spill] sm:$0xff] }
  0xcf   :  { %v4203_v50 = vpop.eup %2835  ;;  %v516_v54 = vmul.f32 %v2834_v47, %v513_v38  ;;  %vm521_vm1 = vweird.f32 %v2834_v47  ;;  %736 = vmatpush.msrb.mxu3 %v6756_v3  ;;  %760 = vmatpush.msra.mxu0 %v6765_v21  ;;  %v6768_v3 = vld [vmem:[#allocation27_spill] sm:$0xff]  ;;  %v6781_v21 = vld [vmem:[#allocation82_spill] sm:$0xff] }
  0xd0   :  { %v531_v58 = vmul.f32 %v4203_v50, %v4176_v30  ;;  %vm522_vm3 = vmor %vm520_vm2, %vm521_vm1  ;;  %vm536_vm6 = vweird.f32 %v4203_v50 }
  0xd1   :  { %v517_v56 = vsub.f32 1.0, %v516_v54  ;;  %737 = vmatpush.msrb.mxu3 %v6758_v16  ;;  %vm537_vm7 = vmor %vm535_vm5, %vm536_vm6  ;;  %v6771_v16 = vld [vmem:[#allocation66_spill] sm:$0xff] }
  0xd2   :  { %v532_v14 = vsub.f32 1.0, %v531_v58 }
  0xd3   :  { %v518_v11 = vmul.f32 %v2834_v47, %v517_v56  ;;  %v6760_v56 = vld [vmem:[#allocation21_spill] sm:$0xff] }
  0xd4   :  { %738 = vmatpush.msrb.mxu3 %v6760_v56  ;;  %v533_v58 = vmul.f32 %v4203_v50, %v532_v14 }
  0xd5   :  { %v519_v33 = vadd.f32 %v2834_v47, %v518_v11  ;;  %v541_v11 = vand.u32 2147483648, %v4176_v30 }
  0xd6   :  { %v534_v22 = vadd.f32 %v4203_v50, %v533_v58  ;;  %v6775_v58 = vld [vmem:[#allocation74_spill] sm:$0xff] }
  0xd7   :  { %v523_v34 = vsel %vm522_vm3, %v2834_v47, %v519_v33  ;;  %v6762_v47 = vld [vmem:[#allocation22_spill] sm:$0xff] }
  0xd8   :  { %v528_v38 = vsel %vm525_vm4, %v527_v29, %v523_v34  ;;  %739 = vmatpush.msrb.mxu3 %v6762_v47  ;;  %v6767_v33 = vld [vmem:[#allocation58_spill] sm:$0xff]  ;;  %v538_v14 = vsel %vm537_vm7, %v4203_v50, %v534_v22  ;;  %v6770_v34 = vld [vmem:[#allocation28_spill] sm:$0xff]  ;;  %v6782_v22 = vld [vmem:[#allocation31_spill] sm:$0xff] }
  0xd9   :  { %v549_v54 = vmul.f32 %v548_v36, %v528_v38  ;;  %761 = vmatpush.msra.mxu0 %v6767_v33  ;;  %v542_v36 = vor.u32 1.1754944e-38, %v541_v11  ;;  %v6772_v38 = vld [vmem:[#allocation30_spill] sm:$0xff]  ;;  %v6779_v11 = vld [vmem:[#allocation40_spill] sm:$0xff] }
  0xda   :  { %740 = vmatpush.msrb.mxu3 %v6764_v13  ;;  %v6776_v50 = vld [vmem:[#allocation34_spill] sm:$0xff]  ;;  %v6780_v13 = vld [vmem:[#allocation37_spill] sm:$0xff] }
  0xdb   :  { %v550_v60 = vadd.f32 %v549_v54, %v4230_v17  ;;  %762 = vmatpush.msra.mxu0 %v6769_v9  ;;  %v543_v30 = vsel %vm540_vm8, %v542_v36, %v538_v14  ;;  %v6773_v54 = vld [vmem:[#allocation70_spill] sm:$0xff]  ;;  %v6786_v36 = vld [vmem:[#allocation33_spill] sm:$0xff] }
  0xdc   :  { %741 = vmatpush.msrb.mxu3 %v6766_v27  ;;  %v6777_v47 = vld [vmem:[#allocation78_spill] sm:$0xff]  ;;  %v6784_v27 = vld [vmem:[#allocation41_spill] sm:$0xff] }
  0xdd   :  { %2837 = vtanh.f32 %v550_v60  ;;  %763 = vmatpush.msra.mxu0 %v6771_v16  ;;  %v6785_v33 = vld [vmem:[#allocation86_spill] sm:$0xff]  ;;  %v6788_v9 = vld [vmem:[#allocation45_spill] sm:$0xff] }
  0xde   :  { %742 = vmatpush.msrb.mxu3 %v6768_v3  ;;  %v6787_v3 = vld [vmem:[#allocation48_spill] sm:$0xff]  ;;  %v6789_v14 = vld [vmem:[#allocation90_spill] sm:$0xff] }
  0xdf   :  { %764 = vmatpush.msra.mxu0 %v6773_v54 }
  0xe0   :  { %743 = vmatpush.msrb.mxu3 %v6770_v34  ;;  %v6791_v34 = vld [vmem:[#allocation52_spill] sm:$0xff] }
  0xe1   :  { %765 = vmatpush.msra.mxu0 %v6775_v58 }
  0xe2   :  { %744 = vmatpush.msrb.mxu3 %v6772_v38  ;;  %v6794_v38 = vld [vmem:[#allocation56_spill] sm:$0xff] }
  0xe3   :  { %v2838_v29 = vpop.eup %2837  ;;  %766 = vmatpush.msra.mxu0 %v6777_v47 }
  0xe4   :  { %v552_v24 = vsub.f32 0.0, %v2838_v29  ;;  %745 = vmatpush.msrb.mxu3 %v6774_v55  ;;  %v6796_v55 = vld [vmem:[#allocation43_spill] sm:$0xff] }
  0xe5   :  { %767 = vmatpush.msra.mxu0 %v6781_v21 }
  0xe6   :  { %v553_v56 = vmul.f32 %v552_v24, %v543_v30  ;;  %746 = vmatpush.msrb.mxu3 %v6776_v50  ;;  %v6792_v24 = vld [vmem:[#allocation49_spill] sm:$0xff]  ;;  %v6793_v30 = vld [vmem:[#allocation39_spill] sm:$0xff]  ;;  %v6797_v50 = vld [vmem:[#allocation60_spill] sm:$0xff] }
  0xe8   :  { %v4258_v60 = vadd.f32 %v2838_v29, %v553_v56  ;;  %747 = vmatpush.msrb.mxu3 %v6780_v13  ;;  %v6790_v29 = vld [vmem:[#allocation36_spill] sm:$0xff]  ;;  %v6795_v56 = vld [vmem:[#allocation53_spill] sm:$0xff] }
  0xe9   :  { %v6800_v13 = vld [vmem:[#allocation64_spill] sm:$0xff] }
  0xea   :  { %578 = vmatmul.f32.vlgmr.msra.gmra.mxu1 %v4258_v60  ;;  %598 = vmatmul.f32.vlgmr.msra.gmra.mxu2 %v4258_v60 }
  0xeb   :  { %618 = vmatmul.f32.vlgmr.msra.gmra.mxu3 %v4258_v60  ;;  %688 = vmatmul.f32.vlgmr.msrb.gmra.mxu0 %v4258_v60 }
  0xec   :  { %772 = vmatpush.msra.mxu1 %v6778_v2  ;;  %857 = vmatpush.msra.mxu2 %v6779_v11  ;;  %v6798_v2 = vld [vmem:[#allocation57_spill] sm:$0xff]  ;;  %v6799_v11 = vld [vmem:[#allocation47_spill] sm:$0xff] }
  0xed   :  { %877 = vmatpush.msra.mxu3 %v6784_v27  ;;  %897 = vmatpush.msrb.mxu0 %v6785_v33  ;;  %v6803_v27 = vld [vmem:[#allocation68_spill] sm:$0xff] }
  0xee   :  { %773 = vmatpush.msra.mxu1 %v6782_v22  ;;  %858 = vmatpush.msra.mxu2 %v6783_v59  ;;  %v6801_v22 = vld [vmem:[#allocation61_spill] sm:$0xff]  ;;  %v6802_v59 = vld [vmem:[#allocation51_spill] sm:$0xff] }
  0xef   :  { %878 = vmatpush.msra.mxu3 %v6788_v9  ;;  %898 = vmatpush.msrb.mxu0 %v6789_v14  ;;  %v6806_v9 = vld [vmem:[#allocation72_spill] sm:$0xff] }
  0xf0   :  { %774 = vmatpush.msra.mxu1 %v6786_v36  ;;  %859 = vmatpush.msra.mxu2 %v6787_v3  ;;  %v6804_v36 = vld [vmem:[#allocation65_spill] sm:$0xff]  ;;  %v6805_v3 = vld [vmem:[#allocation55_spill] sm:$0xff] }
  0xf1   :  { %879 = vmatpush.msra.mxu3 %v6792_v24  ;;  %899 = vmatpush.msrb.mxu0 %v4088_v45  ;;  %v6809_v24 = vld [vmem:[#allocation76_spill] sm:$0xff] }
  0xf2   :  { %708 = vmatmul.f32.vlgmr.msrb.gmra.mxu1 %v4258_v60  ;;  %728 = vmatmul.f32.vlgmr.msrb.gmra.mxu2 %v4258_v60 }
  0xf3   :  { %775 = vmatpush.msra.mxu1 %v6790_v29  ;;  %860 = vmatpush.msra.mxu2 %v6791_v34  ;;  %v6807_v29 = vld [vmem:[#allocation69_spill] sm:$0xff]  ;;  %v6808_v34 = vld [vmem:[#allocation59_spill] sm:$0xff]  ;;  %v482_v20 = vpop.f32.mrf.mxu3 }
  0xf4   :  { %880 = vmatpush.msra.mxu3 %v6795_v56  ;;  %900 = vmatpush.msrb.mxu0 %v4101_v1  ;;  %v6812_v56 = vld [vmem:[#allocation80_spill] sm:$0xff] }
  0xf5   :  { %776 = vmatpush.msra.mxu1 %v6793_v30  ;;  %861 = vmatpush.msra.mxu2 %v6794_v38  ;;  %v6810_v30 = vld [vmem:[#allocation73_spill] sm:$0xff]  ;;  %v6811_v38 = vld [vmem:[#allocation63_spill] sm:$0xff] }
  0xf6   :  { %881 = vmatpush.msra.mxu3 %v6798_v2  ;;  %901 = vmatpush.msrb.mxu0 %v4113_v23  ;;  %v6815_v2 = vld [vmem:[#allocation84_spill] sm:$0xff] }
  0xf7   :  { %777 = vmatpush.msra.mxu1 %v6796_v55  ;;  %862 = vmatpush.msra.mxu2 %v6797_v50  ;;  %v6813_v55 = vld [vmem:[#allocation77_spill] sm:$0xff]  ;;  %v6814_v50 = vld [vmem:[#allocation67_spill] sm:$0xff] }
  0xf8   :  { %882 = vmatpush.msra.mxu3 %v6801_v22  ;;  %902 = vmatpush.msrb.mxu0 %v4121_v63  ;;  %v6818_v22 = vld [vmem:[#allocation88_spill] sm:$0xff] }
  0xf9   :  { %778 = vmatpush.msra.mxu1 %v6799_v11  ;;  %863 = vmatpush.msra.mxu2 %v6800_v13  ;;  %v6816_v11 = vld [vmem:[#allocation81_spill] sm:$0xff]  ;;  %v6817_v13 = vld [vmem:[#allocation71_spill] sm:$0xff] }
  0xfa   :  { %883 = vmatpush.msra.mxu3 %v6804_v36  ;;  %903 = vmatpush.msrb.mxu0 %v4127_v7  ;;  %v6821_v36 = vld [vmem:[#allocation91_spill] sm:$0xff] }
  0xfb   :  { %779 = vmatpush.msra.mxu1 %v6802_v59  ;;  %864 = vmatpush.msra.mxu2 %v6803_v27  ;;  %v6819_v59 = vld [vmem:[#allocation85_spill] sm:$0xff]  ;;  %v6820_v27 = vld [vmem:[#allocation75_spill] sm:$0xff] }
  0xfc   :  { %884 = vmatpush.msra.mxu3 %v6807_v29  ;;  %904 = vmatpush.msrb.mxu0 %v4137_v5  ;;  %v6824_v29 = vld [vmem:[#allocation92_spill] sm:$0xff] }
  0xfd   :  { %780 = vmatpush.msra.mxu1 %v6805_v3  ;;  %865 = vmatpush.msra.mxu2 %v6806_v9  ;;  %v6822_v3 = vld [vmem:[#allocation89_spill] sm:$0xff]  ;;  %v6823_v9 = vld [vmem:[#allocation79_spill] sm:$0xff] }
  0xfe   :  { %885 = vmatpush.msra.mxu3 %v6810_v30  ;;  %905 = vmatpush.msrb.mxu0 %v4143_v6  ;;  %v4333_v30 = vld [vmem:[#allocation5 + $0x170] sm:$0xff] }
  0xff   :  { %781 = vmatpush.msra.mxu1 %v6808_v34  ;;  %866 = vmatpush.msra.mxu2 %v6809_v24  ;;  %v6825_v34 = vld [vmem:[#allocation83_spill] sm:$0xff]  ;;  %v4330_v24 = vld [vmem:[#allocation5 + $0x168] sm:$0xff]  ;;  %6827 = vst [vmem:[#allocation24_spill] sm:$0xff] %v4333_v30 }
 0x100   :  { %886 = vmatpush.msra.mxu3 %v6813_v55  ;;  %906 = vmatpush.msrb.mxu0 %v4150_v8  ;;  %6826 = vst [vmem:[#allocation16_spill] sm:$0xff] %v4330_v24  ;;  %v4355_v55 = vld [vmem:[#allocation5 + $0x128] sm:$0xff] }
 0x101   :  { %782 = vmatpush.msra.mxu1 %v6811_v38  ;;  %867 = vmatpush.msra.mxu2 %v6812_v56  ;;  %v4341_v38 = vld [vmem:[#allocation5 + $0x158] sm:$0xff]  ;;  %v4349_v56 = vld [vmem:[#allocation5 + $0x140] sm:$0xff]  ;;  %6833 = vst [vmem:[#allocation38_spill] sm:$0xff] %v4355_v55 }
 0x102   :  { %887 = vmatpush.msra.mxu3 %v6816_v11  ;;  %907 = vmatpush.msrb.mxu0 %v4156_v18  ;;  %6829 = vst [vmem:[#allocation35_spill] sm:$0xff] %v4341_v38  ;;  %v4367_v11 = vld [vmem:[#allocation5 + $0xf8] sm:$0xff] }
 0x103   :  { %783 = vmatpush.msra.mxu1 %v6814_v50  ;;  %868 = vmatpush.msra.mxu2 %v6815_v2  ;;  %6831 = vst [vmem:[#allocation26_spill] sm:$0xff] %v4349_v56  ;;  %v4358_v50 = vld [vmem:[#allocation5 + $0x108] sm:$0xff]  ;;  %v4364_v2 = vld [vmem:[#allocation5 + $0xf0] sm:$0xff] }
 0x104   :  { %888 = vmatpush.msra.mxu3 %v6819_v59  ;;  %908 = vmatpush.msrb.mxu0 %v4162_v10  ;;  %6834 = vst [vmem:[#allocation20_spill] sm:$0xff] %v4358_v50  ;;  %v4376_v59 = vld [vmem:[#allocation5 + $0xc0] sm:$0xff] }
 0x105   :  { %784 = vmatpush.msra.mxu1 %v6817_v13  ;;  %869 = vmatpush.msra.mxu2 %v6818_v22  ;;  %6836 = vst [vmem:[#allocation21_spill] sm:$0xff] %v4364_v2  ;;  %v4370_v13 = vld [vmem:[#allocation5 + $0xd8] sm:$0xff]  ;;  %v4373_v22 = vld [vmem:[#allocation5 + $0xe0] sm:$0xff] }
 0x106   :  { %889 = vmatpush.msra.mxu3 %v6822_v3  ;;  %909 = vmatpush.msrb.mxu0 %v4168_v26  ;;  %6837 = vst [vmem:[#allocation46_spill] sm:$0xff] %v4367_v11  ;;  %v4386_v3 = vld [vmem:[#allocation5 + $0x90] sm:$0xff] }
 0x107   :  { %785 = vmatpush.msra.mxu1 %v6820_v27  ;;  %870 = vmatpush.msra.mxu2 %v6821_v36  ;;  %6838 = vst [vmem:[#allocation22_spill] sm:$0xff] %v4373_v22  ;;  %v4379_v27 = vld [vmem:[#allocation5 + $0xc8] sm:$0xff] }
 0x108   :  { %890 = vmatpush.msra.mxu3 %v6824_v29  ;;  %910 = vmatpush.msrb.mxu0 %v4174_v19  ;;  %6839 = vst [vmem:[#allocation50_spill] sm:$0xff] %v4379_v27  ;;  %v4382_v36 = vld [vmem:[#allocation5 + $0xa8] sm:$0xff] }
 0x109   :  { %786 = vmatpush.msra.mxu1 %v6823_v9  ;;  %871 = vmatpush.msra.mxu2 %v4092_v0  ;;  %v4338_v0 = vld [vmem:[#allocation5 + $0x150] sm:$0xff] }
 0x10a   :  { %891 = vmatpush.msra.mxu3 %v4094_v40  ;;  %911 = vmatpush.msrb.mxu0 %v4182_v28  ;;  %6828 = vst [vmem:[#allocation18_spill] sm:$0xff] %v4338_v0  ;;  %v4352_v40 = vld [vmem:[#allocation5 + $0x120] sm:$0xff] }
 0x10b   :  { %787 = vmatpush.msra.mxu1 %v6825_v34  ;;  %872 = vmatpush.msra.mxu2 %v4105_v61  ;;  %v4346_v61 = vld [vmem:[#allocation5 + $0x138] sm:$0xff]  ;;  %6832 = vst [vmem:[#allocation19_spill] sm:$0xff] %v4352_v40 }
 0x10c   :  { %892 = vmatpush.msra.mxu3 %v4107_v15  ;;  %912 = vmatpush.msrb.mxu0 %v4188_v42  ;;  %6830 = vst [vmem:[#allocation17_spill] sm:$0xff] %v4346_v61  ;;  %v4361_v15 = vld [vmem:[#allocation5 + $0x110] sm:$0xff] }
 0x10d   :  { %964 = vmatpush.msrb.mxu1 %v4330_v24  ;;  %984 = vmatpush.msrb.mxu2 %v4333_v30  ;;  %6835 = vst [vmem:[#allocation42_spill] sm:$0xff] %v4361_v15 }
 0x10f   :  { %965 = vmatpush.msrb.mxu1 %v4338_v0  ;;  %985 = vmatpush.msrb.mxu2 %v4341_v38 }
 0x111   :  { %966 = vmatpush.msrb.mxu1 %v4346_v61  ;;  %986 = vmatpush.msrb.mxu2 %v4349_v56 }
 0x113   :  { %967 = vmatpush.msrb.mxu1 %v4352_v40  ;;  %987 = vmatpush.msrb.mxu2 %v4355_v55 }
 0x115   :  { %968 = vmatpush.msrb.mxu1 %v4358_v50  ;;  %988 = vmatpush.msrb.mxu2 %v4361_v15 }
 0x117   :  { %969 = vmatpush.msrb.mxu1 %v4364_v2  ;;  %989 = vmatpush.msrb.mxu2 %v4367_v11 }
 0x119   :  { %970 = vmatpush.msrb.mxu1 %v4370_v13  ;;  %990 = vmatpush.msrb.mxu2 %v4373_v22 }
 0x11b   :  { %971 = vmatpush.msrb.mxu1 %v4376_v59  ;;  %991 = vmatpush.msrb.mxu2 %v4379_v27 }
 0x11d   :  { %972 = vmatpush.msrb.mxu1 %v4382_v36  ;;  %992 = vmatpush.msrb.mxu2 %v3746_v31  ;;  %v4402_v31 = vpop.f32.mrf.mxu2 }
 0x11e   :  { %6840 = vst [vmem:[#allocation23_spill] sm:$0xff] %v4402_v31 }
 0x11f   :  { %973 = vmatpush.msrb.mxu1 %v4386_v3  ;;  %993 = vmatpush.msrb.mxu2 %v3756_v35  ;;  %v383_v35 = vld [vmem:[%s6327_s7] sm:$0x7] }
 0x121   :  { %974 = vmatpush.msrb.mxu1 %v3749_v32  ;;  %994 = vmatpush.msrb.mxu2 %v3765_v39  ;;  %v4404_v32 = vpop.f32.mrf.mxu0  ;;  %v4409_v39 = vperm.slane %v383_v35, 0 }
 0x123   :  { %975 = vmatpush.msrb.mxu1 %v3758_v37  ;;  %995 = vmatpush.msrb.mxu2 %v3774_v43  ;;  %6841 = vst [vmem:[#allocation54_spill] sm:$0xff] %v4409_v39 }
 0x125   :  { %976 = vmatpush.msrb.mxu1 %v3768_v41  ;;  %996 = vmatpush.msrb.mxu2 %v3781_v46  ;;  %v462_v37 = vpop.f32.mrf.mxu2 }
 0x127   :  { %977 = vmatpush.msrb.mxu1 %v3777_v44  ;;  %997 = vmatpush.msrb.mxu2 %v3792_v49  ;;  %v4412_v49 = vperm.slane %v383_v35, 1 }
 0x129   :  { %978 = vmatpush.msrb.mxu1 %v3786_v48  ;;  %998 = vmatpush.msrb.mxu2 %v6750_v62  ;;  %6842 = vst [vmem:[#allocation25_spill] sm:$0xff] %v4412_v49 }
 0x12b   :  { %979 = vmatpush.msrb.mxu1 %v3796_v51  ;;  %999 = vmatpush.msrb.mxu2 %v6754_v25 }
 0x167   :  { %v579_v41 = vpop.f32.mrf.mxu1 }
 0x168   :  { %v580_v43 = vadd.f32 %v579_v41, %v4409_v39  ;;  %v689_v44 = vpop.f32.mrf.mxu0 }
 0x169   :  { %v794_v46 = vrot.slane %v689_v44, 6 }
 0x16a   :  { %v622_v48 = vadd.f32 %v580_v43, %v462_v37 }
 0x16b   :  { %v798_v51 = vadd.f32 %v794_v46, %v4130_v12 }
 0x16c   :  { %v2785_v62 = vmul.f32 -1.442695, %v622_v48 }
 0x16d   :  { %v2787_v25 = vmul.f32 -1.442695, %v798_v51  ;;  %v599_v9 = vpop.f32.mrf.mxu2 }
 0x16e   :  { %2839 = vpow2.f32 %v2785_v62  ;;  %v600_v29 = vadd.f32 %v599_v9, %v4412_v49  ;;  %v619_v11 = vpop.f32.mrf.mxu3 }
 0x16f   :  { %2841 = vpow2.f32 %v2787_v25  ;;  %v709_v31 = vpop.f32.mrf.mxu1 }
 0x170   :  { %v623_v57 = vadd.f32 %v600_v29, %v482_v20  ;;  %v795_v53 = vrot.slane %v709_v31, 6  ;;  %v4426_v29 = vld [vmem:[%s6328_s8] ss:$0 sm:$0xff] }
 0x172   :  { %v2786_v27 = vmul.f32 -1.442695, %v623_v57  ;;  %v799_v41 = vadd.f32 %v795_v53, %v4117_v4 }
 0x174   :  { %v2840_v44 = vpop.eup %2839  ;;  %2843 = vpow2.f32 %v2786_v27  ;;  %v2788_v37 = vmul.f32 -1.442695, %v799_v41 }
 0x175   :  { %v2842_v43 = vpop.eup %2841  ;;  %v630_v39 = vadd.f32 1.0, %v2840_v44 }
 0x176   :  { %v806_v46 = vadd.f32 1.0, %v2842_v43  ;;  %2845 = vpow2.f32 %v2788_v37  ;;  %v729_v37 = vpop.f32.mrf.mxu2 }
 0x177   :  { %2847 = vrcp.f32 %v630_v39  ;;  %v643_v9 = vand.u32 2147483648, %v630_v39  ;;  %v641_v44 = vand.u32 2147483647, %v630_v39  ;;  %vm637_vm10 = vweird.f32 %v630_v39 }
 0x178   :  { %2849 = vrcp.f32 %v806_v46  ;;  %v819_v12 = vand.u32 2147483648, %v806_v46  ;;  %v838_v55 = vadd.f32 %v4212_v52, %v729_v37  ;;  %vm813_vm14 = vweird.f32 %v806_v46 }
 0x179   :  { %v644_v15 = vor.u32 1.1754944e-38, %v643_v9  ;;  %vm642_vm13 = vcmp.eq.f32.partialorder %v641_v44, 8.507059e+37 }
 0x17a   :  { %v2844_v48 = vpop.eup %2843  ;;  %v820_v9 = vor.u32 1.1754944e-38, %v819_v12  ;;  %v840_v37 = vrot.slane %v838_v55, 6 }
 0x17b   :  { %v4417_v51 = vadd.f32 1.0, %v2844_v48 }
 0x17c   :  { %v2846_v62 = vpop.eup %2845 }
 0x17d   :  { %v2848_v25 = vpop.eup %2847  ;;  %2851 = vrcp.f32 %v4417_v51  ;;  %v4420_v20 = vadd.f32 1.0, %v2846_v62  ;;  %v4428_v62 = vperm.slane %v383_v35, 2  ;;  %vm652_vm2 = vweird.f32 %v4417_v51 }
 0x17e   :  { %v2850_v57 = vpop.eup %2849  ;;  %v633_v53 = vmul.f32 %v2848_v25, %v630_v39  ;;  %vm638_vm9 = vweird.f32 %v2848_v25  ;;  %v656_v12 = vand.u32 2147483647, %v4417_v51 }
 0x17f   :  { %2853 = vrcp.f32 %v4420_v20  ;;  %v809_v31 = vmul.f32 %v2850_v57, %v806_v46  ;;  %6843 = vst [vmem:[#allocation58_spill] sm:$0xff] %v4428_v62  ;;  %vm639_vm11 = vmor %vm637_vm10, %vm638_vm9  ;;  %vm814_vm12 = vweird.f32 %v2850_v57  ;;  %vm828_vm6 = vweird.f32 %v4420_v20 }
 0x180   :  { %v634_v27 = vsub.f32 1.0, %v633_v53  ;;  %vm815_vm15 = vmor %vm813_vm14, %vm814_vm12  ;;  %vm657_vm4 = vcmp.eq.f32.partialorder %v656_v12, 8.507059e+37  ;;  %v4488_v12 = vld [vmem:[#allocation5 + $0x130] sm:$0xff] }
 0x181   :  { %v810_v43 = vsub.f32 1.0, %v809_v31  ;;  %v665_v31 = vadd.f32 %v4426_v29, %v4404_v32 }
 0x182   :  { %v635_v41 = vmul.f32 %v2848_v25, %v634_v27  ;;  %v817_v27 = vand.u32 2147483647, %v806_v46 }
 0x183   :  { %v2852_v48 = vpop.eup %2851  ;;  %v811_v53 = vmul.f32 %v2850_v57, %v810_v43 }
 0x184   :  { %v648_v4 = vmul.f32 %v2852_v48, %v4417_v51  ;;  %v636_v49 = vadd.f32 %v2848_v25, %v635_v41  ;;  %v620_v41 = vadd.f32 %v619_v11, %v4428_v62  ;;  %vm818_vm0 = vcmp.eq.f32.partialorder %v817_v27, 8.507059e+37 }
 0x185   :  { %v4431_v22 = vpop.eup %2853  ;;  %v812_v42 = vadd.f32 %v2850_v57, %v811_v53  ;;  %vm653_vm1 = vweird.f32 %v2852_v48  ;;  %v658_v11 = vand.u32 2147483648, %v4417_v51  ;;  %v832_v51 = vand.u32 2147483647, %v4420_v20 }
 0x186   :  { %v649_v35 = vsub.f32 1.0, %v648_v4  ;;  %v640_v56 = vsel %vm639_vm11, %v2848_v25, %v636_v49  ;;  %v824_v38 = vmul.f32 %v4431_v22, %v4420_v20  ;;  %vm654_vm3 = vmor %vm652_vm2, %vm653_vm1  ;;  %vm829_vm5 = vweird.f32 %v4431_v22 }
 0x187   :  { %v645_v39 = vsel %vm642_vm13, %v644_v15, %v640_v56  ;;  %v816_v28 = vsel %vm815_vm15, %v2850_v57, %v812_v42  ;;  %v834_v57 = vand.u32 2147483648, %v4420_v20  ;;  %vm830_vm7 = vmor %vm828_vm6, %vm829_vm5  ;;  %vm833_vm8 = vcmp.eq.f32.partialorder %v832_v51, 8.507059e+37  ;;  %v4525_v51 = vld [vmem:[#allocation5 + $0xe8] sm:$0xff] }
 0x188   :  { %v666_v43 = vmul.f32 %v665_v31, %v645_v39  ;;  %v650_v52 = vmul.f32 %v2852_v48, %v649_v35  ;;  %v821_v32 = vsel %vm818_vm0, %v820_v9, %v816_v28  ;;  %v825_v49 = vsub.f32 1.0, %v824_v38  ;;  %v4465_v9 = vld [vmem:[#allocation5 + $0x160] sm:$0xff] }
 0x189   :  { %v842_v4 = vmul.f32 %v840_v37, %v821_v32  ;;  %v659_v28 = vor.u32 1.1754944e-38, %v658_v11  ;;  %v835_v35 = vor.u32 1.1754944e-38, %v834_v57  ;;  %v4468_v37 = vld [vmem:[#allocation8 + $0x150] sm:$0xff]  ;;  %v4471_v32 = vld [vmem:[#allocation8 + $0x158] sm:$0xff]  ;;  %v4519_v57 = vld [vmem:[#allocation8 + $0x160] sm:$0xff] }
 0x18a   :  { %v667_v30 = vadd.f32 %v666_v43, %v620_v41  ;;  %v651_v15 = vadd.f32 %v2852_v48, %v650_v52  ;;  %v826_v42 = vmul.f32 %v4431_v22, %v825_v49  ;;  %v4456_v41 = vld [vmem:[#allocation5 + $0x178] sm:$0xff]  ;;  %v4459_v43 = vld [vmem:[#allocation8 + $0x168] sm:$0xff] }
 0x18b   :  { %v843_v56 = vadd.f32 %v842_v4, %v4230_v17  ;;  %v4476_v49 = vld [vmem:[#allocation5 + $0x148] sm:$0xff] }
 0x18c   :  { %2855 = vtanh.f32 %v667_v30  ;;  %v655_v55 = vsel %vm654_vm3, %v2852_v48, %v651_v15  ;;  %v827_v52 = vadd.f32 %v4431_v22, %v826_v42  ;;  %v4482_v15 = vld [vmem:[#allocation8 + $0x140] sm:$0xff] }
 0x18d   :  { %2857 = vtanh.f32 %v843_v56  ;;  %v660_v30 = vsel %vm657_vm4, %v659_v28, %v655_v55  ;;  %v4479_v56 = vld [vmem:[#allocation8 + $0x138] sm:$0xff]  ;;  %v4491_v42 = vld [vmem:[#allocation8 + $0x120] sm:$0xff]  ;;  %v4494_v55 = vld [vmem:[#allocation8 + $0x128] sm:$0xff] }
 0x18e   :  { %v831_v27 = vsel %vm830_vm7, %v4431_v22, %v827_v52  ;;  %v4462_v22 = vld [vmem:[#allocation8 + $0x170] sm:$0xff]  ;;  %v4504_v28 = vld [vmem:[#allocation8 + $0x108] sm:$0xff] }
 0x18f   :  { %v836_v20 = vsel %vm833_vm8, %v835_v35, %v831_v27  ;;  %v4510_v52 = vld [vmem:[#allocation8 + $0x110] sm:$0xff]  ;;  %v4531_v27 = vld [vmem:[#allocation8 + $0x148] sm:$0xff] }
 0x190   :  { %v4538_v35 = vld [vmem:[#allocation5 + $0xd0] sm:$0xff] }
 0x191   :  { %6847 = vst [vmem:[#allocation66_spill] sm:$0xff] %v4538_v35 }
 0x192   :  { %v2856_v46 = vpop.eup %2855 }
 0x193   :  { %v669_v25 = vsub.f32 0.0, %v2856_v46  ;;  %v2858_v38 = vpop.eup %2857 }
 0x194   :  { %v846_v53 = vrot.slane %v2858_v38, 2 }
 0x195   :  { %v670_v44 = vmul.f32 %v669_v25, %v660_v30  ;;  %v4507_v25 = vld [vmem:[#allocation8 + $0x178] sm:$0xff]  ;;  %v4513_v30 = vld [vmem:[#allocation5 + $0x100] sm:$0xff] }
 0x196   :  { %v848_v31 = vsub.f32 %v4258_v60, %v846_v53  ;;  %v4528_v53 = vld [vmem:[#allocation8 + $0xd8] sm:$0xff] }
 0x197   :  { %v4449_v48 = vadd.f32 %v2856_v46, %v670_v44  ;;  %v4501_v46 = vld [vmem:[#allocation5 + $0x118] sm:$0xff]  ;;  %6845 = vst [vmem:[#allocation62_spill] sm:$0xff] %v4528_v53 }
 0x198   :  { %v850_v39 = vrot.slane %v848_v31, 6  ;;  %v4522_v44 = vld [vmem:[#allocation8 + $0xf8] sm:$0xff]  ;;  %v4534_v31 = vld [vmem:[#allocation8 + $0xe0] sm:$0xff] }
 0x199   :  { %748 = vmatmul.f32.vlgmr.msrb.gmra.mxu3 %v4449_v48  ;;  %768 = vmatmul.f32.vlgmr.msra.gmra.mxu0 %v4449_v48  ;;  %6844 = vst [vmem:[#allocation27_spill] sm:$0xff] %v4522_v44 }
 0x19a   :  { %788 = vmatmul.f32.vlgmr.msra.gmra.mxu1 %v4449_v48  ;;  %1004 = vmatpush.msrb.mxu3 %v4456_v41  ;;  %v852_v60 = vmul.f32 %v850_v39, %v836_v20  ;;  %6846 = vst [vmem:[#allocation28_spill] sm:$0xff] %v4534_v31  ;;  %v4541_v39 = vld [vmem:[#allocation8 + $0xc0] sm:$0xff]  ;;  %v4544_v20 = vld [vmem:[#allocation8 + $0x130] sm:$0xff] }
 0x19b   :  { %1024 = vmatpush.msra.mxu0 %v4459_v43  ;;  %1044 = vmatpush.msra.mxu1 %v4462_v22  ;;  %6848 = vst [vmem:[#allocation30_spill] sm:$0xff] %v4541_v39 }
 0x19c   :  { %1005 = vmatpush.msrb.mxu3 %v4465_v9  ;;  %v4474_v4 = vadd.f32 %v2858_v38, %v852_v60  ;;  %v4516_v38 = vld [vmem:[#allocation8 + $0xf0] sm:$0xff]  ;;  %v4547_v60 = vld [vmem:[#allocation5 + $0xb8] sm:$0xff] }
 0x19d   :  { %1025 = vmatpush.msra.mxu0 %v4468_v37  ;;  %1045 = vmatpush.msra.mxu1 %v4471_v32  ;;  %6849 = vst [vmem:[#allocation70_spill] sm:$0xff] %v4547_v60 }
 0x19e   :  { %1006 = vmatpush.msrb.mxu3 %v4476_v49  ;;  %v4486_v11 = vrot.slane %v4474_v4, 2 }
 0x19f   :  { %1026 = vmatpush.msra.mxu0 %v4479_v56  ;;  %1046 = vmatpush.msra.mxu1 %v4482_v15 }
 0x1a0   :  { %1007 = vmatpush.msrb.mxu3 %v4488_v12  ;;  %873 = vmatmul.f32.vlgmr.msra.gmra.mxu2 %v4486_v11 }
 0x1a1   :  { %1027 = vmatpush.msra.mxu0 %v4491_v42  ;;  %1047 = vmatpush.msra.mxu1 %v4494_v55 }
 0x1a2   :  { %893 = vmatmul.f32.vlgmr.msra.gmra.mxu3 %v4486_v11  ;;  %913 = vmatmul.f32.vlgmr.msrb.gmra.mxu0 %v4486_v11 }
 0x1a3   :  { %980 = vmatmul.f32.vlgmr.msrb.gmra.mxu1 %v4486_v11  ;;  %1008 = vmatpush.msrb.mxu3 %v4501_v46 }
 0x1a4   :  { %1028 = vmatpush.msra.mxu0 %v4504_v28  ;;  %1064 = vmatpush.msra.mxu2 %v4507_v25 }
 0x1a5   :  { %1048 = vmatpush.msra.mxu1 %v4510_v52  ;;  %1009 = vmatpush.msrb.mxu3 %v4513_v30 }
 0x1a6   :  { %1029 = vmatpush.msra.mxu0 %v4516_v38  ;;  %1065 = vmatpush.msra.mxu2 %v4519_v57 }
 0x1a7   :  { %1049 = vmatpush.msra.mxu1 %v4522_v44  ;;  %1010 = vmatpush.msrb.mxu3 %v4525_v51  ;;  %v4550_v44 = vld [vmem:[#allocation8 + $0xc8] sm:$0xff] }
 0x1a8   :  { %1030 = vmatpush.msra.mxu0 %v4528_v53  ;;  %1066 = vmatpush.msra.mxu2 %v4531_v27  ;;  %6850 = vst [vmem:[#allocation32_spill] sm:$0xff] %v4550_v44  ;;  %v4556_v53 = vld [vmem:[#allocation8 + $0x118] sm:$0xff] }
 0x1a9   :  { %1050 = vmatpush.msra.mxu1 %v4534_v31  ;;  %1000 = vmatmul.f32.vlgmr.msrb.gmra.mxu2 %v4486_v11  ;;  %v4553_v31 = vld [vmem:[#allocation8 + $0xa8] sm:$0xff]  ;;  %6852 = vst [vmem:[#allocation34_spill] sm:$0xff] %v4556_v53 }
 0x1aa   :  { %1011 = vmatpush.msrb.mxu3 %v4538_v35  ;;  %1031 = vmatpush.msra.mxu0 %v4541_v39  ;;  %6851 = vst [vmem:[#allocation74_spill] sm:$0xff] %v4553_v31  ;;  %v4559_v39 = vld [vmem:[#allocation5 + $0xa0] sm:$0xff]  ;;  %v4562_v35 = vld [vmem:[#allocation8 + $0xb0] sm:$0xff] }
 0x1ab   :  { %1067 = vmatpush.msra.mxu2 %v4544_v20  ;;  %1051 = vmatpush.msra.mxu1 %v4550_v44  ;;  %6853 = vst [vmem:[#allocation78_spill] sm:$0xff] %v4559_v39  ;;  %v4568_v44 = vld [vmem:[#allocation8 + $0x100] sm:$0xff] }
 0x1ac   :  { %1012 = vmatpush.msrb.mxu3 %v4547_v60  ;;  %1032 = vmatpush.msra.mxu0 %v4553_v31  ;;  %6854 = vst [vmem:[#allocation29_spill] sm:$0xff] %v4562_v35  ;;  %v4565_v60 = vld [vmem:[#allocation8 + $0x90] sm:$0xff]  ;;  %v4571_v31 = vld [vmem:[#allocation5 + $0x88] sm:$0xff] }
 0x1ad   :  { %1068 = vmatpush.msra.mxu2 %v4556_v53  ;;  %1052 = vmatpush.msra.mxu1 %v4562_v35  ;;  %6855 = vst [vmem:[#allocation40_spill] sm:$0xff] %v4565_v60  ;;  %v4574_v53 = vld [vmem:[#allocation8 + $0x98] sm:$0xff]  ;;  %v4580_v35 = vld [vmem:[#allocation8 + $0xe8] sm:$0xff] }
 0x1ae   :  { %1013 = vmatpush.msrb.mxu3 %v4559_v39  ;;  %1033 = vmatpush.msra.mxu0 %v4565_v60  ;;  %6856 = vst [vmem:[#allocation37_spill] sm:$0xff] %v4568_v44  ;;  %v4577_v39 = vld [vmem:[#allocation8 + $0x78] sm:$0xff]  ;;  %v4583_v60 = vld [vmem:[#allocation5 + $0x70] sm:$0xff] }
 0x1af   :  { %1069 = vmatpush.msra.mxu2 %v4568_v44  ;;  %6857 = vst [vmem:[#allocation82_spill] sm:$0xff] %v4571_v31  ;;  %1053 = vmatpush.msra.mxu1 %v4574_v53  ;;  %v4586_v44 = vld [vmem:[#allocation8 + $0x80] sm:$0xff] }
 0x1b0   :  { %1014 = vmatpush.msrb.mxu3 %v4571_v31  ;;  %6858 = vst [vmem:[#allocation31_spill] sm:$0xff] %v4574_v53  ;;  %1034 = vmatpush.msra.mxu0 %v4577_v39  ;;  %v4589_v31 = vld [vmem:[#allocation8 + $0x60] sm:$0xff]  ;;  %v4592_v53 = vld [vmem:[#allocation8 + $0xd0] sm:$0xff] }
 0x1b1   :  { %6859 = vst [vmem:[#allocation44_spill] sm:$0xff] %v4577_v39  ;;  %1070 = vmatpush.msra.mxu2 %v4580_v35  ;;  %1054 = vmatpush.msra.mxu1 %v4586_v44  ;;  %v4595_v39 = vld [vmem:[#allocation5 + $0x58] sm:$0xff] }
 0x1b2   :  { %6860 = vst [vmem:[#allocation41_spill] sm:$0xff] %v4580_v35  ;;  %1015 = vmatpush.msrb.mxu3 %v4583_v60  ;;  %1035 = vmatpush.msra.mxu0 %v4589_v31  ;;  %v4599_v35 = vld [vmem:[#allocation8 + $0x48] sm:$0xff] }
 0x1b3   :  { %6861 = vst [vmem:[#allocation86_spill] sm:$0xff] %v4583_v60  ;;  %1071 = vmatpush.msra.mxu2 %v4592_v53  ;;  %1055 = vmatpush.msra.mxu1 %v6771_v16  ;;  %v4602_v60 = vld [vmem:[#allocation8 + $0xb8] sm:$0xff]  ;;  %v4615_v16 = vld [vmem:[#allocation5 + $0x28] sm:$0xff] }
 0x1b4   :  { %6862 = vst [vmem:[#allocation33_spill] sm:$0xff] %v4586_v44  ;;  %1016 = vmatpush.msrb.mxu3 %v4595_v39  ;;  %1036 = vmatpush.msra.mxu0 %v4599_v35  ;;  %v4605_v44 = vld [vmem:[#allocation5 + $0x40] sm:$0xff] }
 0x1b5   :  { %6863 = vst [vmem:[#allocation48_spill] sm:$0xff] %v4589_v31  ;;  %1072 = vmatpush.msra.mxu2 %v4602_v60  ;;  %1056 = vmatpush.msra.mxu1 %v6773_v54  ;;  %v4609_v31 = vld [vmem:[#allocation8 + $0x30] sm:$0xff] }
 0x1b6   :  { %6864 = vst [vmem:[#allocation45_spill] sm:$0xff] %v4595_v39  ;;  %1017 = vmatpush.msrb.mxu3 %v4605_v44  ;;  %1037 = vmatpush.msra.mxu0 %v4609_v31  ;;  %v4612_v39 = vld [vmem:[#allocation8 + $0xa0] sm:$0xff]  ;;  %v4625_v54 = vld [vmem:[#allocation5 + $0x10] sm:$0xff] }
 0x1b7   :  { %6865 = vst [vmem:[#allocation90_spill] sm:$0xff] %v4599_v35  ;;  %1073 = vmatpush.msra.mxu2 %v4612_v39  ;;  %1057 = vmatpush.msra.mxu1 %v6775_v58  ;;  %v4619_v35 = vld [vmem:[#allocation8 + $0x18] sm:$0xff]  ;;  %v4633_v58 = vld [vmem:[#allocation7 + $0x168] sm:$0xff] }
 0x1b8   :  { %6866 = vst [vmem:[#allocation36_spill] sm:$0xff] %v4605_v44  ;;  %1018 = vmatpush.msrb.mxu3 %v4615_v16  ;;  %1038 = vmatpush.msra.mxu0 %v4619_v35  ;;  %v4622_v44 = vld [vmem:[#allocation8 + $0x88] sm:$0xff] }
 0x1b9   :  { %6867 = vst [vmem:[#allocation52_spill] sm:$0xff] %v4609_v31  ;;  %1074 = vmatpush.msra.mxu2 %v4622_v44  ;;  %1058 = vmatpush.msra.mxu1 %v6777_v47  ;;  %v4630_v31 = vld [vmem:[#allocation8] sm:$0xff]  ;;  %v4643_v47 = vld [vmem:[#allocation7 + $0x150] sm:$0xff] }
 0x1ba   :  { %6868 = vst [vmem:[#allocation49_spill] sm:$0xff] %v4615_v16  ;;  %1019 = vmatpush.msrb.mxu3 %v4625_v54  ;;  %1039 = vmatpush.msra.mxu0 %v4630_v31  ;;  %v4639_v16 = vld [vmem:[#allocation7 + $0x170] sm:$0xff] }
 0x1bb   :  { %6869 = vst [vmem:[#allocation39_spill] sm:$0xff] %v4619_v35  ;;  %1020 = vmatmul.f32.vlgmr.msrb.gmra.mxu3 %v4486_v11  ;;  %v4636_v35 = vld [vmem:[#allocation8 + $0x70] sm:$0xff]  ;;  %1059 = vmatpush.msra.mxu1 %v6781_v21  ;;  %v4646_v11 = vld [vmem:[#allocation8 + $0x58] sm:$0xff]  ;;  %v4659_v21 = vld [vmem:[#allocation7 + $0x140] sm:$0xff] }
 0x1bc   :  { %6870 = vst [vmem:[#allocation56_spill] sm:$0xff] %v4630_v31  ;;  %1149 = vmatpush.msra.mxu3 %v4633_v58  ;;  %1075 = vmatpush.msra.mxu2 %v4636_v35  ;;  %v4649_v31 = vld [vmem:[#allocation7 + $0x158] sm:$0xff] }
 0x1bd   :  { %6871 = vst [vmem:[#allocation53_spill] sm:$0xff] %v4633_v58  ;;  %1169 = vmatpush.msrb.mxu0 %v4639_v16  ;;  %1189 = vmatpush.msrb.mxu1 %v6785_v33  ;;  %v4653_v58 = vld [vmem:[#allocation7 + $0x138] sm:$0xff]  ;;  %v4669_v33 = vld [vmem:[#allocation7 + $0x128] sm:$0xff] }
 0x1be   :  { %6872 = vst [vmem:[#allocation43_spill] sm:$0xff] %v4639_v16  ;;  %1150 = vmatpush.msra.mxu3 %v4643_v47  ;;  %1076 = vmatpush.msra.mxu2 %v4646_v11  ;;  %v4656_v16 = vld [vmem:[#allocation8 + $0x40] sm:$0xff] }
 0x1bf   :  { %6873 = vst [vmem:[#allocation60_spill] sm:$0xff] %v4643_v47  ;;  %1170 = vmatpush.msrb.mxu0 %v4649_v31  ;;  %1190 = vmatpush.msrb.mxu1 %v6789_v14  ;;  %v4663_v47 = vld [vmem:[#allocation7 + $0x120] sm:$0xff]  ;;  %v4677_v14 = vld [vmem:[#allocation7 + $0x110] sm:$0xff] }
 0x1c0   :  { %6874 = vst [vmem:[#allocation57_spill] sm:$0xff] %v4649_v31  ;;  %1151 = vmatpush.msra.mxu3 %v4653_v58  ;;  %1077 = vmatpush.msra.mxu2 %v4656_v16  ;;  %v4666_v31 = vld [vmem:[#allocation8 + $0x28] sm:$0xff] }
 0x1c1   :  { %6875 = vst [vmem:[#allocation47_spill] sm:$0xff] %v4653_v58  ;;  %1171 = vmatpush.msrb.mxu0 %v4659_v21  ;;  %1191 = vmatpush.msrb.mxu1 %v4088_v45  ;;  %v4673_v58 = vld [vmem:[#allocation7 + $0x108] sm:$0xff]  ;;  %v4689_v45 = vld [vmem:[#allocation7 + $0xd8] sm:$0xff] }
 0x1c2   :  { %6876 = vst [vmem:[#allocation64_spill] sm:$0xff] %v4659_v21  ;;  %1152 = vmatpush.msra.mxu3 %v4663_v47  ;;  %1078 = vmatpush.msra.mxu2 %v4666_v31  ;;  %v4681_v21 = vld [vmem:[#allocation7 + $0xf0] sm:$0xff] }
 0x1c3   :  { %6877 = vst [vmem:[#allocation61_spill] sm:$0xff] %v4663_v47  ;;  %1172 = vmatpush.msrb.mxu0 %v4669_v33  ;;  %1192 = vmatpush.msrb.mxu1 %v4101_v1  ;;  %v4701_v1 = vld [vmem:[#allocation7 + $0xc8] sm:$0xff] }
 0x1c4   :  { %6878 = vst [vmem:[#allocation51_spill] sm:$0xff] %v4669_v33  ;;  %1153 = vmatpush.msra.mxu3 %v4673_v58  ;;  %1079 = vmatpush.msra.mxu2 %v6825_v34  ;;  %v4685_v33 = vld [vmem:[#allocation7 + $0xf8] sm:$0xff]  ;;  %v4693_v34 = vld [vmem:[#allocation7 + $0xe0] sm:$0xff] }
 0x1c5   :  { %6879 = vst [vmem:[#allocation68_spill] sm:$0xff] %v4673_v58  ;;  %1173 = vmatpush.msrb.mxu0 %v4677_v14  ;;  %1193 = vmatpush.msrb.mxu1 %v4113_v23  ;;  %v4709_v23 = vld [vmem:[#allocation7 + $0xb0] sm:$0xff] }
 0x1c6   :  { %6880 = vst [vmem:[#allocation65_spill] sm:$0xff] %v4677_v14  ;;  %1256 = vmatpush.msrb.mxu2 %v4330_v24  ;;  %1154 = vmatpush.msra.mxu3 %v4681_v21  ;;  %v4697_v14 = vld [vmem:[#allocation7 + $0xc0] sm:$0xff] }
 0x1c7   :  { %6881 = vst [vmem:[#allocation55_spill] sm:$0xff] %v4681_v21  ;;  %1174 = vmatpush.msrb.mxu0 %v4685_v33  ;;  %1194 = vmatpush.msrb.mxu1 %v4121_v63  ;;  %v4717_v63 = vld [vmem:[#allocation7 + $0x98] sm:$0xff] }
 0x1c8   :  { %6882 = vst [vmem:[#allocation72_spill] sm:$0xff] %v4685_v33  ;;  %1257 = vmatpush.msrb.mxu2 %v4338_v0  ;;  %1155 = vmatpush.msra.mxu3 %v4689_v45  ;;  %v4705_v33 = vld [vmem:[#allocation7 + $0xa8] sm:$0xff] }
 0x1c9   :  { %6883 = vst [vmem:[#allocation69_spill] sm:$0xff] %v4689_v45  ;;  %1175 = vmatpush.msrb.mxu0 %v4693_v34  ;;  %1195 = vmatpush.msrb.mxu1 %v4127_v7  ;;  %v4725_v7 = vld [vmem:[#allocation7 + $0x80] sm:$0xff] }
 0x1ca   :  { %6884 = vst [vmem:[#allocation59_spill] sm:$0xff] %v4693_v34  ;;  %1258 = vmatpush.msrb.mxu2 %v4346_v61  ;;  %1156 = vmatpush.msra.mxu3 %v4697_v14  ;;  %v4713_v34 = vld [vmem:[#allocation7 + $0x90] sm:$0xff] }
 0x1cb   :  { %6885 = vst [vmem:[#allocation76_spill] sm:$0xff] %v4697_v14  ;;  %1176 = vmatpush.msrb.mxu0 %v4701_v1  ;;  %1196 = vmatpush.msrb.mxu1 %v4137_v5  ;;  %v4733_v5 = vld [vmem:[#allocation7 + $0x68] sm:$0xff] }
 0x1cc   :  { %6886 = vst [vmem:[#allocation73_spill] sm:$0xff] %v4701_v1  ;;  %1259 = vmatpush.msrb.mxu2 %v4352_v40  ;;  %1157 = vmatpush.msra.mxu3 %v4705_v33  ;;  %v4721_v1 = vld [vmem:[#allocation7 + $0x78] sm:$0xff] }
 0x1cd   :  { %6887 = vst [vmem:[#allocation63_spill] sm:$0xff] %v4705_v33  ;;  %1177 = vmatpush.msrb.mxu0 %v4709_v23  ;;  %1197 = vmatpush.msrb.mxu1 %v4143_v6  ;;  %v4741_v6 = vld [vmem:[#allocation7 + $0x50] sm:$0xff] }
 0x1ce   :  { %6888 = vst [vmem:[#allocation80_spill] sm:$0xff] %v4709_v23  ;;  %1260 = vmatpush.msrb.mxu2 %v4358_v50  ;;  %1158 = vmatpush.msra.mxu3 %v4713_v34  ;;  %v4729_v23 = vld [vmem:[#allocation7 + $0x60] sm:$0xff] }
 0x1cf   :  { %6889 = vst [vmem:[#allocation77_spill] sm:$0xff] %v4713_v34  ;;  %1178 = vmatpush.msrb.mxu0 %v4717_v63  ;;  %1198 = vmatpush.msrb.mxu1 %v4150_v8  ;;  %v4749_v8 = vld [vmem:[#allocation7 + $0x38] sm:$0xff] }
 0x1d0   :  { %6890 = vst [vmem:[#allocation67_spill] sm:$0xff] %v4717_v63  ;;  %1261 = vmatpush.msrb.mxu2 %v4364_v2  ;;  %1159 = vmatpush.msra.mxu3 %v4721_v1  ;;  %v4737_v63 = vld [vmem:[#allocation7 + $0x48] sm:$0xff] }
 0x1d1   :  { %6891 = vst [vmem:[#allocation84_spill] sm:$0xff] %v4721_v1  ;;  %1179 = vmatpush.msrb.mxu0 %v4725_v7  ;;  %1199 = vmatpush.msrb.mxu1 %v4156_v18  ;;  %v4757_v18 = vld [vmem:[#allocation7 + $0x20] sm:$0xff] }
 0x1d2   :  { %6892 = vst [vmem:[#allocation81_spill] sm:$0xff] %v4725_v7  ;;  %1262 = vmatpush.msrb.mxu2 %v4370_v13  ;;  %1160 = vmatpush.msra.mxu3 %v4729_v23  ;;  %v4745_v13 = vld [vmem:[#allocation7 + $0x30] sm:$0xff] }
 0x1d3   :  { %6893 = vst [vmem:[#allocation71_spill] sm:$0xff] %v4729_v23  ;;  %1180 = vmatpush.msrb.mxu0 %v4733_v5  ;;  %1200 = vmatpush.msrb.mxu1 %v4162_v10  ;;  %v4763_v10 = vld [vmem:[#allocation7] sm:$0xff]  ;;  %v6928_v7 = vld [vmem:[#allocation54_spill] sm:$0xff]  ;;  %v6929_v23 = vld [vmem:[#allocation25_spill] sm:$0xff] }
 0x1d4   :  { %6894 = vst [vmem:[#allocation88_spill] sm:$0xff] %v4733_v5  ;;  %1263 = vmatpush.msrb.mxu2 %v4376_v59  ;;  %1161 = vmatpush.msra.mxu3 %v4737_v63  ;;  %v4753_v59 = vld [vmem:[#allocation7 + $0x18] sm:$0xff] }
 0x1d5   :  { %6895 = vst [vmem:[#allocation85_spill] sm:$0xff] %v4737_v63  ;;  %1181 = vmatpush.msrb.mxu0 %v4741_v6  ;;  %1201 = vmatpush.msrb.mxu1 %v4168_v26  ;;  %v4771_v26 = vld [vmem:[#allocation5 + $0x60] sm:$0xff] }
 0x1d6   :  { %6896 = vst [vmem:[#allocation75_spill] sm:$0xff] %v4741_v6  ;;  %1264 = vmatpush.msrb.mxu2 %v4382_v36  ;;  %1162 = vmatpush.msra.mxu3 %v4745_v13  ;;  %v4760_v36 = vld [vmem:[#allocation5 + $0x78] sm:$0xff] }
 0x1d7   :  { %6897 = vst [vmem:[#allocation91_spill] sm:$0xff] %v4745_v13  ;;  %1182 = vmatpush.msrb.mxu0 %v4749_v8  ;;  %1202 = vmatpush.msrb.mxu1 %v4174_v19  ;;  %v6910_v19 = vld [vmem:[#allocation26_spill] sm:$0xff] }
 0x1d8   :  { %6898 = vst [vmem:[#allocation89_spill] sm:$0xff] %v4749_v8  ;;  %1265 = vmatpush.msrb.mxu2 %v4386_v3  ;;  %1163 = vmatpush.msra.mxu3 %v4753_v59  ;;  %v6903_v3 = vld [vmem:[#allocation24_spill] sm:$0xff]  ;;  %v4785_v6 = vld [vmem:[#allocation5 + $0x18] sm:$0xff] }
 0x1d9   :  { %6899 = vst [vmem:[#allocation79_spill] sm:$0xff] %v4753_v59  ;;  %1183 = vmatpush.msrb.mxu0 %v4757_v18  ;;  %v4768_v8 = vld [vmem:[#allocation7 + $0x8] sm:$0xff]  ;;  %v6907_v59 = vld [vmem:[#allocation35_spill] sm:$0xff] }
 0x1da   :  { %6900 = vst [vmem:[#allocation92_spill] sm:$0xff] %v4757_v18  ;;  %1266 = vmatpush.msrb.mxu2 %v4760_v36  ;;  %1164 = vmatpush.msra.mxu3 %v4763_v10  ;;  %v6906_v18 = vld [vmem:[#allocation97_spill] sm:$0xff] }
 0x1db   :  { %6901 = vst [vmem:[#allocation83_spill] sm:$0xff] %v4760_v36  ;;  %1184 = vmatpush.msrb.mxu0 %v4768_v8  ;;  %1203 = vmatpush.msrb.mxu1 %v6906_v18  ;;  %v4776_v36 = vld [vmem:[#allocation5 + $0x48] sm:$0xff]  ;;  %v6914_v18 = vld [vmem:[#allocation42_spill] sm:$0xff] }
 0x1dc   :  { %6902 = vst [vmem:[#allocation100_spill] sm:$0xff] %v4763_v10  ;;  %1276 = vmatpush.msrb.mxu3 %v6903_v3  ;;  %1267 = vmatpush.msrb.mxu2 %v4771_v26  ;;  %v6909_v10 = vld [vmem:[#allocation98_spill] sm:$0xff] }
 0x1dd   :  { %6904 = vst [vmem:[#allocation24_spill] sm:$0xff] %v4768_v8  ;;  %1204 = vmatpush.msrb.mxu1 %v6909_v10  ;;  %v4781_v3 = vld [vmem:[#allocation5 + $0x30] sm:$0xff] }
 0x1de   :  { %6905 = vst [vmem:[#allocation101_spill] sm:$0xff] %v4771_v26  ;;  %1277 = vmatpush.msrb.mxu3 %v6907_v59  ;;  %1268 = vmatpush.msrb.mxu2 %v4776_v36  ;;  %v6912_v8 = vld [vmem:[#allocation38_spill] sm:$0xff]  ;;  %v4789_v59 = vld [vmem:[#allocation5] sm:$0xff] }
 0x1df   :  { %6908 = vst [vmem:[#allocation97_spill] sm:$0xff] %v4776_v36  ;;  %v6916_v36 = vld [vmem:[#allocation46_spill] sm:$0xff] }
 0x1e0   :  { %1278 = vmatpush.msrb.mxu3 %v6910_v19  ;;  %6911 = vst [vmem:[#allocation35_spill] sm:$0xff] %v4781_v3  ;;  %1269 = vmatpush.msrb.mxu2 %v4781_v3  ;;  %v6917_v10 = vld [vmem:[#allocation22_spill] sm:$0xff]  ;;  %v6927_v3 = vld [vmem:[#allocation96_spill] sm:$0xff] }
 0x1e1   :  { %6913 = vst [vmem:[#allocation98_spill] sm:$0xff] %v4785_v6  ;;  %v6918_v19 = vld [vmem:[#allocation50_spill] sm:$0xff] }
 0x1e2   :  { %1279 = vmatpush.msrb.mxu3 %v6912_v8  ;;  %1270 = vmatpush.msrb.mxu2 %v4785_v6  ;;  %6915 = vst [vmem:[#allocation26_spill] sm:$0xff] %v4789_v59  ;;  %v4795_v26 = vld [vmem:[#allocation5 + $0xb0] sm:$0xff]  ;;  %v4798_v8 = vld [vmem:[#allocation5 + $0x98] sm:$0xff]  ;;  %v4801_v6 = vld [vmem:[#allocation5 + $0x80] sm:$0xff] }
 0x1e3   :  { %6919 = vst [vmem:[#allocation38_spill] sm:$0xff] %v4795_v26 }
 0x1e4   :  { %1280 = vmatpush.msrb.mxu3 %v6914_v18  ;;  %1271 = vmatpush.msrb.mxu2 %v4789_v59  ;;  %6920 = vst [vmem:[#allocation42_spill] sm:$0xff] %v4798_v8  ;;  %v4804_v18 = vld [vmem:[#allocation5 + $0x68] sm:$0xff] }
 0x1e5   :  { %6921 = vst [vmem:[#allocation46_spill] sm:$0xff] %v4801_v6 }
 0x1e6   :  { %1281 = vmatpush.msrb.mxu3 %v6916_v36  ;;  %6922 = vst [vmem:[#allocation22_spill] sm:$0xff] %v4804_v18  ;;  %v4807_v36 = vld [vmem:[#allocation5 + $0x50] sm:$0xff] }
 0x1e7   :  { %6923 = vst [vmem:[#allocation50_spill] sm:$0xff] %v4807_v36 }
 0x1e8   :  { %1282 = vmatpush.msrb.mxu3 %v6917_v10  ;;  %v4810_v10 = vld [vmem:[#allocation5 + $0x38] sm:$0xff] }
 0x1e9   :  { %6924 = vst [vmem:[#allocation102_spill] sm:$0xff] %v4810_v10 }
 0x1ea   :  { %1283 = vmatpush.msrb.mxu3 %v6918_v19  ;;  %v4813_v19 = vld [vmem:[#allocation5 + $0x20] sm:$0xff] }
 0x1eb   :  { %6925 = vst [vmem:[#allocation103_spill] sm:$0xff] %v4813_v19 }
 0x1ec   :  { %1284 = vmatpush.msrb.mxu3 %v4795_v26 }
 0x1ee   :  { %1285 = vmatpush.msrb.mxu3 %v4798_v8  ;;  %v4816_v8 = vld [vmem:[#allocation5 + $0x8] sm:$0xff] }
 0x1ef   :  { %6926 = vst [vmem:[#allocation104_spill] sm:$0xff] %v4816_v8 }
 0x1f0   :  { %1286 = vmatpush.msrb.mxu3 %v4801_v6 }
 0x1f2   :  { %1287 = vmatpush.msrb.mxu3 %v4804_v18 }
 0x1f4   :  { %1288 = vmatpush.msrb.mxu3 %v4807_v36 }
 0x1f6   :  { %1289 = vmatpush.msrb.mxu3 %v4810_v10 }
 0x1f8   :  { %1290 = vmatpush.msrb.mxu3 %v4813_v19 }
 0x1fa   :  { %1291 = vmatpush.msrb.mxu3 %v4816_v8 }
 0x216   :  { %v769_v34 = vpop.f32.mrf.mxu0 }
 0x217   :  { %v4819_v6 = vpop.f32.mrf.mxu1 }
 0x218   :  { %v957_v47 = vadd.f32 %v4426_v29, %v4819_v6 }
 0x21c   :  { %v749_v26 = vpop.f32.mrf.mxu3 }
 0x220   :  { %v981_v18 = vpop.f32.mrf.mxu1 }
 0x221   :  { %v1086_v59 = vrot.slane %v981_v18, 4 }
 0x223   :  { %v1090_v13 = vadd.f32 %v1086_v59, %v6927_v3  ;;  %v874_v5 = vpop.f32.mrf.mxu2 }
 0x224   :  { %v875_v10 = vadd.f32 %v874_v5, %v6928_v7 }
 0x225   :  { %v2791_v36 = vmul.f32 -1.442695, %v1090_v13  ;;  %v894_v63 = vpop.f32.mrf.mxu3  ;;  %v6930_v13 = vld [vmem:[#allocation95_spill] sm:$0xff] }
 0x226   :  { %v895_v1 = vadd.f32 %v894_v63, %v6929_v23  ;;  %v917_v19 = vadd.f32 %v875_v10, %v749_v26 }
 0x227   :  { %2859 = vpow2.f32 %v2791_v36 }
 0x228   :  { %v918_v2 = vadd.f32 %v895_v1, %v769_v34  ;;  %v2789_v33 = vmul.f32 -1.442695, %v917_v19 }
 0x22a   :  { %v2790_v8 = vmul.f32 -1.442695, %v918_v2  ;;  %2861 = vpow2.f32 %v2789_v33 }
 0x22c   :  { %2863 = vpow2.f32 %v2790_v8  ;;  %v1001_v14 = vpop.f32.mrf.mxu2 }
 0x22d   :  { %v2860_v50 = vpop.eup %2859  ;;  %v1087_v40 = vrot.slane %v1001_v14, 4 }
 0x22e   :  { %v1098_v18 = vadd.f32 1.0, %v2860_v50 }
 0x22f   :  { %v1091_v59 = vadd.f32 %v1087_v40, %v6930_v13 }
 0x230   :  { %2865 = vrcp.f32 %v1098_v18  ;;  %v2862_v3 = vpop.eup %2861  ;;  %v1109_v26 = vand.u32 2147483647, %v1098_v18  ;;  %v1111_v40 = vand.u32 2147483648, %v1098_v18  ;;  %vm1105_vm10 = vweird.f32 %v1098_v18 }
 0x231   :  { %v2792_v45 = vmul.f32 -1.442695, %v1091_v59  ;;  %v925_v7 = vadd.f32 1.0, %v2862_v3 }
 0x232   :  { %v2864_v5 = vpop.eup %2863  ;;  %vm1110_vm11 = vcmp.eq.f32.partialorder %v1109_v26, 8.507059e+37 }
 0x233   :  { %v4825_v63 = vadd.f32 1.0, %v2864_v5  ;;  %2867 = vpow2.f32 %v2792_v45  ;;  %v938_v59 = vand.u32 2147483648, %v925_v7  ;;  %v936_v23 = vand.u32 2147483647, %v925_v7 }
 0x234   :  { %2869 = vrcp.f32 %v925_v7  ;;  %vm932_vm14 = vweird.f32 %v925_v7 }
 0x235   :  { %2871 = vrcp.f32 %v4825_v63  ;;  %vm937_vm0 = vcmp.eq.f32.partialorder %v936_v23, 8.507059e+37  ;;  %vm947_vm3 = vweird.f32 %v4825_v63 }
 0x236   :  { %v2866_v34 = vpop.eup %2865 }
 0x237   :  { %v1101_v2 = vmul.f32 %v2866_v34, %v1098_v18  ;;  %vm1106_vm9 = vweird.f32 %v2866_v34  ;;  %v939_v18 = vor.u32 1.1754944e-38, %v938_v59 }
 0x238   :  { %vm1107_vm12 = vmor %vm1105_vm10, %vm1106_vm9 }
 0x239   :  { %v1102_v33 = vsub.f32 1.0, %v1101_v2  ;;  %v2868_v1 = vpop.eup %2867  ;;  %v1112_v2 = vor.u32 1.1754944e-38, %v1111_v40 }
 0x23a   :  { %v2870_v50 = vpop.eup %2869  ;;  %v4828_v14 = vadd.f32 1.0, %v2868_v1  ;;  %v6931_v1 = vld [vmem:[#allocation99_spill] sm:$0xff] }
 0x23b   :  { %v1103_v8 = vmul.f32 %v2866_v34, %v1102_v33  ;;  %v4830_v36 = vpop.eup %2871  ;;  %v928_v10 = vmul.f32 %v2870_v50, %v925_v7  ;;  %vm933_vm13 = vweird.f32 %v2870_v50 }
 0x23c   :  { %2873 = vrcp.f32 %v4828_v14  ;;  %v943_v5 = vmul.f32 %v4830_v36, %v4825_v63  ;;  %vm934_vm15 = vmor %vm932_vm14, %vm933_vm13  ;;  %vm948_vm1 = vweird.f32 %v4830_v36  ;;  %vm1120_vm4 = vweird.f32 %v4828_v14 }
 0x23d   :  { %v929_v45 = vsub.f32 1.0, %v928_v10  ;;  %v1104_v19 = vadd.f32 %v2866_v34, %v1103_v8  ;;  %v914_v8 = vpop.f32.mrf.mxu0  ;;  %v1124_v23 = vand.u32 2147483647, %v4828_v14  ;;  %vm949_vm5 = vmor %vm947_vm3, %vm948_vm1 }
 0x23e   :  { %v1021_v3 = vpop.f32.mrf.mxu3  ;;  %v944_v26 = vsub.f32 1.0, %v943_v5 }
 0x23f   :  { %v1130_v33 = vadd.f32 %v6931_v1, %v1021_v3  ;;  %v930_v13 = vmul.f32 %v2870_v50, %v929_v45  ;;  %v1108_v61 = vsel %vm1107_vm12, %v2866_v34, %v1104_v19  ;;  %vm1125_vm8 = vcmp.eq.f32.partialorder %v1124_v23, 8.507059e+37  ;;  %v6969_v23 = vld [vmem:[#allocation18_spill] sm:$0xff] }
 0x240   :  { %v1113_v21 = vsel %vm1110_vm11, %v1112_v2, %v1108_v61  ;;  %v915_v61 = vadd.f32 %v914_v8, %v4428_v62  ;;  %v945_v19 = vmul.f32 %v4830_v36, %v944_v26 }
 0x241   :  { %v1132_v0 = vrot.slane %v1130_v33, 4  ;;  %v931_v58 = vadd.f32 %v2870_v50, %v930_v13 }
 0x242   :  { %v2874_v10 = vpop.eup %2873 }
 0x243   :  { %v1134_v24 = vmul.f32 %v1132_v0, %v1113_v21  ;;  %v1116_v40 = vmul.f32 %v2874_v10, %v4828_v14  ;;  %v935_v45 = vsel %vm934_vm15, %v2870_v50, %v931_v58  ;;  %v946_v0 = vadd.f32 %v4830_v36, %v945_v19  ;;  %v6961_v19 = vld [vmem:[#allocation43_spill] sm:$0xff] }
 0x244   :  { %v940_v34 = vsel %vm937_vm0, %v939_v18, %v935_v45  ;;  %vm1121_vm2 = vweird.f32 %v2874_v10  ;;  %v953_v58 = vand.u32 2147483648, %v4825_v63  ;;  %v1126_v21 = vand.u32 2147483648, %v4828_v14 }
 0x245   :  { %v1135_v3 = vadd.f32 %v1134_v24, %v4230_v17  ;;  %v1117_v13 = vsub.f32 1.0, %v1116_v40  ;;  %v958_v7 = vmul.f32 %v957_v47, %v940_v34  ;;  %v951_v47 = vand.u32 2147483647, %v4825_v63  ;;  %vm1122_vm6 = vmor %vm1120_vm4, %vm1121_vm2 }
 0x246   :  { %v950_v50 = vsel %vm949_vm5, %v4830_v36, %v946_v0  ;;  %v954_v8 = vor.u32 1.1754944e-38, %v953_v58  ;;  %v1127_v18 = vor.u32 1.1754944e-38, %v1126_v21  ;;  %v6956_v36 = vld [vmem:[#allocation52_spill] sm:$0xff]  ;;  %v4947_v0 = vld [vmem:[#allocation8 + $0x10] sm:$0xff]  ;;  %v4952_v58 = vld [vmem:[#allocation7 + $0x178] sm:$0xff] }
 0x247   :  { %2875 = vtanh.f32 %v1135_v3  ;;  %v1118_v59 = vmul.f32 %v2874_v10, %v1117_v13  ;;  %v959_v5 = vadd.f32 %v958_v7, %v915_v61  ;;  %vm952_vm7 = vcmp.eq.f32.partialorder %v951_v47, 8.507059e+37  ;;  %v4931_v13 = vld [vmem:[#allocation8 + $0x38] sm:$0xff]  ;;  %v6960_v7 = vld [vmem:[#allocation60_spill] sm:$0xff] }
 0x248   :  { %v955_v40 = vsel %vm952_vm7, %v954_v8, %v950_v50  ;;  %v6968_v21 = vld [vmem:[#allocation51_spill] sm:$0xff]  ;;  %v6971_v50 = vld [vmem:[#allocation65_spill] sm:$0xff]  ;;  %v6974_v8 = vld [vmem:[#allocation72_spill] sm:$0xff] }
 0x249   :  { %2877 = vtanh.f32 %v959_v5  ;;  %v1119_v29 = vadd.f32 %v2874_v10, %v1118_v59  ;;  %v6963_v59 = vld [vmem:[#allocation57_spill] sm:$0xff]  ;;  %v4958_v47 = vld [vmem:[#allocation7 + $0x160] sm:$0xff] }
 0x24a   :  { %v4944_v5 = vld [vmem:[#allocation8 + $0x8] sm:$0xff] }
 0x24b   :  { %v1123_v1 = vsel %vm1122_vm6, %v2874_v10, %v1119_v29  ;;  %v6958_v10 = vld [vmem:[#allocation53_spill] sm:$0xff]  ;;  %v6965_v29 = vld [vmem:[#allocation64_spill] sm:$0xff] }
 0x24c   :  { %v1128_v45 = vsel %vm1125_vm8, %v1127_v18, %v1123_v1  ;;  %v6972_v1 = vld [vmem:[#allocation17_spill] sm:$0xff] }
 0x24d   :  { %v2876_v24 = vpop.eup %2875  ;;  %v4970_v18 = vld [vmem:[#allocation7 + $0x130] sm:$0xff] }
 0x24e   :  { %v1138_v6 = vrot.slane %v2876_v24, 2 }
 0x24f   :  { %v2878_v2 = vpop.eup %2877 }
 0x250   :  { %v1140_v33 = vsub.f32 %v4474_v4, %v1138_v6  ;;  %v961_v26 = vsub.f32 %v4449_v48, %v2878_v2  ;;  %v6932_v48 = vld [vmem:[#allocation66_spill] sm:$0xff]  ;;  %v6970_v6 = vld [vmem:[#allocation55_spill] sm:$0xff] }
 0x252   :  { %v1142_v63 = vrot.slane %v1140_v33, 6  ;;  %v962_v3 = vmul.f32 %v961_v26, %v955_v40  ;;  %v6973_v33 = vld [vmem:[#allocation69_spill] sm:$0xff]  ;;  %v6975_v26 = vld [vmem:[#allocation19_spill] sm:$0xff] }
 0x253   :  { %v6977_v40 = vld [vmem:[#allocation59_spill] sm:$0xff] }
 0x254   :  { %v1144_v14 = vmul.f32 %v1142_v63, %v1128_v45  ;;  %v4853_v34 = vadd.f32 %v2878_v2, %v962_v3  ;;  %v4964_v2 = vld [vmem:[#allocation7 + $0x148] sm:$0xff]  ;;  %v4976_v45 = vld [vmem:[#allocation7 + $0x118] sm:$0xff] }
 0x255   :  { %v6976_v63 = vld [vmem:[#allocation76_spill] sm:$0xff] }
 0x256   :  { %v4855_v61 = vadd.f32 %v2876_v24, %v1144_v14  ;;  %1040 = vmatmul.f32.vlgmr.msra.gmra.mxu0 %v4853_v34  ;;  %1060 = vmatmul.f32.vlgmr.msra.gmra.mxu1 %v4853_v34  ;;  %v6967_v24 = vld [vmem:[#allocation68_spill] sm:$0xff]  ;;  %v6979_v14 = vld [vmem:[#allocation63_spill] sm:$0xff] }
 0x257   :  { %1080 = vmatmul.f32.vlgmr.msra.gmra.mxu2 %v4853_v34  ;;  %1296 = vmatpush.msra.mxu0 %v4456_v41  ;;  %v6933_v41 = vld [vmem:[#allocation34_spill] sm:$0xff]  ;;  %v6978_v3 = vld [vmem:[#allocation20_spill] sm:$0xff] }
 0x258   :  { %v4860_v4 = vrot.slane %v4855_v61, 4  ;;  %1316 = vmatpush.msra.mxu1 %v4459_v43  ;;  %1336 = vmatpush.msra.mxu2 %v4462_v22  ;;  %v6934_v43 = vld [vmem:[#allocation62_spill] sm:$0xff]  ;;  %v6935_v22 = vld [vmem:[#allocation27_spill] sm:$0xff] }
 0x259   :  { %1297 = vmatpush.msra.mxu0 %v4465_v9  ;;  %v6936_v9 = vld [vmem:[#allocation70_spill] sm:$0xff] }
 0x25a   :  { %1165 = vmatmul.f32.vlgmr.msra.gmra.mxu3 %v4860_v4  ;;  %1317 = vmatpush.msra.mxu1 %v4468_v37  ;;  %v6937_v37 = vld [vmem:[#allocation37_spill] sm:$0xff] }
 0x25b   :  { %1356 = vmatpush.msra.mxu3 %v4507_v25  ;;  %1298 = vmatpush.msra.mxu0 %v4476_v49  ;;  %v6939_v49 = vld [vmem:[#allocation28_spill] sm:$0xff]  ;;  %v6947_v25 = vld [vmem:[#allocation86_spill] sm:$0xff] }
 0x25c   :  { %1337 = vmatpush.msra.mxu2 %v4471_v32  ;;  %1318 = vmatpush.msra.mxu1 %v4479_v56  ;;  %v6938_v32 = vld [vmem:[#allocation30_spill] sm:$0xff] }
 0x25d   :  { %1357 = vmatpush.msra.mxu3 %v4519_v57  ;;  %1299 = vmatpush.msra.mxu0 %v4488_v12  ;;  %v6940_v56 = vld [vmem:[#allocation78_spill] sm:$0xff]  ;;  %v6951_v57 = vld [vmem:[#allocation48_spill] sm:$0xff] }
 0x25e   :  { %1338 = vmatpush.msra.mxu2 %v4482_v15  ;;  %1185 = vmatmul.f32.vlgmr.msrb.gmra.mxu0 %v4860_v4  ;;  %v6941_v15 = vld [vmem:[#allocation41_spill] sm:$0xff]  ;;  %v6942_v12 = vld [vmem:[#allocation74_spill] sm:$0xff] }
 0x25f   :  { %1205 = vmatmul.f32.vlgmr.msrb.gmra.mxu1 %v4860_v4  ;;  %1272 = vmatmul.f32.vlgmr.msrb.gmra.mxu2 %v4860_v4 }
 0x260   :  { %1300 = vmatpush.msra.mxu0 %v4501_v46  ;;  %1319 = vmatpush.msra.mxu1 %v4491_v42  ;;  %v6943_v42 = vld [vmem:[#allocation32_spill] sm:$0xff] }
 0x261   :  { %1358 = vmatpush.msra.mxu3 %v4531_v27  ;;  %1339 = vmatpush.msra.mxu2 %v4494_v55  ;;  %v6944_v55 = vld [vmem:[#allocation82_spill] sm:$0xff]  ;;  %v6945_v46 = vld [vmem:[#allocation40_spill] sm:$0xff] }
 0x262   :  { %1301 = vmatpush.msra.mxu0 %v4513_v30  ;;  %1292 = vmatmul.f32.vlgmr.msrb.gmra.mxu3 %v4860_v4  ;;  %v6949_v30 = vld [vmem:[#allocation31_spill] sm:$0xff]  ;;  %v6954_v27 = vld [vmem:[#allocation90_spill] sm:$0xff] }
 0x263   :  { %1320 = vmatpush.msra.mxu1 %v4504_v28  ;;  %1359 = vmatpush.msra.mxu3 %v4544_v20  ;;  %v6946_v28 = vld [vmem:[#allocation29_spill] sm:$0xff] }
 0x264   :  { %1302 = vmatpush.msra.mxu0 %v4525_v51  ;;  %1340 = vmatpush.msra.mxu2 %v4510_v52  ;;  %v6948_v52 = vld [vmem:[#allocation44_spill] sm:$0xff]  ;;  %v6952_v51 = vld [vmem:[#allocation33_spill] sm:$0xff] }
 0x265   :  { %1321 = vmatpush.msra.mxu1 %v4516_v38  ;;  %1360 = vmatpush.msra.mxu3 %v6933_v41  ;;  %v6950_v38 = vld [vmem:[#allocation45_spill] sm:$0xff] }
 0x266   :  { %1303 = vmatpush.msra.mxu0 %v6932_v48  ;;  %1341 = vmatpush.msra.mxu2 %v6935_v22  ;;  %v4917_v20 = vld [vmem:[#allocation8 + $0x68] sm:$0xff]  ;;  %v4982_v48 = vld [vmem:[#allocation7 + $0x100] sm:$0xff] }
 0x267   :  { %1322 = vmatpush.msra.mxu1 %v6934_v43  ;;  %1361 = vmatpush.msra.mxu3 %v6937_v37  ;;  %v6981_v41 = vld [vmem:[#allocation21_spill] sm:$0xff]  ;;  %v6983_v22 = vld [vmem:[#allocation80_spill] sm:$0xff]  ;;  %v4991_v37 = vld [vmem:[#allocation5 + $0xd8] sm:$0xff] }
 0x268   :  { %1304 = vmatpush.msra.mxu0 %v6936_v9  ;;  %1342 = vmatpush.msra.mxu2 %v6939_v49  ;;  %v6982_v43 = vld [vmem:[#allocation77_spill] sm:$0xff]  ;;  %v6985_v49 = vld [vmem:[#allocation67_spill] sm:$0xff] }
 0x269   :  { %1323 = vmatpush.msra.mxu1 %v6938_v32  ;;  %1362 = vmatpush.msra.mxu3 %v6941_v15  ;;  %v4988_v9 = vld [vmem:[#allocation7 + $0xe8] sm:$0xff]  ;;  %v4999_v15 = vld [vmem:[#allocation5 + $0xc0] sm:$0xff] }
 0x26a   :  { %1305 = vmatpush.msra.mxu0 %v6940_v56  ;;  %1343 = vmatpush.msra.mxu2 %v6943_v42  ;;  %v6984_v32 = vld [vmem:[#allocation84_spill] sm:$0xff]  ;;  %v4996_v56 = vld [vmem:[#allocation7 + $0xd0] sm:$0xff] }
 0x26b   :  { %1324 = vmatpush.msra.mxu1 %v6942_v12  ;;  %1363 = vmatpush.msra.mxu3 %v4592_v53  ;;  %v6953_v53 = vld [vmem:[#allocation36_spill] sm:$0xff]  ;;  %v6986_v12 = vld [vmem:[#allocation71_spill] sm:$0xff]  ;;  %v6987_v42 = vld [vmem:[#allocation81_spill] sm:$0xff] }
 0x26c   :  { %1306 = vmatpush.msra.mxu0 %v6944_v55  ;;  %1344 = vmatpush.msra.mxu2 %v6946_v28  ;;  %v5004_v55 = vld [vmem:[#allocation7 + $0xb8] sm:$0xff]  ;;  %v6988_v28 = vld [vmem:[#allocation85_spill] sm:$0xff] }
 0x26d   :  { %1325 = vmatpush.msra.mxu1 %v6945_v46  ;;  %1364 = vmatpush.msra.mxu3 %v4602_v60  ;;  %v6955_v60 = vld [vmem:[#allocation49_spill] sm:$0xff] }
 0x26e   :  { %1307 = vmatpush.msra.mxu0 %v6947_v25  ;;  %1345 = vmatpush.msra.mxu2 %v6949_v30  ;;  %v5007_v46 = vld [vmem:[#allocation5 + $0xa8] sm:$0xff]  ;;  %v5015_v30 = vld [vmem:[#allocation5 + $0x90] sm:$0xff] }
 0x26f   :  { %1326 = vmatpush.msra.mxu1 %v6948_v52  ;;  %1365 = vmatpush.msra.mxu3 %v4612_v39  ;;  %v4923_v39 = vld [vmem:[#allocation8 + $0x50] sm:$0xff]  ;;  %v6989_v25 = vld [vmem:[#allocation88_spill] sm:$0xff] }
 0x270   :  { %1308 = vmatpush.msra.mxu0 %v6950_v38  ;;  %1346 = vmatpush.msra.mxu2 %v6952_v51  ;;  %v5012_v52 = vld [vmem:[#allocation7 + $0xa0] sm:$0xff]  ;;  %v5020_v51 = vld [vmem:[#allocation7 + $0x88] sm:$0xff] }
 0x271   :  { %1327 = vmatpush.msra.mxu1 %v6951_v57  ;;  %1366 = vmatpush.msra.mxu3 %v4622_v44  ;;  %v6957_v44 = vld [vmem:[#allocation39_spill] sm:$0xff] }
 0x272   :  { %1309 = vmatpush.msra.mxu0 %v6953_v53  ;;  %1347 = vmatpush.msra.mxu2 %v4917_v20  ;;  %v6990_v38 = vld [vmem:[#allocation91_spill] sm:$0xff] }
 0x273   :  { %1328 = vmatpush.msra.mxu1 %v6954_v27  ;;  %1367 = vmatpush.msra.mxu3 %v4636_v35  ;;  %v6959_v35 = vld [vmem:[#allocation56_spill] sm:$0xff]  ;;  %v6991_v57 = vld [vmem:[#allocation75_spill] sm:$0xff] }
 0x274   :  { %1310 = vmatpush.msra.mxu0 %v6955_v60  ;;  %1348 = vmatpush.msra.mxu2 %v4923_v39  ;;  %v6992_v53 = vld [vmem:[#allocation83_spill] sm:$0xff]  ;;  %v6994_v60 = vld [vmem:[#allocation89_spill] sm:$0xff] }
 0x275   :  { %1329 = vmatpush.msra.mxu1 %v6956_v36  ;;  %1368 = vmatpush.msra.mxu3 %v4646_v11  ;;  %v6962_v11 = vld [vmem:[#allocation47_spill] sm:$0xff]  ;;  %v5026_v36 = vld [vmem:[#allocation7 + $0x70] sm:$0xff] }
 0x276   :  { %1311 = vmatpush.msra.mxu0 %v4625_v54  ;;  %1349 = vmatpush.msra.mxu2 %v4931_v13  ;;  %v4938_v54 = vld [vmem:[#allocation8 + $0x20] sm:$0xff] }
 0x277   :  { %1312 = vmatmul.f32.vlgmr.msra.gmra.mxu0 %v4860_v4  ;;  %1330 = vmatpush.msra.mxu1 %v6957_v44  ;;  %v6980_v4 = vld [vmem:[#allocation73_spill] sm:$0xff]  ;;  %v6993_v27 = vld [vmem:[#allocation79_spill] sm:$0xff] }
 0x278   :  { %1441 = vmatpush.msrb.mxu0 %v6958_v10  ;;  %1369 = vmatpush.msra.mxu3 %v4656_v16  ;;  %v6964_v16 = vld [vmem:[#allocation61_spill] sm:$0xff]  ;;  %v6996_v10 = vld [vmem:[#allocation100_spill] sm:$0xff] }
 0x279   :  { %1331 = vmatpush.msra.mxu1 %v6959_v35  ;;  %1350 = vmatpush.msra.mxu2 %v4938_v54  ;;  %v6995_v44 = vld [vmem:[#allocation101_spill] sm:$0xff]  ;;  %v6997_v35 = vld [vmem:[#allocation92_spill] sm:$0xff] }
 0x27a   :  { %1442 = vmatpush.msrb.mxu0 %v6960_v7  ;;  %1370 = vmatpush.msra.mxu3 %v4666_v31  ;;  %v6966_v31 = vld [vmem:[#allocation16_spill] sm:$0xff]  ;;  %v5032_v7 = vld [vmem:[#allocation5 + $0x170] sm:$0xff] }
 0x27b   :  { %1461 = vmatpush.msrb.mxu1 %v6961_v19  ;;  %1351 = vmatpush.msra.mxu2 %v4944_v5  ;;  %v5035_v19 = vld [vmem:[#allocation7 + $0x58] sm:$0xff] }
 0x27c   :  { %1443 = vmatpush.msrb.mxu0 %v6962_v11  ;;  %1371 = vmatpush.msra.mxu3 %v4947_v0  ;;  %v6998_v11 = vld [vmem:[#allocation24_spill] sm:$0xff] }
 0x27d   :  { %1462 = vmatpush.msrb.mxu1 %v6963_v59  ;;  %1481 = vmatpush.msrb.mxu2 %v4952_v58  ;;  %v6999_v59 = vld [vmem:[#allocation97_spill] sm:$0xff] }
 0x27e   :  { %1444 = vmatpush.msrb.mxu0 %v6964_v16  ;;  %1548 = vmatpush.msrb.mxu3 %v6966_v31  ;;  %v5040_v16 = vld [vmem:[#allocation5 + $0x158] sm:$0xff] }
 0x27f   :  { %1463 = vmatpush.msrb.mxu1 %v6965_v29  ;;  %1482 = vmatpush.msrb.mxu2 %v4958_v47  ;;  %v5043_v29 = vld [vmem:[#allocation7 + $0x40] sm:$0xff] }
 0x280   :  { %1445 = vmatpush.msrb.mxu0 %v6967_v24  ;;  %1549 = vmatpush.msrb.mxu3 %v6969_v23  ;;  %v7000_v31 = vld [vmem:[#allocation35_spill] sm:$0xff]  ;;  %v7001_v23 = vld [vmem:[#allocation98_spill] sm:$0xff] }
 0x281   :  { %1464 = vmatpush.msrb.mxu1 %v6968_v21  ;;  %1483 = vmatpush.msrb.mxu2 %v4964_v2  ;;  %v5047_v24 = vld [vmem:[#allocation5 + $0x140] sm:$0xff]  ;;  %v5050_v21 = vld [vmem:[#allocation7 + $0x28] sm:$0xff] }
 0x282   :  { %1446 = vmatpush.msrb.mxu0 %v6970_v6  ;;  %1550 = vmatpush.msrb.mxu3 %v6972_v1  ;;  %v5054_v6 = vld [vmem:[#allocation5 + $0x128] sm:$0xff]  ;;  %v7002_v1 = vld [vmem:[#allocation26_spill] sm:$0xff] }
 0x283   :  { %1465 = vmatpush.msrb.mxu1 %v6971_v50  ;;  %1484 = vmatpush.msrb.mxu2 %v4970_v18  ;;  %v5057_v50 = vld [vmem:[#allocation7 + $0x10] sm:$0xff] }
 0x284   :  { %1447 = vmatpush.msrb.mxu0 %v6973_v33  ;;  %1551 = vmatpush.msrb.mxu3 %v6975_v26  ;;  %v5061_v33 = vld [vmem:[#allocation5 + $0x110] sm:$0xff]  ;;  %v5067_v26 = vld [vmem:[#allocation5 + $0xe0] sm:$0xff] }
 0x285   :  { %1466 = vmatpush.msrb.mxu1 %v6974_v8  ;;  %1485 = vmatpush.msrb.mxu2 %v4976_v45  ;;  %v5064_v8 = vld [vmem:[#allocation5 + $0xf8] sm:$0xff] }
 0x286   :  { %1448 = vmatpush.msrb.mxu0 %v6976_v63  ;;  %1552 = vmatpush.msrb.mxu3 %v6978_v3  ;;  %v5070_v63 = vld [vmem:[#allocation5 + $0xc8] sm:$0xff]  ;;  %v7004_v3 = vld [vmem:[#allocation42_spill] sm:$0xff] }
 0x287   :  { %1467 = vmatpush.msrb.mxu1 %v6977_v40  ;;  %1486 = vmatpush.msrb.mxu2 %v4982_v48  ;;  %v7003_v40 = vld [vmem:[#allocation38_spill] sm:$0xff] }
 0x288   :  { %1449 = vmatpush.msrb.mxu0 %v6979_v14  ;;  %1553 = vmatpush.msrb.mxu3 %v6981_v41  ;;  %v7005_v14 = vld [vmem:[#allocation46_spill] sm:$0xff] }
 0x289   :  { %1468 = vmatpush.msrb.mxu1 %v6980_v4  ;;  %1487 = vmatpush.msrb.mxu2 %v4988_v9  ;;  %v7006_v4 = vld [vmem:[#allocation22_spill] sm:$0xff] }
 0x28a   :  { %1450 = vmatpush.msrb.mxu0 %v6982_v43  ;;  %1554 = vmatpush.msrb.mxu3 %v4991_v37  ;;  %v7007_v41 = vld [vmem:[#allocation50_spill] sm:$0xff] }
 0x28b   :  { %1469 = vmatpush.msrb.mxu1 %v6983_v22  ;;  %1488 = vmatpush.msrb.mxu2 %v4996_v56  ;;  %v7008_v43 = vld [vmem:[#allocation102_spill] sm:$0xff]  ;;  %v7009_v22 = vld [vmem:[#allocation103_spill] sm:$0xff] }
 0x28c   :  { %1451 = vmatpush.msrb.mxu0 %v6984_v32  ;;  %1555 = vmatpush.msrb.mxu3 %v4999_v15  ;;  %v7010_v32 = vld [vmem:[#allocation104_spill] sm:$0xff] }
 0x28d   :  { %1470 = vmatpush.msrb.mxu1 %v6985_v49  ;;  %1489 = vmatpush.msrb.mxu2 %v5004_v55 }
 0x28e   :  { %1452 = vmatpush.msrb.mxu0 %v6986_v12  ;;  %1556 = vmatpush.msrb.mxu3 %v5007_v46 }
 0x28f   :  { %1471 = vmatpush.msrb.mxu1 %v6987_v42  ;;  %1490 = vmatpush.msrb.mxu2 %v5012_v52 }
 0x290   :  { %1453 = vmatpush.msrb.mxu0 %v6988_v28  ;;  %1557 = vmatpush.msrb.mxu3 %v5015_v30  ;;  %v7011_v28 = vld [vmem:[#allocation25_spill] sm:$0xff] }
 0x291   :  { %1472 = vmatpush.msrb.mxu1 %v6989_v25  ;;  %1491 = vmatpush.msrb.mxu2 %v5020_v51 }
 0x292   :  { %1454 = vmatpush.msrb.mxu0 %v6990_v38  ;;  %1558 = vmatpush.msrb.mxu3 %v6992_v53  ;;  %v7012_v53 = vld [vmem:[#allocation54_spill] sm:$0xff] }
 0x293   :  { %1473 = vmatpush.msrb.mxu1 %v6991_v57  ;;  %1492 = vmatpush.msrb.mxu2 %v5026_v36 }
 0x294   :  { %1455 = vmatpush.msrb.mxu0 %v6993_v27  ;;  %1559 = vmatpush.msrb.mxu3 %v6995_v44 }
 0x295   :  { %1474 = vmatpush.msrb.mxu1 %v6994_v60  ;;  %1493 = vmatpush.msrb.mxu2 %v5035_v19 }
 0x296   :  { %1456 = vmatpush.msrb.mxu0 %v6996_v10  ;;  %1560 = vmatpush.msrb.mxu3 %v6999_v59 }
 0x297   :  { %1475 = vmatpush.msrb.mxu1 %v6997_v35  ;;  %1494 = vmatpush.msrb.mxu2 %v5043_v29 }
 0x298   :  { %1568 = vmatpush.msra.mxu0 %v5032_v7  ;;  %1561 = vmatpush.msrb.mxu3 %v7000_v31 }
 0x299   :  { %1476 = vmatpush.msrb.mxu1 %v6998_v11  ;;  %1495 = vmatpush.msrb.mxu2 %v5050_v21 }
 0x29a   :  { %1569 = vmatpush.msra.mxu0 %v5040_v16  ;;  %1562 = vmatpush.msrb.mxu3 %v7001_v23  ;;  %v7013_v23 = vld [vmem:[#allocation96_spill] sm:$0xff] }
 0x29b   :  { %1496 = vmatpush.msrb.mxu2 %v5057_v50 }
 0x29c   :  { %1570 = vmatpush.msra.mxu0 %v5047_v24  ;;  %1563 = vmatpush.msrb.mxu3 %v7002_v1 }
 0x29e   :  { %1571 = vmatpush.msra.mxu0 %v5054_v6 }
 0x2a0   :  { %1572 = vmatpush.msra.mxu0 %v5061_v33 }
 0x2a2   :  { %1573 = vmatpush.msra.mxu0 %v5064_v8 }
 0x2a4   :  { %1574 = vmatpush.msra.mxu0 %v5067_v26 }
 0x2a6   :  { %1575 = vmatpush.msra.mxu0 %v5070_v63 }
 0x2a8   :  { %1576 = vmatpush.msra.mxu0 %v7003_v40 }
 0x2aa   :  { %1577 = vmatpush.msra.mxu0 %v7004_v3 }
 0x2ac   :  { %1578 = vmatpush.msra.mxu0 %v7005_v14  ;;  %v7014_v14 = vld [vmem:[#allocation95_spill] sm:$0xff] }
 0x2ae   :  { %1579 = vmatpush.msra.mxu0 %v7006_v4 }
 0x2b0   :  { %1580 = vmatpush.msra.mxu0 %v7007_v41 }
 0x2b2   :  { %1581 = vmatpush.msra.mxu0 %v7008_v43 }
 0x2b4   :  { %1582 = vmatpush.msra.mxu0 %v7009_v22 }
 0x2b6   :  { %1583 = vmatpush.msra.mxu0 %v7010_v32 }
 0x2d3   :  { %v1041_v49 = vpop.f32.mrf.mxu0  ;;  %v1061_v57 = vpop.f32.mrf.mxu1 }
 0x2da   :  { %v1081_v12 = vpop.f32.mrf.mxu2 }
 0x2db   :  { %v1186_v42 = vpop.f32.mrf.mxu0 }
 0x2dc   :  { %v1187_v25 = vadd.f32 %v1186_v42, %v7011_v28 }
 0x2dd   :  { %v1166_v38 = vpop.f32.mrf.mxu3 }
 0x2de   :  { %v1167_v27 = vadd.f32 %v1166_v38, %v7012_v53  ;;  %v1210_v60 = vadd.f32 %v1187_v25, %v1061_v57 }
 0x2e0   :  { %v1209_v44 = vadd.f32 %v1167_v27, %v1041_v49  ;;  %v2794_v10 = vmul.f32 -1.442695, %v1210_v60 }
 0x2e2   :  { %v2793_v35 = vmul.f32 -1.442695, %v1209_v44  ;;  %2879 = vpow2.f32 %v2794_v10  ;;  %v1273_v11 = vpop.f32.mrf.mxu2 }
 0x2e3   :  { %v1378_v59 = vrot.slane %v1273_v11, 2 }
 0x2e4   :  { %2881 = vpow2.f32 %v2793_v35 }
 0x2e5   :  { %v1293_v31 = vpop.f32.mrf.mxu3  ;;  %v1382_v1 = vadd.f32 %v1378_v59, %v7013_v23 }
 0x2e6   :  { %v1379_v40 = vrot.slane %v1293_v31, 2 }
 0x2e7   :  { %v2795_v3 = vmul.f32 -1.442695, %v1382_v1  ;;  %v1206_v1 = vpop.f32.mrf.mxu1 }
 0x2e8   :  { %v1383_v4 = vadd.f32 %v1379_v40, %v7014_v14  ;;  %v2880_v41 = vpop.eup %2879 }
 0x2e9   :  { %v5085_v22 = vadd.f32 1.0, %v2880_v41  ;;  %2883 = vpow2.f32 %v2795_v3 }
 0x2ea   :  { %v2882_v43 = vpop.eup %2881  ;;  %v2796_v32 = vmul.f32 -1.442695, %v1383_v4 }
 0x2eb   :  { %v1217_v49 = vadd.f32 1.0, %v2882_v43  ;;  %2885 = vrcp.f32 %v5085_v22  ;;  %v5098_v43 = vld [vmem:[%s6328_s8] ss:$0 sm:$0xff]  ;;  %vm1239_vm2 = vweird.f32 %v5085_v22 }
 0x2ed   :  { %2887 = vrcp.f32 %v1217_v49  ;;  %v1230_v11 = vand.u32 2147483648, %v1217_v49  ;;  %v1228_v31 = vand.u32 2147483647, %v1217_v49  ;;  %vm1224_vm10 = vweird.f32 %v1217_v49 }
 0x2ee   :  { %2889 = vpow2.f32 %v2796_v32  ;;  %v1249_v32 = vadd.f32 %v5098_v43, %v1081_v12 }
 0x2ef   :  { %v2884_v42 = vpop.eup %2883  ;;  %v1231_v4 = vor.u32 1.1754944e-38, %v1230_v11  ;;  %vm1229_vm12 = vcmp.eq.f32.partialorder %v1228_v31, 8.507059e+37  ;;  %v5107_v11 = vld [vmem:[%s6324_s4] ss:$0 sm:$0xff] }
 0x2f0   :  { %v1390_v25 = vadd.f32 1.0, %v2884_v42 }
 0x2f1   :  { %v5088_v38 = vpop.eup %2885 }
 0x2f2   :  { %2891 = vrcp.f32 %v1390_v25  ;;  %v1235_v35 = vmul.f32 %v5088_v38, %v5085_v22  ;;  %vm1397_vm14 = vweird.f32 %v1390_v25  ;;  %vm1240_vm1 = vweird.f32 %v5088_v38 }
 0x2f3   :  { %v2888_v57 = vpop.eup %2887  ;;  %vm1241_vm3 = vmor %vm1239_vm2, %vm1240_vm1 }
 0x2f4   :  { %v2890_v27 = vpop.eup %2889  ;;  %v1220_v60 = vmul.f32 %v2888_v57, %v1217_v49  ;;  %vm1225_vm9 = vweird.f32 %v2888_v57  ;;  %v1236_v14 = vsub.f32 1.0, %v1235_v35  ;;  %v1313_v41 = vpop.f32.mrf.mxu0 }
 0x2f5   :  { %v5090_v44 = vadd.f32 1.0, %v2890_v27  ;;  %vm1226_vm11 = vmor %vm1224_vm10, %vm1225_vm9  ;;  %v1422_v53 = vadd.f32 %v5107_v11, %v1313_v41 }
 0x2f6   :  { %v1221_v10 = vsub.f32 1.0, %v1220_v60  ;;  %v1207_v60 = vadd.f32 %v1206_v1, %v4428_v62  ;;  %v1237_v31 = vmul.f32 %v5088_v38, %v1236_v14  ;;  %v1245_v14 = vand.u32 2147483648, %v5085_v22 }
 0x2f7   :  { %2893 = vrcp.f32 %v5090_v44  ;;  %vm1412_vm6 = vweird.f32 %v5090_v44 }
 0x2f8   :  { %v1222_v59 = vmul.f32 %v2888_v57, %v1221_v10  ;;  %v2892_v23 = vpop.eup %2891  ;;  %v1401_v10 = vand.u32 2147483647, %v1390_v25  ;;  %v1238_v62 = vadd.f32 %v5088_v38, %v1237_v31 }
 0x2f9   :  { %v1393_v3 = vmul.f32 %v2892_v23, %v1390_v25  ;;  %vm1398_vm13 = vweird.f32 %v2892_v23 }
 0x2fa   :  { %v1223_v40 = vadd.f32 %v2888_v57, %v1222_v59  ;;  %v1403_v59 = vand.u32 2147483648, %v1390_v25  ;;  %vm1399_vm15 = vmor %vm1397_vm14, %vm1398_vm13  ;;  %vm1402_vm0 = vcmp.eq.f32.partialorder %v1401_v10, 8.507059e+37  ;;  %v1243_v25 = vand.u32 2147483647, %v5085_v22 }
 0x2fb   :  { %v1394_v42 = vsub.f32 1.0, %v1393_v3  ;;  %v1246_v10 = vor.u32 1.1754944e-38, %v1245_v14  ;;  %v5152_v14 = vld [vmem:[#allocation8 + $0x150] sm:$0xff] }
 0x2fc   :  { %v1227_v27 = vsel %vm1226_vm11, %v2888_v57, %v1223_v40  ;;  %v1404_v3 = vor.u32 1.1754944e-38, %v1403_v59  ;;  %vm1244_vm4 = vcmp.eq.f32.partialorder %v1243_v25, 8.507059e+37 }
 0x2fd   :  { %v1232_v49 = vsel %vm1229_vm12, %v1231_v4, %v1227_v27  ;;  %v5102_v28 = vpop.eup %2893  ;;  %v1395_v35 = vmul.f32 %v2892_v23, %v1394_v42  ;;  %v1424_v42 = vrot.slane %v1422_v53, 2 }
 0x2fe   :  { %v1250_v12 = vmul.f32 %v1249_v32, %v1232_v49  ;;  %v1408_v40 = vmul.f32 %v5102_v28, %v5090_v44  ;;  %vm1413_vm5 = vweird.f32 %v5102_v28 }
 0x2ff   :  { %v1396_v57 = vadd.f32 %v2892_v23, %v1395_v35  ;;  %vm5131_vm7 = vmor %vm1412_vm6, %vm1413_vm5 }
 0x300   :  { %v1251_v1 = vadd.f32 %v1250_v12, %v1207_v60  ;;  %v1409_v32 = vsub.f32 1.0, %v1408_v40 }
 0x301   :  { %v1400_v4 = vsel %vm1399_vm15, %v2892_v23, %v1396_v57  ;;  %v1242_v23 = vsel %vm1241_vm3, %v5088_v38, %v1238_v62  ;;  %v1418_v57 = vand.u32 2147483648, %v5090_v44  ;;  %v1416_v62 = vand.u32 2147483647, %v5090_v44 }
 0x302   :  { %2895 = vtanh.f32 %v1251_v1  ;;  %v1405_v27 = vsel %vm1402_vm0, %v1404_v3, %v1400_v4  ;;  %v1410_v59 = vmul.f32 %v5102_v28, %v1409_v32  ;;  %v1247_v35 = vsel %vm1244_vm4, %v1246_v10, %v1242_v23  ;;  %v5136_v1 = vld [vmem:[#allocation5 + $0x178] sm:$0xff]  ;;  %v5143_v3 = vld [vmem:[#allocation8 + $0x168] sm:$0xff]  ;;  %v5146_v4 = vld [vmem:[#allocation8 + $0x170] sm:$0xff] }
 0x303   :  { %v1426_v41 = vmul.f32 %v1424_v42, %v1405_v27  ;;  %v1419_v42 = vor.u32 1.1754944e-38, %v1418_v57  ;;  %v5149_v27 = vld [vmem:[#allocation5 + $0x160] sm:$0xff]  ;;  %vm1417_vm8 = vcmp.eq.f32.partialorder %v1416_v62, 8.507059e+37  ;;  %v5158_v32 = vld [vmem:[#allocation5 + $0x148] sm:$0xff] }
 0x304   :  { %v1411_v31 = vadd.f32 %v5102_v28, %v1410_v59  ;;  %v5164_v23 = vld [vmem:[#allocation8 + $0x140] sm:$0xff]  ;;  %v5197_v62 = vld [vmem:[#allocation5 + $0xe8] sm:$0xff] }
 0x305   :  { %v1427_v60 = vadd.f32 %v1426_v41, %v4230_v17  ;;  %v5172_v59 = vld [vmem:[#allocation8 + $0x120] sm:$0xff]  ;;  %7017 = vst [vmem:[#allocation99_spill] sm:$0xff] %v5197_v62 }
 0x306   :  { %v1415_v40 = vsel %vm5131_vm7, %v5102_v28, %v1411_v31  ;;  %v5184_v31 = vld [vmem:[#allocation8 + $0x108] sm:$0xff]  ;;  %v5190_v57 = vld [vmem:[#allocation5 + $0x100] sm:$0xff] }
 0x307   :  { %2897 = vtanh.f32 %v1427_v60  ;;  %v1420_v28 = vsel %vm1417_vm8, %v1419_v42, %v1415_v40  ;;  %v5161_v60 = vld [vmem:[#allocation8 + $0x138] sm:$0xff]  ;;  %v5212_v42 = vld [vmem:[#allocation8 + $0x160] sm:$0xff] }
 0x308   :  { %v2896_v53 = vpop.eup %2895  ;;  %v5206_v40 = vld [vmem:[#allocation8 + $0xf8] sm:$0xff] }
 0x309   :  { %v1253_v49 = vsub.f32 %v4853_v34, %v2896_v53  ;;  %v5203_v34 = vld [vmem:[#allocation8 + $0xf0] sm:$0xff]  ;;  %7018 = vst [vmem:[#allocation66_spill] sm:$0xff] %v5206_v40 }
 0x30b   :  { %v1254_v12 = vmul.f32 %v1253_v49, %v1247_v35  ;;  %v5175_v49 = vld [vmem:[#allocation8 + $0x128] sm:$0xff]  ;;  %v5178_v35 = vld [vmem:[#allocation5 + $0x118] sm:$0xff] }
 0x30d   :  { %v5124_v22 = vadd.f32 %v2896_v53, %v1254_v12  ;;  %v2898_v17 = vpop.eup %2897  ;;  %v5167_v53 = vld [vmem:[#allocation5 + $0x130] sm:$0xff] }
 0x30e   :  { %v1430_v38 = vrot.slane %v2898_v17, 2 }
 0x30f   :  { %1332 = vmatmul.f32.vlgmr.msra.gmra.mxu1 %v5124_v22  ;;  %1352 = vmatmul.f32.vlgmr.msra.gmra.mxu2 %v5124_v22 }
 0x310   :  { %1372 = vmatmul.f32.vlgmr.msra.gmra.mxu3 %v5124_v22  ;;  %1588 = vmatpush.msra.mxu1 %v5136_v1  ;;  %v1432_v44 = vsub.f32 %v4855_v61, %v1430_v38  ;;  %v5155_v61 = vld [vmem:[#allocation8 + $0x158] sm:$0xff] }
 0x311   :  { %1608 = vmatpush.msra.mxu2 %v5143_v3  ;;  %1628 = vmatpush.msra.mxu3 %v5146_v4  ;;  %v5200_v38 = vld [vmem:[#allocation8 + $0x178] sm:$0xff] }
 0x312   :  { %1589 = vmatpush.msra.mxu1 %v5149_v27  ;;  %v1434_v41 = vrot.slane %v1432_v44, 6  ;;  %v5209_v44 = vld [vmem:[#allocation5 + $0xd0] sm:$0xff] }
 0x313   :  { %1609 = vmatpush.msra.mxu2 %v5152_v14  ;;  %1629 = vmatpush.msra.mxu3 %v5155_v61  ;;  %7019 = vst [vmem:[#allocation34_spill] sm:$0xff] %v5209_v44 }
 0x314   :  { %1590 = vmatpush.msra.mxu1 %v5158_v32  ;;  %v1436_v25 = vmul.f32 %v1434_v41, %v1420_v28  ;;  %v5215_v41 = vld [vmem:[#allocation8 + $0xd8] sm:$0xff]  ;;  %v5218_v28 = vld [vmem:[#allocation8 + $0xe0] sm:$0xff] }
 0x315   :  { %1610 = vmatpush.msra.mxu2 %v5161_v60  ;;  %1630 = vmatpush.msra.mxu3 %v5164_v23  ;;  %7020 = vst [vmem:[#allocation62_spill] sm:$0xff] %v5215_v41 }
 0x316   :  { %1591 = vmatpush.msra.mxu1 %v5167_v53  ;;  %v5170_v10 = vadd.f32 %v2898_v17, %v1436_v25  ;;  %v5187_v17 = vld [vmem:[#allocation8 + $0x110] sm:$0xff]  ;;  %7021 = vst [vmem:[#allocation27_spill] sm:$0xff] %v5218_v28  ;;  %v5221_v25 = vld [vmem:[#allocation5 + $0xb8] sm:$0xff] }
 0x317   :  { %1611 = vmatpush.msra.mxu2 %v5172_v59  ;;  %1631 = vmatpush.msra.mxu3 %v5175_v49  ;;  %7022 = vst [vmem:[#allocation70_spill] sm:$0xff] %v5221_v25 }
 0x318   :  { %1592 = vmatpush.msra.mxu1 %v5178_v35  ;;  %v5182_v12 = vrot.slane %v5170_v10, 6 }
 0x319   :  { %1612 = vmatpush.msra.mxu2 %v5184_v31  ;;  %1632 = vmatpush.msra.mxu3 %v5187_v17 }
 0x31a   :  { %1593 = vmatpush.msra.mxu1 %v5190_v57  ;;  %1457 = vmatmul.f32.vlgmr.msrb.gmra.mxu0 %v5182_v12 }
 0x31b   :  { %1477 = vmatmul.f32.vlgmr.msrb.gmra.mxu1 %v5182_v12  ;;  %1497 = vmatmul.f32.vlgmr.msrb.gmra.mxu2 %v5182_v12 }
 0x31c   :  { %1564 = vmatmul.f32.vlgmr.msrb.gmra.mxu3 %v5182_v12  ;;  %1594 = vmatpush.msra.mxu1 %v5197_v62  ;;  %v5224_v62 = vld [vmem:[#allocation8 + $0x148] sm:$0xff] }
 0x31d   :  { %1648 = vmatpush.msrb.mxu0 %v5200_v38  ;;  %1613 = vmatpush.msra.mxu2 %v5203_v34  ;;  %7023 = vst [vmem:[#allocation37_spill] sm:$0xff] %v5224_v62 }
 0x31e   :  { %1633 = vmatpush.msra.mxu3 %v5206_v40  ;;  %1595 = vmatpush.msra.mxu1 %v5209_v44  ;;  %v5227_v44 = vld [vmem:[#allocation8 + $0xc0] sm:$0xff]  ;;  %v5230_v40 = vld [vmem:[#allocation8 + $0xc8] sm:$0xff] }
 0x31f   :  { %1649 = vmatpush.msrb.mxu0 %v5212_v42  ;;  %1614 = vmatpush.msra.mxu2 %v5215_v41  ;;  %7024 = vst [vmem:[#allocation30_spill] sm:$0xff] %v5227_v44  ;;  %v5233_v41 = vld [vmem:[#allocation5 + $0xa0] sm:$0xff] }
 0x320   :  { %1634 = vmatpush.msra.mxu3 %v5218_v28  ;;  %1596 = vmatpush.msra.mxu1 %v5221_v25  ;;  %7025 = vst [vmem:[#allocation28_spill] sm:$0xff] %v5230_v40  ;;  %v5237_v28 = vld [vmem:[#allocation8 + $0x130] sm:$0xff]  ;;  %v5240_v25 = vld [vmem:[#allocation8 + $0xa8] sm:$0xff] }
 0x321   :  { %1650 = vmatpush.msrb.mxu0 %v5224_v62  ;;  %1615 = vmatpush.msra.mxu2 %v5227_v44  ;;  %7026 = vst [vmem:[#allocation78_spill] sm:$0xff] %v5233_v41  ;;  %v5243_v62 = vld [vmem:[#allocation5 + $0x88] sm:$0xff]  ;;  %v5246_v44 = vld [vmem:[#allocation8 + $0xb0] sm:$0xff] }
 0x322   :  { %1635 = vmatpush.msra.mxu3 %v5230_v40  ;;  %1597 = vmatpush.msra.mxu1 %v5233_v41  ;;  %7027 = vst [vmem:[#allocation41_spill] sm:$0xff] %v5237_v28  ;;  %v5249_v40 = vld [vmem:[#allocation8 + $0x118] sm:$0xff]  ;;  %v5252_v41 = vld [vmem:[#allocation8 + $0x90] sm:$0xff] }
 0x323   :  { %1584 = vmatmul.f32.vlgmr.msra.gmra.mxu0 %v5182_v12  ;;  %7028 = vst [vmem:[#allocation74_spill] sm:$0xff] %v5240_v25  ;;  %1616 = vmatpush.msra.mxu2 %v5240_v25  ;;  %v5258_v25 = vld [vmem:[#allocation8 + $0x98] sm:$0xff] }
 0x324   :  { %1651 = vmatpush.msrb.mxu0 %v5237_v28  ;;  %7029 = vst [vmem:[#allocation32_spill] sm:$0xff] %v5243_v62  ;;  %1598 = vmatpush.msra.mxu1 %v5243_v62  ;;  %v5255_v28 = vld [vmem:[#allocation5 + $0x70] sm:$0xff]  ;;  %v5261_v62 = vld [vmem:[#allocation8 + $0x100] sm:$0xff] }
 0x325   :  { %7030 = vst [vmem:[#allocation82_spill] sm:$0xff] %v5246_v44  ;;  %1636 = vmatpush.msra.mxu3 %v5246_v44  ;;  %1617 = vmatpush.msra.mxu2 %v5252_v41  ;;  %v5264_v44 = vld [vmem:[#allocation8 + $0x78] sm:$0xff] }
 0x326   :  { %7031 = vst [vmem:[#allocation40_spill] sm:$0xff] %v5249_v40  ;;  %1652 = vmatpush.msrb.mxu0 %v5249_v40  ;;  %1599 = vmatpush.msra.mxu1 %v5255_v28  ;;  %v5267_v40 = vld [vmem:[#allocation5 + $0x58] sm:$0xff] }
 0x327   :  { %7032 = vst [vmem:[#allocation29_spill] sm:$0xff] %v5252_v41  ;;  %1637 = vmatpush.msra.mxu3 %v5258_v25  ;;  %1618 = vmatpush.msra.mxu2 %v5264_v44  ;;  %v5270_v41 = vld [vmem:[#allocation8 + $0x80] sm:$0xff] }
 0x328   :  { %7033 = vst [vmem:[#allocation86_spill] sm:$0xff] %v5255_v28  ;;  %1653 = vmatpush.msrb.mxu0 %v5261_v62  ;;  %1600 = vmatpush.msra.mxu1 %v5267_v40  ;;  %v5273_v28 = vld [vmem:[#allocation8 + $0xe8] sm:$0xff] }
 0x329   :  { %7034 = vst [vmem:[#allocation44_spill] sm:$0xff] %v5258_v25  ;;  %1638 = vmatpush.msra.mxu3 %v5270_v41  ;;  %v5276_v25 = vld [vmem:[#allocation8 + $0x60] sm:$0xff] }
 0x32a   :  { %7035 = vst [vmem:[#allocation31_spill] sm:$0xff] %v5261_v62  ;;  %1654 = vmatpush.msrb.mxu0 %v5273_v28  ;;  %1619 = vmatpush.msra.mxu2 %v5276_v25  ;;  %v5279_v62 = vld [vmem:[#allocation5 + $0x40] sm:$0xff] }
 0x32b   :  { %7036 = vst [vmem:[#allocation45_spill] sm:$0xff] %v5264_v44  ;;  %1601 = vmatpush.msra.mxu1 %v5279_v62  ;;  %1639 = vmatpush.msra.mxu3 %v4917_v20  ;;  %v5283_v44 = vld [vmem:[#allocation8 + $0xd0] sm:$0xff] }
 0x32c   :  { %7037 = vst [vmem:[#allocation48_spill] sm:$0xff] %v5267_v40  ;;  %1655 = vmatpush.msrb.mxu0 %v5283_v44  ;;  %v5286_v40 = vld [vmem:[#allocation8 + $0x48] sm:$0xff]  ;;  %v5299_v20 = vld [vmem:[#allocation5 + $0x10] sm:$0xff] }
 0x32d   :  { %7038 = vst [vmem:[#allocation33_spill] sm:$0xff] %v5270_v41  ;;  %1620 = vmatpush.msra.mxu2 %v5286_v40  ;;  %v5289_v41 = vld [vmem:[#allocation5 + $0x28] sm:$0xff]  ;;  %1640 = vmatpush.msra.mxu3 %v4923_v39 }
 0x32e   :  { %7039 = vst [vmem:[#allocation36_spill] sm:$0xff] %v5276_v25  ;;  %1602 = vmatpush.msra.mxu1 %v5289_v41  ;;  %v5293_v25 = vld [vmem:[#allocation8 + $0xb8] sm:$0xff]  ;;  %v5307_v39 = vld [vmem:[#allocation7 + $0x168] sm:$0xff] }
 0x32f   :  { %7040 = vst [vmem:[#allocation90_spill] sm:$0xff] %v5279_v62  ;;  %1656 = vmatpush.msrb.mxu0 %v5293_v25  ;;  %v5296_v62 = vld [vmem:[#allocation8 + $0x30] sm:$0xff]  ;;  %1641 = vmatpush.msra.mxu3 %v4931_v13 }
 0x330   :  { %7041 = vst [vmem:[#allocation49_spill] sm:$0xff] %v5286_v40  ;;  %1621 = vmatpush.msra.mxu2 %v5296_v62  ;;  %1603 = vmatpush.msra.mxu1 %v5299_v20  ;;  %v5304_v40 = vld [vmem:[#allocation8 + $0xa0] sm:$0xff]  ;;  %v5317_v13 = vld [vmem:[#allocation7 + $0x150] sm:$0xff] }
 0x331   :  { %7042 = vst [vmem:[#allocation52_spill] sm:$0xff] %v5289_v41  ;;  %1604 = vmatmul.f32.vlgmr.msra.gmra.mxu1 %v5182_v12  ;;  %1657 = vmatpush.msrb.mxu0 %v5304_v40  ;;  %v5310_v41 = vld [vmem:[#allocation8 + $0x18] sm:$0xff]  ;;  %v5320_v12 = vld [vmem:[#allocation8] sm:$0xff] }
 0x332   :  { %7043 = vst [vmem:[#allocation39_spill] sm:$0xff] %v5296_v62  ;;  %1721 = vmatpush.msrb.mxu1 %v5307_v39  ;;  %1622 = vmatpush.msra.mxu2 %v5310_v41  ;;  %v5313_v62 = vld [vmem:[#allocation8 + $0x88] sm:$0xff] }
 0x333   :  { %7044 = vst [vmem:[#allocation53_spill] sm:$0xff] %v5299_v20  ;;  %1658 = vmatpush.msrb.mxu0 %v5313_v62  ;;  %1642 = vmatpush.msra.mxu3 %v4938_v54  ;;  %v5323_v20 = vld [vmem:[#allocation8 + $0x70] sm:$0xff]  ;;  %v5333_v54 = vld [vmem:[#allocation8 + $0x58] sm:$0xff] }
 0x334   :  { %7045 = vst [vmem:[#allocation56_spill] sm:$0xff] %v5307_v39  ;;  %1722 = vmatpush.msrb.mxu1 %v5317_v13  ;;  %1623 = vmatpush.msra.mxu2 %v5320_v12  ;;  %v5326_v39 = vld [vmem:[#allocation7 + $0x170] sm:$0xff] }
 0x335   :  { %7046 = vst [vmem:[#allocation60_spill] sm:$0xff] %v5310_v41  ;;  %1659 = vmatpush.msrb.mxu0 %v5323_v20  ;;  %v5329_v41 = vld [vmem:[#allocation7 + $0x138] sm:$0xff]  ;;  %1643 = vmatpush.msra.mxu3 %v4944_v5  ;;  %v5349_v5 = vld [vmem:[#allocation7 + $0x108] sm:$0xff] }
 0x336   :  { %7047 = vst [vmem:[#allocation43_spill] sm:$0xff] %v5317_v13  ;;  %1741 = vmatpush.msrb.mxu2 %v5326_v39  ;;  %1723 = vmatpush.msrb.mxu1 %v5329_v41  ;;  %v5336_v13 = vld [vmem:[#allocation7 + $0x158] sm:$0xff] }
 0x337   :  { %7048 = vst [vmem:[#allocation47_spill] sm:$0xff] %v5320_v12  ;;  %1660 = vmatpush.msrb.mxu0 %v5333_v54  ;;  %v5339_v12 = vld [vmem:[#allocation7 + $0x120] sm:$0xff]  ;;  %1761 = vmatpush.msrb.mxu3 %v4952_v58  ;;  %v5359_v58 = vld [vmem:[#allocation7 + $0xf0] sm:$0xff] }
 0x338   :  { %7049 = vst [vmem:[#allocation57_spill] sm:$0xff] %v5326_v39  ;;  %1742 = vmatpush.msrb.mxu2 %v5336_v13  ;;  %1724 = vmatpush.msrb.mxu1 %v5339_v12  ;;  %v5343_v39 = vld [vmem:[#allocation8 + $0x40] sm:$0xff] }
 0x339   :  { %7050 = vst [vmem:[#allocation61_spill] sm:$0xff] %v5329_v41  ;;  %1661 = vmatpush.msrb.mxu0 %v5343_v39  ;;  %v5346_v41 = vld [vmem:[#allocation7 + $0x140] sm:$0xff]  ;;  %1762 = vmatpush.msrb.mxu3 %v4958_v47  ;;  %v5367_v47 = vld [vmem:[#allocation7 + $0xd8] sm:$0xff] }
 0x33a   :  { %7051 = vst [vmem:[#allocation64_spill] sm:$0xff] %v5336_v13  ;;  %1743 = vmatpush.msrb.mxu2 %v5346_v41  ;;  %1725 = vmatpush.msrb.mxu1 %v5349_v5  ;;  %v5353_v13 = vld [vmem:[#allocation8 + $0x28] sm:$0xff] }
 0x33b   :  { %7052 = vst [vmem:[#allocation16_spill] sm:$0xff] %v5339_v12  ;;  %1662 = vmatpush.msrb.mxu0 %v5353_v13  ;;  %v5356_v12 = vld [vmem:[#allocation7 + $0x128] sm:$0xff]  ;;  %1763 = vmatpush.msrb.mxu3 %v4964_v2  ;;  %v5377_v2 = vld [vmem:[#allocation7 + $0xc0] sm:$0xff] }
 0x33c   :  { %7053 = vst [vmem:[#allocation68_spill] sm:$0xff] %v5346_v41  ;;  %1744 = vmatpush.msrb.mxu2 %v5356_v12  ;;  %1726 = vmatpush.msrb.mxu1 %v5359_v58  ;;  %v5364_v41 = vld [vmem:[#allocation7 + $0x110] sm:$0xff] }
 0x33d   :  { %7054 = vst [vmem:[#allocation51_spill] sm:$0xff] %v5349_v5  ;;  %1663 = vmatpush.msrb.mxu0 %v4947_v0  ;;  %v5370_v5 = vld [vmem:[#allocation5 + $0x168] sm:$0xff]  ;;  %1764 = vmatpush.msrb.mxu3 %v4970_v18  ;;  %v5380_v0 = vld [vmem:[#allocation5 + $0x150] sm:$0xff] }
 0x33e   :  { %7055 = vst [vmem:[#allocation18_spill] sm:$0xff] %v5356_v12  ;;  %1745 = vmatpush.msrb.mxu2 %v5364_v41  ;;  %1727 = vmatpush.msrb.mxu1 %v5367_v47  ;;  %v5373_v12 = vld [vmem:[#allocation7 + $0xf8] sm:$0xff]  ;;  %v5393_v18 = vld [vmem:[#allocation7 + $0xc8] sm:$0xff] }
 0x33f   :  { %7056 = vst [vmem:[#allocation55_spill] sm:$0xff] %v5359_v58  ;;  %1828 = vmatpush.msra.mxu0 %v5370_v5  ;;  %v5383_v58 = vld [vmem:[#allocation7 + $0xe0] sm:$0xff]  ;;  %1765 = vmatpush.msrb.mxu3 %v4976_v45  ;;  %v5403_v45 = vld [vmem:[#allocation7 + $0xb0] sm:$0xff] }
 0x340   :  { %7057 = vst [vmem:[#allocation65_spill] sm:$0xff] %v5367_v47  ;;  %1746 = vmatpush.msrb.mxu2 %v5373_v12  ;;  %1728 = vmatpush.msrb.mxu1 %v5377_v2  ;;  %v5387_v47 = vld [vmem:[#allocation7 + $0xa8] sm:$0xff] }
 0x341   :  { %7058 = vst [vmem:[#allocation17_spill] sm:$0xff] %v5373_v12  ;;  %1829 = vmatpush.msra.mxu0 %v5380_v0  ;;  %v5390_v12 = vld [vmem:[#allocation5 + $0x138] sm:$0xff]  ;;  %1766 = vmatpush.msrb.mxu3 %v4982_v48 }
 0x342   :  { %7059 = vst [vmem:[#allocation69_spill] sm:$0xff] %v5377_v2  ;;  %1747 = vmatpush.msrb.mxu2 %v5383_v58  ;;  %1729 = vmatpush.msrb.mxu1 %v5387_v47  ;;  %v5397_v2 = vld [vmem:[#allocation7 + $0x90] sm:$0xff]  ;;  %v5413_v48 = vld [vmem:[#allocation7 + $0x98] sm:$0xff] }
 0x343   :  { %7060 = vst [vmem:[#allocation72_spill] sm:$0xff] %v5383_v58  ;;  %1830 = vmatpush.msra.mxu0 %v5390_v12  ;;  %v5400_v58 = vld [vmem:[#allocation5 + $0x120] sm:$0xff]  ;;  %1767 = vmatpush.msrb.mxu3 %v4988_v9 }
 0x344   :  { %7061 = vst [vmem:[#allocation19_spill] sm:$0xff] %v5387_v47  ;;  %1748 = vmatpush.msrb.mxu2 %v5393_v18  ;;  %1730 = vmatpush.msrb.mxu1 %v5397_v2  ;;  %v5407_v47 = vld [vmem:[#allocation7 + $0x78] sm:$0xff]  ;;  %v5423_v9 = vld [vmem:[#allocation7 + $0x80] sm:$0xff] }
 0x345   :  { %7062 = vst [vmem:[#allocation76_spill] sm:$0xff] %v5390_v12  ;;  %1831 = vmatpush.msra.mxu0 %v5400_v58  ;;  %1768 = vmatpush.msrb.mxu3 %v4996_v56  ;;  %v5431_v56 = vld [vmem:[#allocation7 + $0x68] sm:$0xff] }
 0x346   :  { %7063 = vst [vmem:[#allocation59_spill] sm:$0xff] %v5393_v18  ;;  %1749 = vmatpush.msrb.mxu2 %v5403_v45  ;;  %1731 = vmatpush.msrb.mxu1 %v5407_v47  ;;  %v5410_v18 = vld [vmem:[#allocation5 + $0x108] sm:$0xff] }
 0x347   :  { %7064 = vst [vmem:[#allocation20_spill] sm:$0xff] %v5397_v2  ;;  %1832 = vmatpush.msra.mxu0 %v5410_v18  ;;  %v5417_v2 = vld [vmem:[#allocation7 + $0x60] sm:$0xff]  ;;  %1769 = vmatpush.msrb.mxu3 %v5004_v55  ;;  %v5443_v55 = vld [vmem:[#allocation7 + $0x18] sm:$0xff] }
 0x348   :  { %7065 = vst [vmem:[#allocation63_spill] sm:$0xff] %v5400_v58  ;;  %1750 = vmatpush.msrb.mxu2 %v5413_v48  ;;  %1732 = vmatpush.msrb.mxu1 %v5417_v2 }
 0x349   :  { %7066 = vst [vmem:[#allocation73_spill] sm:$0xff] %v5403_v45  ;;  %v5420_v45 = vld [vmem:[#allocation5 + $0xf0] sm:$0xff]  ;;  %1770 = vmatpush.msrb.mxu3 %v5012_v52  ;;  %v5451_v52 = vld [vmem:[#allocation7] sm:$0xff] }
 0x34a   :  { %7067 = vst [vmem:[#allocation21_spill] sm:$0xff] %v5407_v47  ;;  %1833 = vmatpush.msra.mxu0 %v5420_v45  ;;  %1751 = vmatpush.msrb.mxu2 %v5423_v9  ;;  %v5427_v47 = vld [vmem:[#allocation7 + $0x48] sm:$0xff] }
 0x34b   :  { %7068 = vst [vmem:[#allocation77_spill] sm:$0xff] %v5410_v18  ;;  %1733 = vmatpush.msrb.mxu1 %v5427_v47  ;;  %1771 = vmatpush.msrb.mxu3 %v5020_v51  ;;  %v5459_v51 = vld [vmem:[#allocation5 + $0x78] sm:$0xff] }
 0x34c   :  { %7069 = vst [vmem:[#allocation80_spill] sm:$0xff] %v5413_v48  ;;  %1834 = vmatpush.msra.mxu0 %v4991_v37  ;;  %1752 = vmatpush.msrb.mxu2 %v5431_v56  ;;  %v5447_v37 = vld [vmem:[#allocation7 + $0x38] sm:$0xff] }
 0x34d   :  { %7070 = vst [vmem:[#allocation84_spill] sm:$0xff] %v5417_v2  ;;  %v5435_v2 = vld [vmem:[#allocation7 + $0x30] sm:$0xff]  ;;  %1772 = vmatpush.msrb.mxu3 %v5026_v36  ;;  %v5467_v36 = vld [vmem:[#allocation5 + $0x60] sm:$0xff] }
 0x34e   :  { %7071 = vst [vmem:[#allocation67_spill] sm:$0xff] %v5420_v45  ;;  %1734 = vmatpush.msrb.mxu1 %v5435_v2  ;;  %1835 = vmatpush.msra.mxu0 %v4999_v15  ;;  %v5456_v15 = vld [vmem:[#allocation7 + $0x20] sm:$0xff]  ;;  %v7100_v48 = vld [vmem:[#allocation58_spill] sm:$0xff] }
 0x34f   :  { %7072 = vst [vmem:[#allocation71_spill] sm:$0xff] %v5423_v9  ;;  %v5439_v9 = vld [vmem:[#allocation7 + $0x50] sm:$0xff]  ;;  %1773 = vmatpush.msrb.mxu3 %v5035_v19  ;;  %v5482_v19 = vld [vmem:[#allocation5 + $0x18] sm:$0xff] }
 0x350   :  { %7073 = vst [vmem:[#allocation81_spill] sm:$0xff] %v5427_v47  ;;  %1753 = vmatpush.msrb.mxu2 %v5439_v9  ;;  %1735 = vmatpush.msrb.mxu1 %v5443_v55 }
 0x351   :  { %7074 = vst [vmem:[#allocation85_spill] sm:$0xff] %v5431_v56  ;;  %1836 = vmatpush.msra.mxu0 %v5007_v46  ;;  %v5464_v46 = vld [vmem:[#allocation7 + $0x8] sm:$0xff]  ;;  %1774 = vmatpush.msrb.mxu3 %v5043_v29  ;;  %v5491_v29 = vld [vmem:[#allocation5 + $0xb0] sm:$0xff] }
 0x352   :  { %7075 = vst [vmem:[#allocation88_spill] sm:$0xff] %v5435_v2  ;;  %1754 = vmatpush.msrb.mxu2 %v5447_v37  ;;  %1736 = vmatpush.msrb.mxu1 %v5451_v52 }
 0x353   :  { %7076 = vst [vmem:[#allocation91_spill] sm:$0xff] %v5439_v9  ;;  %1837 = vmatpush.msra.mxu0 %v5015_v30  ;;  %v5472_v30 = vld [vmem:[#allocation5 + $0x48] sm:$0xff]  ;;  %1775 = vmatpush.msrb.mxu3 %v5050_v21  ;;  %v5497_v21 = vld [vmem:[#allocation5 + $0x80] sm:$0xff] }
 0x354   :  { %7077 = vst [vmem:[#allocation75_spill] sm:$0xff] %v5443_v55  ;;  %1848 = vmatpush.msra.mxu1 %v5032_v7  ;;  %1755 = vmatpush.msrb.mxu2 %v5456_v15  ;;  %v5477_v7 = vld [vmem:[#allocation5 + $0x30] sm:$0xff] }
 0x355   :  { %7078 = vst [vmem:[#allocation83_spill] sm:$0xff] %v5447_v37  ;;  %1838 = vmatpush.msra.mxu0 %v5459_v51  ;;  %1776 = vmatpush.msrb.mxu3 %v5057_v50  ;;  %v5503_v50 = vld [vmem:[#allocation5 + $0x50] sm:$0xff] }
 0x356   :  { %7079 = vst [vmem:[#allocation79_spill] sm:$0xff] %v5451_v52  ;;  %1849 = vmatpush.msra.mxu1 %v5040_v16  ;;  %1756 = vmatpush.msrb.mxu2 %v5464_v46  ;;  %v5486_v16 = vld [vmem:[#allocation5] sm:$0xff] }
 0x357   :  { %7080 = vst [vmem:[#allocation89_spill] sm:$0xff] %v5456_v15  ;;  %1839 = vmatpush.msra.mxu0 %v5467_v36 }
 0x358   :  { %7081 = vst [vmem:[#allocation101_spill] sm:$0xff] %v5459_v51  ;;  %1850 = vmatpush.msra.mxu1 %v5047_v24  ;;  %v5494_v24 = vld [vmem:[#allocation5 + $0x98] sm:$0xff] }
 0x359   :  { %7082 = vst [vmem:[#allocation100_spill] sm:$0xff] %v5464_v46  ;;  %1840 = vmatpush.msra.mxu0 %v5472_v30 }
 0x35a   :  { %7083 = vst [vmem:[#allocation92_spill] sm:$0xff] %v5467_v36  ;;  %1851 = vmatpush.msra.mxu1 %v5054_v6  ;;  %v5500_v6 = vld [vmem:[#allocation5 + $0x68] sm:$0xff] }
 0x35b   :  { %7084 = vst [vmem:[#allocation24_spill] sm:$0xff] %v5472_v30  ;;  %1841 = vmatpush.msra.mxu0 %v5477_v7 }
 0x35c   :  { %7085 = vst [vmem:[#allocation97_spill] sm:$0xff] %v5477_v7  ;;  %1852 = vmatpush.msra.mxu1 %v5061_v33  ;;  %v5506_v33 = vld [vmem:[#allocation5 + $0x38] sm:$0xff] }
 0x35d   :  { %7086 = vst [vmem:[#allocation35_spill] sm:$0xff] %v5482_v19  ;;  %1842 = vmatpush.msra.mxu0 %v5482_v19  ;;  %v7097_v19 = vld [vmem:[#allocation25_spill] sm:$0xff] }
 0x35e   :  { %1853 = vmatpush.msra.mxu1 %v5064_v8  ;;  %7087 = vst [vmem:[#allocation98_spill] sm:$0xff] %v5486_v16  ;;  %v5509_v8 = vld [vmem:[#allocation5 + $0x20] sm:$0xff] }
 0x35f   :  { %1843 = vmatpush.msra.mxu0 %v5486_v16  ;;  %7088 = vst [vmem:[#allocation26_spill] sm:$0xff] %v5491_v29 }
 0x360   :  { %1854 = vmatpush.msra.mxu1 %v5067_v26  ;;  %7089 = vst [vmem:[#allocation38_spill] sm:$0xff] %v5494_v24  ;;  %v5512_v26 = vld [vmem:[#allocation5 + $0x8] sm:$0xff] }
 0x361   :  { %7090 = vst [vmem:[#allocation42_spill] sm:$0xff] %v5497_v21 }
 0x362   :  { %1855 = vmatpush.msra.mxu1 %v5070_v63  ;;  %7091 = vst [vmem:[#allocation46_spill] sm:$0xff] %v5500_v6 }
 0x363   :  { %7092 = vst [vmem:[#allocation22_spill] sm:$0xff] %v5503_v50 }
 0x364   :  { %1856 = vmatpush.msra.mxu1 %v5491_v29  ;;  %7093 = vst [vmem:[#allocation50_spill] sm:$0xff] %v5506_v33  ;;  %v7096_v29 = vld [vmem:[#allocation54_spill] sm:$0xff] }
 0x365   :  { %7094 = vst [vmem:[#allocation102_spill] sm:$0xff] %v5509_v8 }
 0x366   :  { %1857 = vmatpush.msra.mxu1 %v5494_v24  ;;  %7095 = vst [vmem:[#allocation103_spill] sm:$0xff] %v5512_v26 }
 0x368   :  { %1858 = vmatpush.msra.mxu1 %v5497_v21 }
 0x36a   :  { %1859 = vmatpush.msra.mxu1 %v5500_v6 }
 0x36c   :  { %1860 = vmatpush.msra.mxu1 %v5503_v50 }
 0x36e   :  { %1861 = vmatpush.msra.mxu1 %v5506_v33 }
 0x370   :  { %1862 = vmatpush.msra.mxu1 %v5509_v8  ;;  %v7098_v8 = vld [vmem:[#allocation93_spill] sm:$0xff] }
 0x372   :  { %1863 = vmatpush.msra.mxu1 %v5512_v26  ;;  %v7099_v26 = vld [vmem:[#allocation94_spill] sm:$0xff] }
 0x38c   :  { %v1333_v63 = vpop.f32.mrf.mxu1 }
 0x392   :  { %v1353_v7 = vpop.f32.mrf.mxu2 }
 0x393   :  { %v1373_v21 = vpop.f32.mrf.mxu3 }
 0x397   :  { %v1458_v24 = vpop.f32.mrf.mxu0 }
 0x398   :  { %v1478_v6 = vpop.f32.mrf.mxu1  ;;  %v1459_v16 = vadd.f32 %v1458_v24, %v7096_v29 }
 0x399   :  { %v1479_v50 = vadd.f32 %v1478_v6, %v7097_v19 }
 0x39a   :  { %v1501_v30 = vadd.f32 %v1459_v16, %v1333_v63 }
 0x39b   :  { %v1502_v36 = vadd.f32 %v1479_v50, %v1353_v7 }
 0x39c   :  { %v2797_v33 = vmul.f32 -1.442695, %v1501_v30 }
 0x39d   :  { %v2798_v46 = vmul.f32 -1.442695, %v1502_v36 }
 0x39e   :  { %2899 = vpow2.f32 %v2797_v33 }
 0x39f   :  { %v1565_v52 = vpop.f32.mrf.mxu3  ;;  %2901 = vpow2.f32 %v2798_v46 }
 0x3a0   :  { %v1668_v51 = vadd.f32 %v1565_v52, %v7098_v8  ;;  %v1585_v15 = vpop.f32.mrf.mxu0  ;;  %v1541_v8 = vadd.f32 %v5098_v43, %v1373_v21 }
 0x3a1   :  { %v1669_v55 = vadd.f32 %v1585_v15, %v7099_v26 }
 0x3a2   :  { %v2799_v37 = vmul.f32 -1.442695, %v1668_v51 }
 0x3a3   :  { %v2800_v2 = vmul.f32 -1.442695, %v1669_v55 }
 0x3a4   :  { %2903 = vpow2.f32 %v2799_v37  ;;  %v2900_v9 = vpop.eup %2899 }
 0x3a5   :  { %2905 = vpow2.f32 %v2800_v2  ;;  %v2902_v24 = vpop.eup %2901  ;;  %v1509_v6 = vadd.f32 1.0, %v2900_v9 }
 0x3a6   :  { %v5519_v19 = vadd.f32 1.0, %v2902_v24 }
 0x3a7   :  { %2907 = vrcp.f32 %v1509_v6  ;;  %v1522_v2 = vand.u32 2147483648, %v1509_v6  ;;  %v1520_v50 = vand.u32 2147483647, %v1509_v6  ;;  %vm1516_vm10 = vweird.f32 %v1509_v6 }
 0x3a8   :  { %2909 = vrcp.f32 %v5519_v19  ;;  %vm1531_vm2 = vweird.f32 %v5519_v19 }
 0x3a9   :  { %vm1521_vm12 = vcmp.eq.f32.partialorder %v1520_v50, 8.507059e+37  ;;  %v7101_v50 = vld [vmem:[#allocation87_spill] sm:$0xff] }
 0x3aa   :  { %v2904_v36 = vpop.eup %2903 }
 0x3ab   :  { %v2906_v30 = vpop.eup %2905  ;;  %v1676_v46 = vadd.f32 1.0, %v2904_v36  ;;  %v1498_v36 = vpop.f32.mrf.mxu2 }
 0x3ac   :  { %v5522_v7 = vadd.f32 1.0, %v2906_v30  ;;  %v1523_v30 = vor.u32 1.1754944e-38, %v1522_v2  ;;  %v1499_v18 = vadd.f32 %v1498_v36, %v7100_v48 }
 0x3ad   :  { %2911 = vrcp.f32 %v1676_v46  ;;  %v2908_v52 = vpop.eup %2907  ;;  %v1689_v29 = vand.u32 2147483648, %v1676_v46  ;;  %vm1683_vm14 = vweird.f32 %v1676_v46 }
 0x3ae   :  { %v2910_v15 = vpop.eup %2909  ;;  %v1512_v51 = vmul.f32 %v2908_v52, %v1509_v6  ;;  %2913 = vrcp.f32 %v5522_v7  ;;  %vm1517_vm9 = vweird.f32 %v2908_v52  ;;  %vm1698_vm6 = vweird.f32 %v5522_v7 }
 0x3af   :  { %v1527_v37 = vmul.f32 %v2910_v15, %v5519_v19  ;;  %vm1518_vm11 = vmor %vm1516_vm10, %vm1517_vm9  ;;  %v1690_v43 = vor.u32 1.1754944e-38, %v1689_v29  ;;  %vm1532_vm1 = vweird.f32 %v2910_v15  ;;  %v1535_v29 = vand.u32 2147483647, %v5519_v19 }
 0x3b0   :  { %v1513_v55 = vsub.f32 1.0, %v1512_v51  ;;  %vm1533_vm3 = vmor %vm1531_vm2, %vm1532_vm1 }
 0x3b1   :  { %v1528_v24 = vsub.f32 1.0, %v1527_v37  ;;  %vm1536_vm4 = vcmp.eq.f32.partialorder %v1535_v29, 8.507059e+37  ;;  %v5618_v29 = vld [vmem:[#allocation8 + $0x20] sm:$0xff] }
 0x3b2   :  { %v1514_v16 = vmul.f32 %v2908_v52, %v1513_v55  ;;  %v1687_v55 = vand.u32 2147483647, %v1676_v46 }
 0x3b3   :  { %v2912_v9 = vpop.eup %2911  ;;  %v1529_v37 = vmul.f32 %v2910_v15, %v1528_v24 }
 0x3b4   :  { %v1679_v33 = vmul.f32 %v2912_v9, %v1676_v46  ;;  %v1515_v63 = vadd.f32 %v2908_v52, %v1514_v16  ;;  %v2914_v47 = vpop.eup %2913  ;;  %vm1684_vm13 = vweird.f32 %v2912_v9  ;;  %v1605_v16 = vpop.f32.mrf.mxu1  ;;  %vm1688_vm0 = vcmp.eq.f32.partialorder %v1687_v55, 8.507059e+37 }
 0x3b5   :  { %v1694_v2 = vmul.f32 %v2914_v47, %v5522_v7  ;;  %vm1685_vm15 = vmor %vm1683_vm14, %vm1684_vm13  ;;  %vm1699_vm5 = vweird.f32 %v2914_v47 }
 0x3b6   :  { %v1680_v26 = vsub.f32 1.0, %v1679_v33  ;;  %v1519_v51 = vsel %vm1518_vm11, %v2908_v52, %v1515_v63  ;;  %v1708_v52 = vadd.f32 %v5107_v11, %v1605_v16  ;;  %v7102_v33 = vperm.slane %v7101_v50, 2  ;;  %v7103_v63 = vld [vmem:[#allocation23_spill] sm:$0xff]  ;;  %vm1700_vm7 = vmor %vm1698_vm6, %vm1699_vm5  ;;  %v7125_v50 = vld [vmem:[#allocation36_spill] sm:$0xff] }
 0x3b7   :  { %v1524_v56 = vsel %vm1521_vm12, %v1523_v30, %v1519_v51 }
 0x3b8   :  { %v1681_v45 = vmul.f32 %v2912_v9, %v1680_v26  ;;  %v1542_v58 = vmul.f32 %v1541_v8, %v1524_v56  ;;  %v5533_v36 = vadd.f32 %v7103_v63, %v7102_v33  ;;  %v1695_v8 = vsub.f32 1.0, %v1694_v2  ;;  %v7126_v33 = vld [vmem:[#allocation48_spill] sm:$0xff] }
 0x3b9   :  { %v5600_v63 = vld [vmem:[#allocation8 + $0x68] sm:$0xff] }
 0x3ba   :  { %v1682_v6 = vadd.f32 %v2912_v9, %v1681_v45  ;;  %v1543_v12 = vadd.f32 %v1542_v58, %v1499_v18  ;;  %v1530_v45 = vadd.f32 %v2910_v15, %v1529_v37  ;;  %v1537_v58 = vand.u32 2147483648, %v5519_v19 }
 0x3bb   :  { %v1696_v46 = vmul.f32 %v2914_v47, %v1695_v8  ;;  %v1702_v19 = vand.u32 2147483647, %v5522_v7  ;;  %v7129_v8 = vld [vmem:[#allocation39_spill] sm:$0xff] }
 0x3bc   :  { %v1686_v21 = vsel %vm1685_vm15, %v2912_v9, %v1682_v6  ;;  %2915 = vtanh.f32 %v1543_v12  ;;  %v1534_v11 = vsel %vm1533_vm3, %v2910_v15, %v1530_v45  ;;  %v1538_v9 = vor.u32 1.1754944e-38, %v1537_v58  ;;  %v7128_v45 = vld [vmem:[#allocation90_spill] sm:$0xff] }
 0x3bd   :  { %v1691_v26 = vsel %vm1688_vm0, %v1690_v43, %v1686_v21  ;;  %v1697_v55 = vadd.f32 %v2914_v47, %v1696_v46  ;;  %v1704_v6 = vand.u32 2147483648, %v5522_v7  ;;  %vm1703_vm8 = vcmp.eq.f32.partialorder %v1702_v19, 8.507059e+37  ;;  %v5612_v58 = vld [vmem:[#allocation8 + $0x38] sm:$0xff]  ;;  %v5626_v46 = vld [vmem:[#allocation8 + $0x8] sm:$0xff]  ;;  %v5648_v19 = vld [vmem:[#allocation8 + $0x10] sm:$0xff] }
 0x3be   :  { %v1709_v56 = vmul.f32 %v1708_v52, %v1691_v26  ;;  %v1539_v30 = vsel %vm1536_vm4, %v1538_v9, %v1534_v11  ;;  %v7123_v52 = vld [vmem:[#allocation86_spill] sm:$0xff]  ;;  %v7124_v26 = vld [vmem:[#allocation33_spill] sm:$0xff]  ;;  %v7133_v11 = vld [vmem:[#allocation47_spill] sm:$0xff] }
 0x3bf   :  { %v1705_v43 = vor.u32 1.1754944e-38, %v1704_v6  ;;  %v7137_v9 = vld [vmem:[#allocation64_spill] sm:$0xff]  ;;  %v7142_v6 = vld [vmem:[#allocation51_spill] sm:$0xff] }
 0x3c0   :  { %v1710_v18 = vadd.f32 %v1709_v56, %v5533_v36  ;;  %v7127_v56 = vld [vmem:[#allocation49_spill] sm:$0xff] }
 0x3c2   :  { %2917 = vtanh.f32 %v1710_v18  ;;  %v2916_v12 = vpop.eup %2915  ;;  %v7131_v18 = vld [vmem:[#allocation60_spill] sm:$0xff] }
 0x3c3   :  { %v1545_v24 = vsub.f32 %v5124_v22, %v2916_v12  ;;  %v1701_v22 = vsel %vm1700_vm7, %v2914_v47, %v1697_v55  ;;  %v7140_v55 = vld [vmem:[#allocation16_spill] sm:$0xff] }
 0x3c4   :  { %v1706_v21 = vsel %vm1703_vm8, %v1705_v43, %v1701_v22  ;;  %v7145_v22 = vld [vmem:[#allocation65_spill] sm:$0xff]  ;;  %v7146_v43 = vld [vmem:[#allocation72_spill] sm:$0xff] }
 0x3c5   :  { %v1546_v51 = vmul.f32 %v1545_v24, %v1539_v30  ;;  %v5632_v24 = vld [vmem:[#allocation7 + $0x178] sm:$0xff]  ;;  %v7138_v30 = vld [vmem:[#allocation61_spill] sm:$0xff] }
 0x3c7   :  { %v5541_v37 = vadd.f32 %v2916_v12, %v1546_v51  ;;  %v7135_v12 = vld [vmem:[#allocation57_spill] sm:$0xff]  ;;  %v5638_v51 = vld [vmem:[#allocation7 + $0x160] sm:$0xff] }
 0x3c8   :  { %v2918_v16 = vpop.eup %2917 }
 0x3c9   :  { %v1713_v15 = vrot.slane %v2918_v16, 2  ;;  %1624 = vmatmul.f32.vlgmr.msra.gmra.mxu2 %v5541_v37  ;;  %1644 = vmatmul.f32.vlgmr.msra.gmra.mxu3 %v5541_v37 }
 0x3ca   :  { %1664 = vmatmul.f32.vlgmr.msrb.gmra.mxu0 %v5541_v37  ;;  %1868 = vmatpush.msra.mxu2 %v5136_v1 }
 0x3cb   :  { %v1715_v2 = vsub.f32 %v5170_v10, %v1713_v15  ;;  %1888 = vmatpush.msra.mxu3 %v5143_v3  ;;  %1908 = vmatpush.msrb.mxu0 %v5146_v4  ;;  %v7104_v3 = vld [vmem:[#allocation66_spill] sm:$0xff]  ;;  %v7105_v4 = vld [vmem:[#allocation99_spill] sm:$0xff]  ;;  %v7113_v10 = vld [vmem:[#allocation28_spill] sm:$0xff] }
 0x3cc   :  { %1869 = vmatpush.msra.mxu2 %v5149_v27  ;;  %v7106_v27 = vld [vmem:[#allocation62_spill] sm:$0xff] }
 0x3cd   :  { %v1717_v7 = vrot.slane %v1715_v2, 6  ;;  %1889 = vmatpush.msra.mxu3 %v5152_v14  ;;  %1909 = vmatpush.msrb.mxu0 %v5155_v61  ;;  %v7107_v14 = vld [vmem:[#allocation37_spill] sm:$0xff]  ;;  %v7108_v61 = vld [vmem:[#allocation27_spill] sm:$0xff] }
 0x3ce   :  { %1870 = vmatpush.msra.mxu2 %v5158_v32  ;;  %v7109_v32 = vld [vmem:[#allocation34_spill] sm:$0xff] }
 0x3cf   :  { %v1719_v47 = vmul.f32 %v1717_v7, %v1706_v21  ;;  %1890 = vmatpush.msra.mxu3 %v5161_v60  ;;  %1910 = vmatpush.msrb.mxu0 %v5164_v23  ;;  %v7110_v60 = vld [vmem:[#allocation30_spill] sm:$0xff]  ;;  %v7111_v23 = vld [vmem:[#allocation41_spill] sm:$0xff]  ;;  %v5666_v7 = vld [vmem:[#allocation7 + $0x100] sm:$0xff] }
 0x3d0   :  { %1871 = vmatpush.msra.mxu2 %v5167_v53  ;;  %v7112_v53 = vld [vmem:[#allocation70_spill] sm:$0xff]  ;;  %v7149_v21 = vld [vmem:[#allocation59_spill] sm:$0xff] }
 0x3d1   :  { %v5558_v1 = vadd.f32 %v2918_v16, %v1719_v47  ;;  %1891 = vmatpush.msra.mxu3 %v5172_v59  ;;  %1911 = vmatpush.msrb.mxu0 %v5175_v49  ;;  %v7114_v59 = vld [vmem:[#allocation74_spill] sm:$0xff]  ;;  %v7115_v49 = vld [vmem:[#allocation40_spill] sm:$0xff]  ;;  %v7150_v47 = vld [vmem:[#allocation63_spill] sm:$0xff] }
 0x3d2   :  { %1872 = vmatpush.msra.mxu2 %v5178_v35  ;;  %v7116_v35 = vld [vmem:[#allocation78_spill] sm:$0xff]  ;;  %v5644_v16 = vld [vmem:[#allocation7 + $0x148] sm:$0xff] }
 0x3d3   :  { %1737 = vmatmul.f32.vlgmr.msrb.gmra.mxu1 %v5558_v1  ;;  %1757 = vmatmul.f32.vlgmr.msrb.gmra.mxu2 %v5558_v1  ;;  %v5654_v15 = vld [vmem:[#allocation7 + $0x130] sm:$0xff]  ;;  %v5660_v2 = vld [vmem:[#allocation7 + $0x118] sm:$0xff] }
 0x3d4   :  { %1777 = vmatmul.f32.vlgmr.msrb.gmra.mxu3 %v5558_v1  ;;  %1844 = vmatmul.f32.vlgmr.msra.gmra.mxu0 %v5558_v1 }
 0x3d5   :  { %1892 = vmatpush.msra.mxu3 %v5184_v31  ;;  %1928 = vmatpush.msrb.mxu1 %v5200_v38  ;;  %v7117_v31 = vld [vmem:[#allocation82_spill] sm:$0xff]  ;;  %v7120_v38 = vld [vmem:[#allocation32_spill] sm:$0xff] }
 0x3d6   :  { %1912 = vmatpush.msrb.mxu0 %v5187_v17  ;;  %1873 = vmatpush.msra.mxu2 %v5190_v57  ;;  %v7118_v17 = vld [vmem:[#allocation29_spill] sm:$0xff]  ;;  %v7119_v57 = vld [vmem:[#allocation31_spill] sm:$0xff] }
 0x3d7   :  { %1893 = vmatpush.msra.mxu3 %v5203_v34  ;;  %1929 = vmatpush.msrb.mxu1 %v5212_v42  ;;  %v7121_v34 = vld [vmem:[#allocation44_spill] sm:$0xff]  ;;  %v7122_v42 = vld [vmem:[#allocation45_spill] sm:$0xff] }
 0x3d8   :  { %1913 = vmatpush.msrb.mxu0 %v7104_v3  ;;  %1874 = vmatpush.msra.mxu2 %v7105_v4  ;;  %v5672_v3 = vld [vmem:[#allocation7 + $0xe8] sm:$0xff] }
 0x3d9   :  { %1894 = vmatpush.msra.mxu3 %v7106_v27  ;;  %1930 = vmatpush.msrb.mxu1 %v7107_v14  ;;  %v7152_v4 = vld [vmem:[#allocation73_spill] sm:$0xff]  ;;  %v7154_v14 = vld [vmem:[#allocation20_spill] sm:$0xff] }
 0x3da   :  { %1914 = vmatpush.msrb.mxu0 %v7108_v61  ;;  %1875 = vmatpush.msra.mxu2 %v7109_v32  ;;  %v7153_v27 = vld [vmem:[#allocation77_spill] sm:$0xff]  ;;  %v7155_v32 = vld [vmem:[#allocation80_spill] sm:$0xff] }
 0x3db   :  { %1864 = vmatmul.f32.vlgmr.msra.gmra.mxu1 %v5558_v1  ;;  %1895 = vmatpush.msra.mxu3 %v7110_v60  ;;  %v5678_v61 = vld [vmem:[#allocation7 + $0xd0] sm:$0xff]  ;;  %v7156_v60 = vld [vmem:[#allocation67_spill] sm:$0xff] }
 0x3dc   :  { %1931 = vmatpush.msrb.mxu1 %v7111_v23  ;;  %1876 = vmatpush.msra.mxu2 %v7112_v53  ;;  %v7157_v23 = vld [vmem:[#allocation21_spill] sm:$0xff]  ;;  %v5684_v53 = vld [vmem:[#allocation7 + $0xb8] sm:$0xff] }
 0x3dd   :  { %1915 = vmatpush.msrb.mxu0 %v7113_v10  ;;  %1896 = vmatpush.msra.mxu3 %v7114_v59  ;;  %v7158_v10 = vld [vmem:[#allocation71_spill] sm:$0xff] }
 0x3de   :  { %1932 = vmatpush.msrb.mxu1 %v7115_v49  ;;  %1877 = vmatpush.msra.mxu2 %v7116_v35  ;;  %v5688_v59 = vld [vmem:[#allocation5 + $0xd8] sm:$0xff]  ;;  %v7159_v49 = vld [vmem:[#allocation84_spill] sm:$0xff] }
 0x3df   :  { %1916 = vmatpush.msrb.mxu0 %v7117_v31  ;;  %1897 = vmatpush.msra.mxu3 %v7118_v17  ;;  %v5692_v35 = vld [vmem:[#allocation7 + $0xa0] sm:$0xff]  ;;  %v7160_v31 = vld [vmem:[#allocation85_spill] sm:$0xff] }
 0x3e0   :  { %1933 = vmatpush.msrb.mxu1 %v7119_v57  ;;  %1878 = vmatpush.msra.mxu2 %v7120_v38  ;;  %v5696_v17 = vld [vmem:[#allocation5 + $0xc0] sm:$0xff]  ;;  %v7161_v57 = vld [vmem:[#allocation81_spill] sm:$0xff] }
 0x3e1   :  { %1917 = vmatpush.msrb.mxu0 %v7121_v34  ;;  %1898 = vmatpush.msra.mxu3 %v7122_v42  ;;  %v5700_v38 = vld [vmem:[#allocation7 + $0x88] sm:$0xff]  ;;  %v7162_v34 = vld [vmem:[#allocation91_spill] sm:$0xff] }
 0x3e2   :  { %1934 = vmatpush.msrb.mxu1 %v5273_v28  ;;  %1879 = vmatpush.msra.mxu2 %v7123_v52  ;;  %v5606_v28 = vld [vmem:[#allocation8 + $0x50] sm:$0xff]  ;;  %v5704_v42 = vld [vmem:[#allocation5 + $0xa8] sm:$0xff] }
 0x3e3   :  { %1918 = vmatpush.msrb.mxu0 %v7124_v26  ;;  %1899 = vmatpush.msra.mxu3 %v7125_v50  ;;  %v7163_v52 = vld [vmem:[#allocation88_spill] sm:$0xff]  ;;  %v5708_v26 = vld [vmem:[#allocation7 + $0x70] sm:$0xff]  ;;  %v7164_v50 = vld [vmem:[#allocation83_spill] sm:$0xff] }
 0x3e4   :  { %1935 = vmatpush.msrb.mxu1 %v5283_v44  ;;  %1880 = vmatpush.msra.mxu2 %v7126_v33  ;;  %v7130_v44 = vld [vmem:[#allocation52_spill] sm:$0xff]  ;;  %v5712_v33 = vld [vmem:[#allocation5 + $0x90] sm:$0xff] }
 0x3e5   :  { %1919 = vmatpush.msrb.mxu0 %v5600_v63  ;;  %1900 = vmatpush.msra.mxu3 %v7127_v56  ;;  %v7165_v56 = vld [vmem:[#allocation75_spill] sm:$0xff] }
 0x3e6   :  { %1936 = vmatpush.msrb.mxu1 %v5293_v25  ;;  %1881 = vmatpush.msra.mxu2 %v7128_v45  ;;  %v7132_v25 = vld [vmem:[#allocation53_spill] sm:$0xff]  ;;  %v5716_v45 = vld [vmem:[#allocation7 + $0x58] sm:$0xff] }
 0x3e7   :  { %1920 = vmatpush.msrb.mxu0 %v5606_v28  ;;  %1901 = vmatpush.msra.mxu3 %v7129_v8  ;;  %v7166_v8 = vld [vmem:[#allocation89_spill] sm:$0xff] }
 0x3e8   :  { %1937 = vmatpush.msrb.mxu1 %v5304_v40  ;;  %1882 = vmatpush.msra.mxu2 %v7130_v44  ;;  %v7134_v40 = vld [vmem:[#allocation56_spill] sm:$0xff]  ;;  %v7167_v44 = vld [vmem:[#allocation101_spill] sm:$0xff] }
 0x3e9   :  { %1921 = vmatpush.msrb.mxu0 %v5612_v58  ;;  %1902 = vmatpush.msra.mxu3 %v7131_v18  ;;  %v7168_v18 = vld [vmem:[#allocation79_spill] sm:$0xff] }
 0x3ea   :  { %1938 = vmatpush.msrb.mxu1 %v5313_v62  ;;  %1883 = vmatpush.msra.mxu2 %v7132_v25  ;;  %v7136_v62 = vld [vmem:[#allocation43_spill] sm:$0xff] }
 0x3eb   :  { %1922 = vmatpush.msrb.mxu0 %v5618_v29  ;;  %1884 = vmatmul.f32.vlgmr.msra.gmra.mxu2 %v5558_v1  ;;  %v5722_v25 = vld [vmem:[#allocation7 + $0x40] sm:$0xff] }
 0x3ec   :  { %1903 = vmatpush.msra.mxu3 %v7133_v11  ;;  %2013 = vmatpush.msrb.mxu2 %v7134_v40  ;;  %v5725_v11 = vld [vmem:[#allocation5 + $0x170] sm:$0xff]  ;;  %v7169_v40 = vld [vmem:[#allocation100_spill] sm:$0xff] }
 0x3ed   :  { %1939 = vmatpush.msrb.mxu1 %v5323_v20  ;;  %1923 = vmatpush.msrb.mxu0 %v5626_v46  ;;  %v7139_v20 = vld [vmem:[#allocation68_spill] sm:$0xff] }
 0x3ee   :  { %2033 = vmatpush.msrb.mxu3 %v7135_v12  ;;  %2014 = vmatpush.msrb.mxu2 %v7136_v62  ;;  %v7170_v12 = vld [vmem:[#allocation92_spill] sm:$0xff] }
 0x3ef   :  { %1940 = vmatpush.msrb.mxu1 %v5333_v54  ;;  %2053 = vmatpush.msra.mxu0 %v5632_v24  ;;  %v7141_v54 = vld [vmem:[#allocation18_spill] sm:$0xff]  ;;  %v5730_v62 = vld [vmem:[#allocation7 + $0x28] sm:$0xff] }
 0x3f0   :  { %2034 = vmatpush.msrb.mxu3 %v7137_v9  ;;  %2015 = vmatpush.msrb.mxu2 %v7138_v30  ;;  %v5733_v9 = vld [vmem:[#allocation5 + $0x158] sm:$0xff]  ;;  %v7171_v30 = vld [vmem:[#allocation24_spill] sm:$0xff] }
 0x3f1   :  { %1941 = vmatpush.msrb.mxu1 %v5343_v39  ;;  %2054 = vmatpush.msra.mxu0 %v5638_v51  ;;  %v7143_v39 = vld [vmem:[#allocation55_spill] sm:$0xff] }
 0x3f2   :  { %2035 = vmatpush.msrb.mxu3 %v7139_v20  ;;  %2016 = vmatpush.msrb.mxu2 %v7140_v55  ;;  %v5737_v20 = vld [vmem:[#allocation7 + $0x10] sm:$0xff]  ;;  %v5740_v55 = vld [vmem:[#allocation5 + $0x140] sm:$0xff] }
 0x3f3   :  { %1942 = vmatpush.msrb.mxu1 %v5353_v13  ;;  %2055 = vmatpush.msra.mxu0 %v5644_v16  ;;  %v7144_v13 = vld [vmem:[#allocation17_spill] sm:$0xff] }
 0x3f4   :  { %2036 = vmatpush.msrb.mxu3 %v7141_v54  ;;  %2017 = vmatpush.msrb.mxu2 %v7142_v6  ;;  %v7172_v54 = vld [vmem:[#allocation97_spill] sm:$0xff] }
 0x3f5   :  { %1943 = vmatpush.msrb.mxu1 %v5648_v19  ;;  %2056 = vmatpush.msra.mxu0 %v5654_v15  ;;  %v5744_v6 = vld [vmem:[#allocation5 + $0x128] sm:$0xff] }
 0x3f6   :  { %2037 = vmatpush.msrb.mxu3 %v5364_v41  ;;  %2018 = vmatpush.msrb.mxu2 %v7143_v39  ;;  %v7147_v41 = vld [vmem:[#allocation76_spill] sm:$0xff]  ;;  %v7173_v39 = vld [vmem:[#allocation35_spill] sm:$0xff] }
 0x3f7   :  { %2120 = vmatpush.msra.mxu1 %v5370_v5  ;;  %2057 = vmatpush.msra.mxu0 %v5660_v2  ;;  %v7148_v5 = vld [vmem:[#allocation69_spill] sm:$0xff] }
 0x3f8   :  { %2038 = vmatpush.msrb.mxu3 %v7144_v13  ;;  %2019 = vmatpush.msrb.mxu2 %v7145_v22  ;;  %v5748_v13 = vld [vmem:[#allocation5 + $0x110] sm:$0xff] }
 0x3f9   :  { %2121 = vmatpush.msra.mxu1 %v5380_v0  ;;  %2058 = vmatpush.msra.mxu0 %v5666_v7  ;;  %v7151_v0 = vld [vmem:[#allocation19_spill] sm:$0xff]  ;;  %v7174_v22 = vld [vmem:[#allocation98_spill] sm:$0xff] }
 0x3fa   :  { %2039 = vmatpush.msrb.mxu3 %v7146_v43  ;;  %2020 = vmatpush.msrb.mxu2 %v7148_v5  ;;  %v5752_v43 = vld [vmem:[#allocation5 + $0xf8] sm:$0xff]  ;;  %v5758_v5 = vld [vmem:[#allocation5 + $0xc8] sm:$0xff] }
 0x3fb   :  { %2122 = vmatpush.msra.mxu1 %v7147_v41  ;;  %2059 = vmatpush.msra.mxu0 %v5672_v3  ;;  %v5755_v41 = vld [vmem:[#allocation5 + $0xe0] sm:$0xff]  ;;  %7175 = vst [vmem:[#allocation104_spill] sm:$0xff] %v5758_v5 }
 0x3fc   :  { %2040 = vmatpush.msrb.mxu3 %v7149_v21  ;;  %2021 = vmatpush.msrb.mxu2 %v7151_v0  ;;  %v7176_v21 = vld [vmem:[#allocation26_spill] sm:$0xff] }
 0x3fd   :  { %2123 = vmatpush.msra.mxu1 %v7150_v47  ;;  %2060 = vmatpush.msra.mxu0 %v5678_v61  ;;  %v7177_v47 = vld [vmem:[#allocation38_spill] sm:$0xff] }
 0x3fe   :  { %2041 = vmatpush.msrb.mxu3 %v7152_v4  ;;  %2022 = vmatpush.msrb.mxu2 %v7154_v14  ;;  %v7178_v0 = vld [vmem:[#allocation42_spill] sm:$0xff] }
 0x3ff   :  { %2124 = vmatpush.msra.mxu1 %v7153_v27  ;;  %2061 = vmatpush.msra.mxu0 %v5684_v53  ;;  %v7179_v4 = vld [vmem:[#allocation46_spill] sm:$0xff] }
 0x400   :  { %2042 = vmatpush.msrb.mxu3 %v7155_v32  ;;  %2023 = vmatpush.msrb.mxu2 %v7157_v23  ;;  %v7180_v27 = vld [vmem:[#allocation22_spill] sm:$0xff] }
 0x401   :  { %2125 = vmatpush.msra.mxu1 %v7156_v60  ;;  %2062 = vmatpush.msra.mxu0 %v5692_v35  ;;  %v7181_v14 = vld [vmem:[#allocation50_spill] sm:$0xff]  ;;  %v7183_v60 = vld [vmem:[#allocation103_spill] sm:$0xff] }
 0x402   :  { %2043 = vmatpush.msrb.mxu3 %v7158_v10  ;;  %2024 = vmatpush.msrb.mxu2 %v7159_v49  ;;  %v7182_v32 = vld [vmem:[#allocation102_spill] sm:$0xff] }
 0x403   :  { %2126 = vmatpush.msra.mxu1 %v5688_v59  ;;  %2063 = vmatpush.msra.mxu0 %v5700_v38 }
 0x404   :  { %2044 = vmatpush.msrb.mxu3 %v7160_v31  ;;  %2025 = vmatpush.msrb.mxu2 %v7161_v57  ;;  %v7184_v31 = vld [vmem:[#allocation54_spill] sm:$0xff] }
 0x405   :  { %2127 = vmatpush.msra.mxu1 %v5696_v17  ;;  %2064 = vmatpush.msra.mxu0 %v5708_v26 }
 0x406   :  { %2045 = vmatpush.msrb.mxu3 %v7162_v34  ;;  %2026 = vmatpush.msrb.mxu2 %v7163_v52 }
 0x407   :  { %2128 = vmatpush.msra.mxu1 %v5704_v42  ;;  %2065 = vmatpush.msra.mxu0 %v5716_v45 }
 0x408   :  { %2046 = vmatpush.msrb.mxu3 %v7164_v50  ;;  %2027 = vmatpush.msrb.mxu2 %v7165_v56  ;;  %v7185_v56 = vld [vmem:[#allocation93_spill] sm:$0xff] }
 0x409   :  { %2129 = vmatpush.msra.mxu1 %v5712_v33  ;;  %2066 = vmatpush.msra.mxu0 %v5722_v25 }
 0x40a   :  { %2047 = vmatpush.msrb.mxu3 %v7166_v8  ;;  %2028 = vmatpush.msrb.mxu2 %v7168_v18 }
 0x40b   :  { %2130 = vmatpush.msra.mxu1 %v7167_v44  ;;  %2067 = vmatpush.msra.mxu0 %v5730_v62 }
 0x40c   :  { %2140 = vmatpush.msra.mxu2 %v5725_v11  ;;  %2048 = vmatpush.msrb.mxu3 %v7169_v40 }
 0x40d   :  { %2131 = vmatpush.msra.mxu1 %v7170_v12  ;;  %2068 = vmatpush.msra.mxu0 %v5737_v20  ;;  %v7186_v12 = vld [vmem:[#allocation25_spill] sm:$0xff] }
 0x40e   :  { %2141 = vmatpush.msra.mxu2 %v5733_v9 }
 0x40f   :  { %2132 = vmatpush.msra.mxu1 %v7171_v30 }
 0x410   :  { %2142 = vmatpush.msra.mxu2 %v5740_v55 }
 0x411   :  { %2133 = vmatpush.msra.mxu1 %v7172_v54 }
 0x412   :  { %2143 = vmatpush.msra.mxu2 %v5744_v6 }
 0x413   :  { %2134 = vmatpush.msra.mxu1 %v7173_v39 }
 0x414   :  { %2144 = vmatpush.msra.mxu2 %v5748_v13 }
 0x415   :  { %2135 = vmatpush.msra.mxu1 %v7174_v22 }
 0x416   :  { %2145 = vmatpush.msra.mxu2 %v5752_v43 }
 0x418   :  { %2146 = vmatpush.msra.mxu2 %v5755_v41 }
 0x41a   :  { %2147 = vmatpush.msra.mxu2 %v5758_v5 }
 0x41c   :  { %2148 = vmatpush.msra.mxu2 %v7176_v21 }
 0x41e   :  { %2149 = vmatpush.msra.mxu2 %v7177_v47 }
 0x420   :  { %2150 = vmatpush.msra.mxu2 %v7178_v0  ;;  %v7187_v0 = vld [vmem:[#allocation94_spill] sm:$0xff] }
 0x422   :  { %2151 = vmatpush.msra.mxu2 %v7179_v4 }
 0x424   :  { %2152 = vmatpush.msra.mxu2 %v7180_v27 }
 0x426   :  { %2153 = vmatpush.msra.mxu2 %v7181_v14 }
 0x428   :  { %2154 = vmatpush.msra.mxu2 %v7182_v32 }
 0x42a   :  { %2155 = vmatpush.msra.mxu2 %v7183_v60 }
 0x447   :  { %v1665_v23 = vpop.f32.mrf.mxu0 }
 0x44c   :  { %v1625_v10 = vpop.f32.mrf.mxu2  ;;  %v1645_v54 = vpop.f32.mrf.mxu3 }
 0x450   :  { %v1738_v49 = vpop.f32.mrf.mxu1 }
 0x451   :  { %v1739_v57 = vadd.f32 %v1738_v49, %v7184_v31  ;;  %v1845_v34 = vpop.f32.mrf.mxu0 }
 0x452   :  { %v1950_v52 = vrot.slane %v1845_v34, 6 }
 0x453   :  { %v1781_v50 = vadd.f32 %v1739_v57, %v1625_v10 }
 0x454   :  { %v1954_v8 = vadd.f32 %v1950_v52, %v7185_v56 }
 0x455   :  { %v2801_v44 = vmul.f32 -1.442695, %v1781_v50 }
 0x456   :  { %v2803_v18 = vmul.f32 -1.442695, %v1954_v8  ;;  %v1758_v40 = vpop.f32.mrf.mxu2 }
 0x457   :  { %2919 = vpow2.f32 %v2801_v44  ;;  %v1759_v30 = vadd.f32 %v1758_v40, %v7186_v12 }
 0x458   :  { %2921 = vpow2.f32 %v2803_v18  ;;  %v1865_v39 = vpop.f32.mrf.mxu1 }
 0x459   :  { %v1782_v22 = vadd.f32 %v1759_v30, %v1645_v54  ;;  %v1951_v21 = vrot.slane %v1865_v39, 6 }
 0x45b   :  { %v2802_v47 = vmul.f32 -1.442695, %v1782_v22  ;;  %v1955_v4 = vadd.f32 %v1951_v21, %v7187_v0 }
 0x45d   :  { %v2920_v27 = vpop.eup %2919  ;;  %2923 = vpow2.f32 %v2802_v47  ;;  %v2804_v14 = vmul.f32 -1.442695, %v1955_v4 }
 0x45e   :  { %v2922_v32 = vpop.eup %2921  ;;  %v1789_v60 = vadd.f32 1.0, %v2920_v27 }
 0x45f   :  { %v1962_v10 = vadd.f32 1.0, %v2922_v32  ;;  %2925 = vpow2.f32 %v2804_v14 }
 0x460   :  { %2927 = vrcp.f32 %v1789_v60  ;;  %v1802_v30 = vand.u32 2147483648, %v1789_v60  ;;  %v1800_v39 = vand.u32 2147483647, %v1789_v60  ;;  %vm1796_vm10 = vweird.f32 %v1789_v60 }
 0x461   :  { %2929 = vrcp.f32 %v1962_v10  ;;  %v1975_v14 = vand.u32 2147483648, %v1962_v10  ;;  %vm1969_vm14 = vweird.f32 %v1962_v10 }
 0x462   :  { %vm1801_vm13 = vcmp.eq.f32.partialorder %v1800_v39, 8.507059e+37 }
 0x463   :  { %v2924_v49 = vpop.eup %2923 }
 0x464   :  { %v5773_v57 = vadd.f32 1.0, %v2924_v49  ;;  %v1778_v49 = vpop.f32.mrf.mxu3 }
 0x465   :  { %v2926_v34 = vpop.eup %2925  ;;  %v1779_v56 = vadd.f32 %v1778_v49, %v7100_v48 }
 0x466   :  { %v2928_v52 = vpop.eup %2927  ;;  %2931 = vrcp.f32 %v5773_v57  ;;  %v5776_v50 = vadd.f32 1.0, %v2926_v34  ;;  %v1803_v34 = vor.u32 1.1754944e-38, %v1802_v30  ;;  %v5791_v30 = vld [vmem:[%s6324_s4] ss:$0 sm:$0xff]  ;;  %v1817_v49 = vand.u32 2147483648, %v5773_v57 }
 0x467   :  { %v2930_v8 = vpop.eup %2929  ;;  %v1792_v44 = vmul.f32 %v2928_v52, %v1789_v60  ;;  %vm1797_vm9 = vweird.f32 %v2928_v52  ;;  %vm1811_vm2 = vweird.f32 %v5773_v57 }
 0x468   :  { %2933 = vrcp.f32 %v5776_v50  ;;  %v1965_v40 = vmul.f32 %v2930_v8, %v1962_v10  ;;  %vm1798_vm11 = vmor %vm1796_vm10, %vm1797_vm9  ;;  %vm1970_vm12 = vweird.f32 %v2930_v8  ;;  %vm1984_vm6 = vweird.f32 %v5776_v50 }
 0x469   :  { %v1793_v18 = vsub.f32 1.0, %v1792_v44  ;;  %v1973_v44 = vand.u32 2147483647, %v1962_v10  ;;  %vm1971_vm15 = vmor %vm1969_vm14, %vm1970_vm12 }
 0x46a   :  { %v1966_v22 = vsub.f32 1.0, %v1965_v40 }
 0x46b   :  { %v1794_v54 = vmul.f32 %v2928_v52, %v1793_v18  ;;  %v5785_v18 = vld [vmem:[%s6328_s8] ss:$0 sm:$0xff]  ;;  %vm1974_vm0 = vcmp.eq.f32.partialorder %v1973_v44, 8.507059e+37 }
 0x46c   :  { %v2932_v21 = vpop.eup %2931  ;;  %v1967_v27 = vmul.f32 %v2930_v8, %v1966_v22  ;;  %7188 = vst [vmem:[#allocation96_spill] sm:$0xff] %v5785_v18  ;;  %v1821_v40 = vadd.f32 %v5785_v18, %v1665_v23 }
 0x46d   :  { %v1807_v47 = vmul.f32 %v2932_v21, %v5773_v57  ;;  %v1795_v4 = vadd.f32 %v2928_v52, %v1794_v54  ;;  %vm1812_vm1 = vweird.f32 %v2932_v21 }
 0x46e   :  { %v5780_v32 = vpop.eup %2933  ;;  %v1885_v54 = vpop.f32.mrf.mxu2  ;;  %v1968_v12 = vadd.f32 %v2930_v8, %v1967_v27  ;;  %vm1813_vm3 = vmor %vm1811_vm2, %vm1812_vm1 }
 0x46f   :  { %v1808_v60 = vsub.f32 1.0, %v1807_v47  ;;  %v1799_v0 = vsel %vm1798_vm11, %v2928_v52, %v1795_v4  ;;  %v1994_v31 = vadd.f32 %v5791_v30, %v1885_v54  ;;  %v1980_v23 = vmul.f32 %v5780_v32, %v5776_v50 }
 0x470   :  { %v1804_v22 = vsel %vm1801_vm13, %v1803_v34, %v1799_v0  ;;  %v1976_v52 = vor.u32 1.1754944e-38, %v1975_v14  ;;  %v1972_v39 = vsel %vm1971_vm15, %v2930_v8, %v1968_v12  ;;  %v1815_v14 = vand.u32 2147483647, %v5773_v57 }
 0x471   :  { %v1822_v5 = vmul.f32 %v1821_v40, %v1804_v22  ;;  %v1996_v0 = vrot.slane %v1994_v31, 6  ;;  %v1809_v10 = vmul.f32 %v2932_v21, %v1808_v60  ;;  %v1981_v34 = vsub.f32 1.0, %v1980_v23 }
 0x472   :  { %v1977_v4 = vsel %vm1974_vm0, %v1976_v52, %v1972_v39  ;;  %vm1816_vm4 = vcmp.eq.f32.partialorder %v1815_v14, 8.507059e+37  ;;  %vm1985_vm5 = vweird.f32 %v5780_v32  ;;  %v1990_v22 = vand.u32 2147483648, %v5776_v50  ;;  %v5839_v14 = vld [vmem:[#allocation8 + $0x138] sm:$0xff] }
 0x473   :  { %v1823_v47 = vadd.f32 %v1822_v5, %v1779_v56  ;;  %v1998_v27 = vmul.f32 %v1996_v0, %v1977_v4  ;;  %v1810_v18 = vadd.f32 %v2932_v21, %v1809_v10  ;;  %v1982_v12 = vmul.f32 %v5780_v32, %v1981_v34  ;;  %vm1986_vm7 = vmor %vm1984_vm6, %vm1985_vm5  ;;  %v5816_v10 = vld [vmem:[#allocation5 + $0x178] sm:$0xff]  ;;  %v5825_v4 = vld [vmem:[#allocation5 + $0x160] sm:$0xff] }
 0x474   :  { %v1818_v56 = vor.u32 1.1754944e-38, %v1817_v49  ;;  %v1988_v57 = vand.u32 2147483647, %v5776_v50  ;;  %v1991_v39 = vor.u32 1.1754944e-38, %v1990_v22  ;;  %v5831_v34 = vld [vmem:[#allocation8 + $0x158] sm:$0xff]  ;;  %v5836_v49 = vld [vmem:[#allocation5 + $0x148] sm:$0xff] }
 0x475   :  { %2935 = vtanh.f32 %v1823_v47  ;;  %v1999_v54 = vadd.f32 %v1998_v27, %v5533_v36  ;;  %v1814_v31 = vsel %vm1813_vm3, %v2932_v21, %v1810_v18  ;;  %v1983_v44 = vadd.f32 %v5780_v32, %v1982_v12  ;;  %v5819_v47 = vld [vmem:[#allocation8 + $0x168] sm:$0xff]  ;;  %v5828_v27 = vld [vmem:[#allocation8 + $0x150] sm:$0xff]  ;;  %v5842_v12 = vld [vmem:[#allocation8 + $0x140] sm:$0xff] }
 0x476   :  { %v1819_v40 = vsel %vm1816_vm4, %v1818_v56, %v1814_v31  ;;  %vm1989_vm8 = vcmp.eq.f32.partialorder %v1988_v57, 8.507059e+37  ;;  %v5851_v56 = vld [vmem:[#allocation8 + $0x120] sm:$0xff]  ;;  %v5870_v22 = vld [vmem:[#allocation8 + $0x110] sm:$0xff] }
 0x477   :  { %2937 = vtanh.f32 %v1999_v54  ;;  %v5876_v57 = vld [vmem:[#allocation8 + $0xf0] sm:$0xff] }
 0x478   :  { %7189 = vst [vmem:[#allocation95_spill] sm:$0xff] %v5876_v57 }
 0x47b   :  { %v2936_v5 = vpop.eup %2935 }
 0x47c   :  { %v1825_v8 = vsub.f32 %v5541_v37, %v2936_v5  ;;  %v1987_v37 = vsel %vm1986_vm7, %v5780_v32, %v1983_v44  ;;  %v5822_v32 = vld [vmem:[#allocation8 + $0x170] sm:$0xff]  ;;  %v5861_v44 = vld [vmem:[#allocation5 + $0x118] sm:$0xff] }
 0x47d   :  { %v2938_v60 = vpop.eup %2937  ;;  %v1992_v50 = vsel %vm1989_vm8, %v1991_v39, %v1987_v37  ;;  %v5882_v37 = vld [vmem:[#allocation8 + $0xf8] sm:$0xff] }
 0x47e   :  { %v1826_v23 = vmul.f32 %v1825_v8, %v1819_v40  ;;  %v2002_v52 = vrot.slane %v2938_v60, 2  ;;  %v5854_v8 = vld [vmem:[#allocation8 + $0x128] sm:$0xff]  ;;  %7190 = vst [vmem:[#allocation58_spill] sm:$0xff] %v5882_v37  ;;  %v5888_v39 = vld [vmem:[#allocation8 + $0xd8] sm:$0xff] }
 0x47f   :  { %v5864_v40 = vld [vmem:[#allocation8 + $0x108] sm:$0xff]  ;;  %7191 = vst [vmem:[#allocation87_spill] sm:$0xff] %v5888_v39 }
 0x480   :  { %v5809_v21 = vadd.f32 %v2936_v5, %v1826_v23  ;;  %v2004_v18 = vsub.f32 %v5558_v1, %v2002_v52  ;;  %v5848_v5 = vld [vmem:[#allocation5 + $0x130] sm:$0xff]  ;;  %v5873_v23 = vld [vmem:[#allocation5 + $0x100] sm:$0xff] }
 0x481   :  { %v5879_v52 = vld [vmem:[#allocation8 + $0x160] sm:$0xff] }
 0x482   :  { %1904 = vmatmul.f32.vlgmr.msra.gmra.mxu3 %v5809_v21  ;;  %1924 = vmatmul.f32.vlgmr.msrb.gmra.mxu0 %v5809_v21  ;;  %v2006_v0 = vrot.slane %v2004_v18, 6  ;;  %v5885_v18 = vld [vmem:[#allocation5 + $0xe8] sm:$0xff] }
 0x483   :  { %1944 = vmatmul.f32.vlgmr.msrb.gmra.mxu1 %v5809_v21  ;;  %2160 = vmatpush.msra.mxu3 %v5816_v10 }
 0x484   :  { %2180 = vmatpush.msrb.mxu0 %v5819_v47  ;;  %2200 = vmatpush.msrb.mxu1 %v5822_v32  ;;  %v2008_v1 = vmul.f32 %v2006_v0, %v1992_v50  ;;  %v5891_v0 = vld [vmem:[#allocation8 + $0x148] sm:$0xff]  ;;  %v5894_v50 = vld [vmem:[#allocation8 + $0xe0] sm:$0xff] }
 0x485   :  { %2161 = vmatpush.msra.mxu3 %v5825_v4  ;;  %7192 = vst [vmem:[#allocation23_spill] sm:$0xff] %v5891_v0 }
 0x486   :  { %2181 = vmatpush.msrb.mxu0 %v5828_v27  ;;  %2201 = vmatpush.msrb.mxu1 %v5831_v34  ;;  %v5834_v54 = vadd.f32 %v2938_v60, %v2008_v1  ;;  %v5867_v60 = vld [vmem:[#allocation8 + $0x178] sm:$0xff]  ;;  %7193 = vst [vmem:[#allocation66_spill] sm:$0xff] %v5894_v50  ;;  %v5897_v1 = vld [vmem:[#allocation5 + $0xd0] sm:$0xff] }
 0x487   :  { %2162 = vmatpush.msra.mxu3 %v5836_v49  ;;  %7194 = vst [vmem:[#allocation99_spill] sm:$0xff] %v5897_v1 }
 0x488   :  { %2182 = vmatpush.msrb.mxu0 %v5839_v14  ;;  %2202 = vmatpush.msrb.mxu1 %v5842_v12  ;;  %v5846_v31 = vrot.slane %v5834_v54, 2 }
 0x489   :  { %2163 = vmatpush.msra.mxu3 %v5848_v5 }
 0x48a   :  { %2183 = vmatpush.msrb.mxu0 %v5851_v56  ;;  %2203 = vmatpush.msrb.mxu1 %v5854_v8 }
 0x48b   :  { %2029 = vmatmul.f32.vlgmr.msrb.gmra.mxu2 %v5846_v31  ;;  %2049 = vmatmul.f32.vlgmr.msrb.gmra.mxu3 %v5846_v31 }
 0x48c   :  { %2069 = vmatmul.f32.vlgmr.msra.gmra.mxu0 %v5846_v31  ;;  %2136 = vmatmul.f32.vlgmr.msra.gmra.mxu1 %v5846_v31 }
 0x48d   :  { %2164 = vmatpush.msra.mxu3 %v5861_v44  ;;  %2184 = vmatpush.msrb.mxu0 %v5864_v40 }
 0x48e   :  { %2220 = vmatpush.msrb.mxu2 %v5867_v60  ;;  %2204 = vmatpush.msrb.mxu1 %v5870_v22 }
 0x48f   :  { %2165 = vmatpush.msra.mxu3 %v5873_v23  ;;  %2185 = vmatpush.msrb.mxu0 %v5876_v57  ;;  %v5904_v57 = vld [vmem:[#allocation8 + $0x130] sm:$0xff] }
 0x490   :  { %2221 = vmatpush.msrb.mxu2 %v5879_v52  ;;  %2205 = vmatpush.msrb.mxu1 %v5882_v37  ;;  %v5901_v37 = vld [vmem:[#allocation8 + $0xc0] sm:$0xff]  ;;  %7196 = vst [vmem:[#allocation37_spill] sm:$0xff] %v5904_v57 }
 0x491   :  { %2166 = vmatpush.msra.mxu3 %v5885_v18  ;;  %2186 = vmatpush.msrb.mxu0 %v5888_v39  ;;  %7195 = vst [vmem:[#allocation62_spill] sm:$0xff] %v5901_v37  ;;  %v5907_v39 = vld [vmem:[#allocation5 + $0xb8] sm:$0xff] }
 0x492   :  { %2222 = vmatpush.msrb.mxu2 %v5891_v0  ;;  %2206 = vmatpush.msrb.mxu1 %v5894_v50  ;;  %7197 = vst [vmem:[#allocation27_spill] sm:$0xff] %v5907_v39  ;;  %v5910_v0 = vld [vmem:[#allocation8 + $0xc8] sm:$0xff] }
 0x493   :  { %2167 = vmatpush.msra.mxu3 %v5897_v1  ;;  %2156 = vmatmul.f32.vlgmr.msra.gmra.mxu2 %v5846_v31  ;;  %7198 = vst [vmem:[#allocation34_spill] sm:$0xff] %v5910_v0  ;;  %v5913_v50 = vld [vmem:[#allocation8 + $0xa8] sm:$0xff]  ;;  %v5916_v1 = vld [vmem:[#allocation8 + $0x118] sm:$0xff] }
 0x494   :  { %2187 = vmatpush.msrb.mxu0 %v5901_v37  ;;  %2223 = vmatpush.msrb.mxu2 %v5904_v57  ;;  %7199 = vst [vmem:[#allocation30_spill] sm:$0xff] %v5913_v50  ;;  %v5919_v37 = vld [vmem:[#allocation5 + $0xa0] sm:$0xff]  ;;  %v5922_v57 = vld [vmem:[#allocation8 + $0xb0] sm:$0xff] }
 0x495   :  { %2168 = vmatpush.msra.mxu3 %v5907_v39  ;;  %2207 = vmatpush.msrb.mxu1 %v5910_v0  ;;  %7200 = vst [vmem:[#allocation41_spill] sm:$0xff] %v5916_v1  ;;  %v5925_v39 = vld [vmem:[#allocation8 + $0x90] sm:$0xff]  ;;  %v5928_v0 = vld [vmem:[#allocation8 + $0x100] sm:$0xff] }
 0x496   :  { %2188 = vmatpush.msrb.mxu0 %v5913_v50  ;;  %2224 = vmatpush.msrb.mxu2 %v5916_v1  ;;  %7201 = vst [vmem:[#allocation70_spill] sm:$0xff] %v5919_v37  ;;  %v5931_v50 = vld [vmem:[#allocation5 + $0x88] sm:$0xff]  ;;  %v5934_v1 = vld [vmem:[#allocation8 + $0x98] sm:$0xff] }
 0x497   :  { %2169 = vmatpush.msra.mxu3 %v5919_v37  ;;  %7202 = vst [vmem:[#allocation28_spill] sm:$0xff] %v5922_v57  ;;  %2208 = vmatpush.msrb.mxu1 %v5922_v57  ;;  %v5937_v37 = vld [vmem:[#allocation8 + $0x78] sm:$0xff]  ;;  %v5940_v57 = vld [vmem:[#allocation8 + $0xe8] sm:$0xff] }
 0x498   :  { %7203 = vst [vmem:[#allocation74_spill] sm:$0xff] %v5925_v39  ;;  %2189 = vmatpush.msrb.mxu0 %v5925_v39  ;;  %2225 = vmatpush.msrb.mxu2 %v5928_v0  ;;  %v5943_v39 = vld [vmem:[#allocation5 + $0x70] sm:$0xff] }
 0x499   :  { %7204 = vst [vmem:[#allocation40_spill] sm:$0xff] %v5928_v0  ;;  %2170 = vmatpush.msra.mxu3 %v5931_v50  ;;  %2209 = vmatpush.msrb.mxu1 %v5934_v1  ;;  %v5946_v0 = vld [vmem:[#allocation8 + $0x80] sm:$0xff] }
 0x49a   :  { %7205 = vst [vmem:[#allocation78_spill] sm:$0xff] %v5931_v50  ;;  %2190 = vmatpush.msrb.mxu0 %v5937_v37  ;;  %2226 = vmatpush.msrb.mxu2 %v5940_v57  ;;  %v5949_v50 = vld [vmem:[#allocation8 + $0x60] sm:$0xff] }
 0x49b   :  { %7206 = vst [vmem:[#allocation82_spill] sm:$0xff] %v5934_v1  ;;  %2171 = vmatpush.msra.mxu3 %v5943_v39  ;;  %2210 = vmatpush.msrb.mxu1 %v5946_v0  ;;  %v5952_v1 = vld [vmem:[#allocation8 + $0xd0] sm:$0xff] }
 0x49c   :  { %7207 = vst [vmem:[#allocation29_spill] sm:$0xff] %v5937_v37  ;;  %2191 = vmatpush.msrb.mxu0 %v5949_v50  ;;  %2227 = vmatpush.msrb.mxu2 %v5952_v1  ;;  %v5955_v37 = vld [vmem:[#allocation5 + $0x58] sm:$0xff] }
 0x49d   :  { %7208 = vst [vmem:[#allocation31_spill] sm:$0xff] %v5940_v57  ;;  %2172 = vmatpush.msra.mxu3 %v5955_v37  ;;  %2211 = vmatpush.msrb.mxu1 %v5600_v63  ;;  %v5959_v57 = vld [vmem:[#allocation8 + $0x48] sm:$0xff] }
 0x49e   :  { %7209 = vst [vmem:[#allocation32_spill] sm:$0xff] %v5943_v39  ;;  %2192 = vmatpush.msrb.mxu0 %v5959_v57  ;;  %v5962_v39 = vld [vmem:[#allocation8 + $0xb8] sm:$0xff]  ;;  %v5975_v63 = vld [vmem:[#allocation5 + $0x28] sm:$0xff] }
 0x49f   :  { %7210 = vst [vmem:[#allocation44_spill] sm:$0xff] %v5946_v0  ;;  %2228 = vmatpush.msrb.mxu2 %v5962_v39  ;;  %v5965_v0 = vld [vmem:[#allocation5 + $0x40] sm:$0xff]  ;;  %2212 = vmatpush.msrb.mxu1 %v5606_v28  ;;  %v5985_v28 = vld [vmem:[#allocation5 + $0x10] sm:$0xff] }
 0x4a0   :  { %7211 = vst [vmem:[#allocation45_spill] sm:$0xff] %v5949_v50  ;;  %2173 = vmatpush.msra.mxu3 %v5965_v0  ;;  %v5969_v50 = vld [vmem:[#allocation8 + $0x30] sm:$0xff] }
 0x4a1   :  { %7212 = vst [vmem:[#allocation86_spill] sm:$0xff] %v5955_v37  ;;  %2193 = vmatpush.msrb.mxu0 %v5969_v50  ;;  %v5972_v37 = vld [vmem:[#allocation8 + $0xa0] sm:$0xff]  ;;  %2213 = vmatpush.msrb.mxu1 %v5612_v58  ;;  %v5993_v58 = vld [vmem:[#allocation7 + $0x168] sm:$0xff] }
 0x4a2   :  { %7213 = vst [vmem:[#allocation33_spill] sm:$0xff] %v5959_v57  ;;  %2229 = vmatpush.msrb.mxu2 %v5972_v37  ;;  %2174 = vmatpush.msra.mxu3 %v5975_v63  ;;  %v5979_v57 = vld [vmem:[#allocation8 + $0x18] sm:$0xff] }
 0x4a3   :  { %7214 = vst [vmem:[#allocation36_spill] sm:$0xff] %v5965_v0  ;;  %2194 = vmatpush.msrb.mxu0 %v5979_v57  ;;  %v5982_v0 = vld [vmem:[#allocation8 + $0x88] sm:$0xff]  ;;  %2214 = vmatpush.msrb.mxu1 %v5618_v29  ;;  %v6003_v29 = vld [vmem:[#allocation7 + $0x150] sm:$0xff] }
 0x4a4   :  { %7215 = vst [vmem:[#allocation48_spill] sm:$0xff] %v5969_v50  ;;  %2230 = vmatpush.msrb.mxu2 %v5982_v0  ;;  %2175 = vmatpush.msra.mxu3 %v5985_v28  ;;  %v5990_v50 = vld [vmem:[#allocation8] sm:$0xff] }
 0x4a5   :  { %7216 = vst [vmem:[#allocation49_spill] sm:$0xff] %v5979_v57  ;;  %2176 = vmatmul.f32.vlgmr.msra.gmra.mxu3 %v5846_v31  ;;  %2195 = vmatpush.msrb.mxu0 %v5990_v50  ;;  %v5996_v57 = vld [vmem:[#allocation8 + $0x70] sm:$0xff]  ;;  %v6006_v31 = vld [vmem:[#allocation8 + $0x58] sm:$0xff] }
 0x4a6   :  { %7217 = vst [vmem:[#allocation90_spill] sm:$0xff] %v5982_v0  ;;  %2305 = vmatpush.msrb.mxu3 %v5993_v58  ;;  %2231 = vmatpush.msrb.mxu2 %v5996_v57  ;;  %v5999_v0 = vld [vmem:[#allocation7 + $0x170] sm:$0xff] }
 0x4a7   :  { %7218 = vst [vmem:[#allocation39_spill] sm:$0xff] %v5990_v50  ;;  %2325 = vmatpush.msra.mxu0 %v5999_v0  ;;  %2215 = vmatpush.msrb.mxu1 %v5626_v46  ;;  %v6009_v50 = vld [vmem:[#allocation7 + $0x158] sm:$0xff]  ;;  %v6019_v46 = vld [vmem:[#allocation7 + $0x140] sm:$0xff] }
 0x4a8   :  { %7219 = vst [vmem:[#allocation52_spill] sm:$0xff] %v5993_v58  ;;  %2306 = vmatpush.msrb.mxu3 %v6003_v29  ;;  %2232 = vmatpush.msrb.mxu2 %v6006_v31  ;;  %v6013_v58 = vld [vmem:[#allocation7 + $0x138] sm:$0xff] }
 0x4a9   :  { %7220 = vst [vmem:[#allocation60_spill] sm:$0xff] %v5999_v0  ;;  %2326 = vmatpush.msra.mxu0 %v6009_v50  ;;  %2345 = vmatpush.msra.mxu1 %v5632_v24  ;;  %v6016_v0 = vld [vmem:[#allocation8 + $0x40] sm:$0xff]  ;;  %v6029_v24 = vld [vmem:[#allocation7 + $0x128] sm:$0xff] }
 0x4aa   :  { %7221 = vst [vmem:[#allocation53_spill] sm:$0xff] %v6003_v29  ;;  %2307 = vmatpush.msrb.mxu3 %v6013_v58  ;;  %2233 = vmatpush.msrb.mxu2 %v6016_v0  ;;  %v6023_v29 = vld [vmem:[#allocation7 + $0x120] sm:$0xff] }
 0x4ab   :  { %7222 = vst [vmem:[#allocation47_spill] sm:$0xff] %v6009_v50  ;;  %2327 = vmatpush.msra.mxu0 %v6019_v46  ;;  %2346 = vmatpush.msra.mxu1 %v5638_v51  ;;  %v6026_v50 = vld [vmem:[#allocation8 + $0x28] sm:$0xff]  ;;  %v6037_v51 = vld [vmem:[#allocation7 + $0x110] sm:$0xff] }
 0x4ac   :  { %7223 = vst [vmem:[#allocation56_spill] sm:$0xff] %v6013_v58  ;;  %2308 = vmatpush.msrb.mxu3 %v6023_v29  ;;  %2234 = vmatpush.msrb.mxu2 %v6026_v50  ;;  %v6033_v58 = vld [vmem:[#allocation7 + $0x108] sm:$0xff] }
 0x4ad   :  { %7224 = vst [vmem:[#allocation57_spill] sm:$0xff] %v6019_v46  ;;  %2328 = vmatpush.msra.mxu0 %v6029_v24  ;;  %2347 = vmatpush.msra.mxu1 %v5644_v16  ;;  %v6040_v46 = vld [vmem:[#allocation7 + $0xf0] sm:$0xff] }
 0x4ae   :  { %7225 = vst [vmem:[#allocation43_spill] sm:$0xff] %v6023_v29  ;;  %2309 = vmatpush.msrb.mxu3 %v6033_v58  ;;  %2235 = vmatpush.msrb.mxu2 %v5648_v19  ;;  %v3365_v29 = vld [vmem:[#allocation5 + $0x168] sm:$0xff]  ;;  %v3368_v16 = vld [vmem:[#allocation5 + $0x150] sm:$0xff]  ;;  %v6051_v19 = vld [vmem:[#allocation7 + $0xe0] sm:$0xff] }
 0x4af   :  { %7226 = vst [vmem:[#allocation64_spill] sm:$0xff] %v6029_v24  ;;  %2329 = vmatpush.msra.mxu0 %v6037_v51  ;;  %2348 = vmatpush.msra.mxu1 %v5654_v15  ;;  %v6044_v24 = vld [vmem:[#allocation7 + $0xf8] sm:$0xff]  ;;  %v6058_v15 = vld [vmem:[#allocation7 + $0xc8] sm:$0xff] }
 0x4b0   :  { %7227 = vst [vmem:[#allocation61_spill] sm:$0xff] %v6033_v58  ;;  %2412 = vmatpush.msra.mxu2 %v3365_v29  ;;  %2310 = vmatpush.msrb.mxu3 %v6040_v46  ;;  %v6047_v58 = vld [vmem:[#allocation7 + $0xd8] sm:$0xff] }
 0x4b1   :  { %7228 = vst [vmem:[#allocation68_spill] sm:$0xff] %v6040_v46  ;;  %2330 = vmatpush.msra.mxu0 %v6044_v24  ;;  %2349 = vmatpush.msra.mxu1 %v5660_v2  ;;  %v3371_v29 = vld [vmem:[#allocation5 + $0x138] sm:$0xff]  ;;  %v6054_v46 = vld [vmem:[#allocation7 + $0xc0] sm:$0xff]  ;;  %v6065_v2 = vld [vmem:[#allocation7 + $0xb0] sm:$0xff] }
 0x4b2   :  { %2413 = vmatpush.msra.mxu2 %v3368_v16  ;;  %7229 = vst [vmem:[#allocation16_spill] sm:$0xff] %v6047_v58  ;;  %2311 = vmatpush.msrb.mxu3 %v6047_v58  ;;  %v3374_v16 = vld [vmem:[#allocation5 + $0x120] sm:$0xff]  ;;  %v6061_v58 = vld [vmem:[#allocation7 + $0xa8] sm:$0xff] }
 0x4b3   :  { %2331 = vmatpush.msra.mxu0 %v6051_v19  ;;  %7230 = vst [vmem:[#allocation18_spill] sm:$0xff] %v6054_v46  ;;  %2350 = vmatpush.msra.mxu1 %v5666_v7  ;;  %v6072_v7 = vld [vmem:[#allocation7 + $0x98] sm:$0xff] }
 0x4b4   :  { %2414 = vmatpush.msra.mxu2 %v3371_v29  ;;  %2312 = vmatpush.msrb.mxu3 %v6054_v46  ;;  %7231 = vst [vmem:[#allocation51_spill] sm:$0xff] %v6058_v15  ;;  %v3377_v29 = vld [vmem:[#allocation5 + $0x108] sm:$0xff]  ;;  %v6068_v46 = vld [vmem:[#allocation7 + $0x90] sm:$0xff] }
 0x4b5   :  { %2332 = vmatpush.msra.mxu0 %v6058_v15  ;;  %7232 = vst [vmem:[#allocation55_spill] sm:$0xff] %v6061_v58  ;;  %2351 = vmatpush.msra.mxu1 %v5672_v3  ;;  %v6079_v3 = vld [vmem:[#allocation7 + $0x80] sm:$0xff] }
 0x4b6   :  { %2415 = vmatpush.msra.mxu2 %v3374_v16  ;;  %2313 = vmatpush.msrb.mxu3 %v6061_v58  ;;  %7233 = vst [vmem:[#allocation17_spill] sm:$0xff] %v6065_v2  ;;  %v3380_v16 = vld [vmem:[#allocation5 + $0xf0] sm:$0xff]  ;;  %v6075_v58 = vld [vmem:[#allocation7 + $0x78] sm:$0xff] }
 0x4b7   :  { %2333 = vmatpush.msra.mxu0 %v6065_v2  ;;  %7234 = vst [vmem:[#allocation65_spill] sm:$0xff] %v6068_v46  ;;  %2352 = vmatpush.msra.mxu1 %v5678_v61  ;;  %v6087_v61 = vld [vmem:[#allocation7 + $0x68] sm:$0xff] }
 0x4b8   :  { %2416 = vmatpush.msra.mxu2 %v3377_v29  ;;  %2314 = vmatpush.msrb.mxu3 %v6068_v46  ;;  %7235 = vst [vmem:[#allocation72_spill] sm:$0xff] %v6072_v7  ;;  %v6083_v29 = vld [vmem:[#allocation7 + $0x60] sm:$0xff] }
 0x4b9   :  { %2334 = vmatpush.msra.mxu0 %v6072_v7  ;;  %7236 = vst [vmem:[#allocation76_spill] sm:$0xff] %v6075_v58  ;;  %2353 = vmatpush.msra.mxu1 %v5684_v53  ;;  %v6095_v53 = vld [vmem:[#allocation7 + $0x50] sm:$0xff]  ;;  %v7253_v2 = vld [vmem:[#allocation96_spill] sm:$0xff] }
 0x4ba   :  { %2417 = vmatpush.msra.mxu2 %v3380_v16  ;;  %2315 = vmatpush.msrb.mxu3 %v6075_v58  ;;  %7237 = vst [vmem:[#allocation69_spill] sm:$0xff] %v6079_v3  ;;  %v6091_v16 = vld [vmem:[#allocation7 + $0x48] sm:$0xff] }
 0x4bb   :  { %2335 = vmatpush.msra.mxu0 %v6079_v3  ;;  %7238 = vst [vmem:[#allocation59_spill] sm:$0xff] %v6083_v29  ;;  %2354 = vmatpush.msra.mxu1 %v5692_v35  ;;  %v6103_v35 = vld [vmem:[#allocation7 + $0x38] sm:$0xff] }
 0x4bc   :  { %2418 = vmatpush.msra.mxu2 %v5688_v59  ;;  %2316 = vmatpush.msrb.mxu3 %v6083_v29  ;;  %7239 = vst [vmem:[#allocation63_spill] sm:$0xff] %v6087_v61  ;;  %v6099_v59 = vld [vmem:[#allocation7 + $0x30] sm:$0xff] }
 0x4bd   :  { %2336 = vmatpush.msra.mxu0 %v6087_v61  ;;  %7240 = vst [vmem:[#allocation19_spill] sm:$0xff] %v6091_v16  ;;  %2355 = vmatpush.msra.mxu1 %v5700_v38  ;;  %v6111_v38 = vld [vmem:[#allocation7 + $0x20] sm:$0xff] }
 0x4be   :  { %2419 = vmatpush.msra.mxu2 %v5696_v17  ;;  %2317 = vmatpush.msrb.mxu3 %v6091_v16  ;;  %7241 = vst [vmem:[#allocation73_spill] sm:$0xff] %v6095_v53  ;;  %v6107_v17 = vld [vmem:[#allocation7 + $0x18] sm:$0xff] }
 0x4bf   :  { %2337 = vmatpush.msra.mxu0 %v6095_v53  ;;  %7242 = vst [vmem:[#allocation77_spill] sm:$0xff] %v6099_v59  ;;  %2356 = vmatpush.msra.mxu1 %v5708_v26  ;;  %v6119_v26 = vld [vmem:[#allocation7 + $0x8] sm:$0xff] }
 0x4c0   :  { %2420 = vmatpush.msra.mxu2 %v5704_v42  ;;  %2318 = vmatpush.msrb.mxu3 %v6099_v59  ;;  %7243 = vst [vmem:[#allocation20_spill] sm:$0xff] %v6103_v35  ;;  %v3391_v42 = vld [vmem:[#allocation5 + $0x78] sm:$0xff]  ;;  %v6114_v59 = vld [vmem:[#allocation7] sm:$0xff] }
 0x4c1   :  { %2338 = vmatpush.msra.mxu0 %v6103_v35  ;;  %7244 = vst [vmem:[#allocation80_spill] sm:$0xff] %v6107_v17  ;;  %2357 = vmatpush.msra.mxu1 %v5716_v45  ;;  %v3395_v45 = vld [vmem:[#allocation5 + $0x48] sm:$0xff] }
 0x4c2   :  { %2421 = vmatpush.msra.mxu2 %v5712_v33  ;;  %2319 = vmatpush.msrb.mxu3 %v6107_v17  ;;  %7245 = vst [vmem:[#allocation67_spill] sm:$0xff] %v6111_v38  ;;  %v3394_v33 = vld [vmem:[#allocation5 + $0x60] sm:$0xff] }
 0x4c3   :  { %2339 = vmatpush.msra.mxu0 %v6111_v38  ;;  %7246 = vst [vmem:[#allocation21_spill] sm:$0xff] %v6114_v59  ;;  %2358 = vmatpush.msra.mxu1 %v5722_v25  ;;  %v3397_v25 = vld [vmem:[#allocation5 + $0x18] sm:$0xff]  ;;  %v7251_v38 = vld [vmem:[#allocation25_spill] sm:$0xff] }
 0x4c4   :  { %2422 = vmatpush.msra.mxu2 %v3391_v42  ;;  %2320 = vmatpush.msrb.mxu3 %v6114_v59  ;;  %7247 = vst [vmem:[#allocation71_spill] sm:$0xff] %v6119_v26  ;;  %v3396_v42 = vld [vmem:[#allocation5 + $0x30] sm:$0xff] }
 0x4c5   :  { %2340 = vmatpush.msra.mxu0 %v6119_v26  ;;  %2359 = vmatpush.msra.mxu1 %v5730_v62  ;;  %v7248_v62 = vld [vmem:[#allocation104_spill] sm:$0xff]  ;;  %v7250_v59 = vld [vmem:[#allocation54_spill] sm:$0xff] }
 0x4c6   :  { %2432 = vmatpush.msra.mxu3 %v5725_v11  ;;  %2423 = vmatpush.msra.mxu2 %v3394_v33  ;;  %v3398_v11 = vld [vmem:[#allocation5] sm:$0xff]  ;;  %v3402_v33 = vld [vmem:[#allocation5 + $0x68] sm:$0xff] }
 0x4c7   :  { %2360 = vmatpush.msra.mxu1 %v5737_v20  ;;  %v3400_v20 = vld [vmem:[#allocation5 + $0x98] sm:$0xff] }
 0x4c8   :  { %2433 = vmatpush.msra.mxu3 %v5733_v9  ;;  %2424 = vmatpush.msra.mxu2 %v3395_v45  ;;  %v3399_v9 = vld [vmem:[#allocation5 + $0xb0] sm:$0xff]  ;;  %v3404_v45 = vld [vmem:[#allocation5 + $0x38] sm:$0xff] }
 0x4ca   :  { %2434 = vmatpush.msra.mxu3 %v5740_v55  ;;  %2425 = vmatpush.msra.mxu2 %v3396_v42  ;;  %v3401_v55 = vld [vmem:[#allocation5 + $0x80] sm:$0xff]  ;;  %v3406_v42 = vld [vmem:[#allocation5 + $0x8] sm:$0xff] }
 0x4cc   :  { %2435 = vmatpush.msra.mxu3 %v5744_v6  ;;  %2426 = vmatpush.msra.mxu2 %v3397_v25  ;;  %v3403_v6 = vld [vmem:[#allocation5 + $0x50] sm:$0xff] }
 0x4ce   :  { %2436 = vmatpush.msra.mxu3 %v5748_v13  ;;  %2427 = vmatpush.msra.mxu2 %v3398_v11  ;;  %v3405_v13 = vld [vmem:[#allocation5 + $0x20] sm:$0xff] }
 0x4d0   :  { %2437 = vmatpush.msra.mxu3 %v5752_v43 }
 0x4d2   :  { %2438 = vmatpush.msra.mxu3 %v5755_v41 }
 0x4d4   :  { %2439 = vmatpush.msra.mxu3 %v7248_v62  ;;  %v7249_v62 = vld [vmem:[#allocation93_spill] sm:$0xff] }
 0x4d6   :  { %2440 = vmatpush.msra.mxu3 %v3399_v9 }
 0x4d8   :  { %2441 = vmatpush.msra.mxu3 %v3400_v20 }
 0x4da   :  { %2442 = vmatpush.msra.mxu3 %v3401_v55 }
 0x4dc   :  { %2443 = vmatpush.msra.mxu3 %v3402_v33 }
 0x4de   :  { %2444 = vmatpush.msra.mxu3 %v3403_v6 }
 0x4e0   :  { %2445 = vmatpush.msra.mxu3 %v3404_v45 }
 0x4e2   :  { %2446 = vmatpush.msra.mxu3 %v3405_v13 }
 0x4e4   :  { %2447 = vmatpush.msra.mxu3 %v3406_v42 }
 0x4ff   :  { %v1925_v17 = vpop.f32.mrf.mxu0 }
 0x500   :  { %v6131_v43 = vpop.f32.mrf.mxu1 }
 0x501   :  { %v2113_v15 = vadd.f32 %v7253_v2, %v6131_v43 }
 0x505   :  { %v1905_v41 = vpop.f32.mrf.mxu3 }
 0x509   :  { %v2137_v25 = vpop.f32.mrf.mxu1 }
 0x50a   :  { %v2242_v11 = vrot.slane %v2137_v25, 4 }
 0x50c   :  { %v2246_v9 = vadd.f32 %v2242_v11, %v7249_v62  ;;  %v7252_v11 = vld [vmem:[#allocation94_spill] sm:$0xff] }
 0x50e   :  { %v2807_v20 = vmul.f32 -1.442695, %v2246_v9  ;;  %v2030_v26 = vpop.f32.mrf.mxu2  ;;  %v2050_v55 = vpop.f32.mrf.mxu3 }
 0x50f   :  { %v2031_v33 = vadd.f32 %v2030_v26, %v7250_v59  ;;  %v2051_v6 = vadd.f32 %v2050_v55, %v7251_v38 }
 0x510   :  { %2939 = vpow2.f32 %v2807_v20 }
 0x511   :  { %v2073_v45 = vadd.f32 %v2031_v33, %v1905_v41  ;;  %v2074_v13 = vadd.f32 %v2051_v6, %v1925_v17 }
 0x513   :  { %v2805_v35 = vmul.f32 -1.442695, %v2073_v45  ;;  %v2806_v42 = vmul.f32 -1.442695, %v2074_v13 }
 0x515   :  { %2941 = vpow2.f32 %v2805_v35 }
 0x516   :  { %v2940_v53 = vpop.eup %2939  ;;  %2943 = vpow2.f32 %v2806_v42  ;;  %v2157_v16 = vpop.f32.mrf.mxu2 }
 0x517   :  { %v2254_v25 = vadd.f32 1.0, %v2940_v53  ;;  %v2243_v61 = vrot.slane %v2157_v16, 4 }
 0x519   :  { %2945 = vrcp.f32 %v2254_v25  ;;  %v2247_v9 = vadd.f32 %v2243_v61, %v7252_v11  ;;  %v2265_v33 = vand.u32 2147483647, %v2254_v25  ;;  %v2267_v61 = vand.u32 2147483648, %v2254_v25 }
 0x51a   :  { %vm2261_vm10 = vweird.f32 %v2254_v25 }
 0x51b   :  { %v2942_v62 = vpop.eup %2941  ;;  %v2808_v29 = vmul.f32 -1.442695, %v2247_v9  ;;  %vm2266_vm11 = vcmp.eq.f32.partialorder %v2265_v33, 8.507059e+37 }
 0x51c   :  { %v2944_v26 = vpop.eup %2943  ;;  %v2081_v59 = vadd.f32 1.0, %v2942_v62 }
 0x51d   :  { %v6137_v55 = vadd.f32 1.0, %v2944_v26  ;;  %2947 = vpow2.f32 %v2808_v29 }
 0x51e   :  { %2949 = vrcp.f32 %v2081_v59  ;;  %v2094_v9 = vand.u32 2147483648, %v2081_v59  ;;  %v2092_v11 = vand.u32 2147483647, %v2081_v59  ;;  %vm2088_vm14 = vweird.f32 %v2081_v59 }
 0x51f   :  { %v2946_v17 = vpop.eup %2945  ;;  %2951 = vrcp.f32 %v6137_v55  ;;  %vm2103_vm3 = vweird.f32 %v6137_v55 }
 0x520   :  { %v2257_v35 = vmul.f32 %v2946_v17, %v2254_v25  ;;  %vm2262_vm9 = vweird.f32 %v2946_v17  ;;  %v2095_v25 = vor.u32 1.1754944e-38, %v2094_v9  ;;  %vm2093_vm0 = vcmp.eq.f32.partialorder %v2092_v11, 8.507059e+37 }
 0x521   :  { %vm2263_vm12 = vmor %vm2261_vm10, %vm2262_vm9 }
 0x522   :  { %v2258_v41 = vsub.f32 1.0, %v2257_v35  ;;  %v2268_v35 = vor.u32 1.1754944e-38, %v2267_v61 }
 0x523   :  { %v2948_v20 = vpop.eup %2947 }
 0x524   :  { %v2950_v53 = vpop.eup %2949  ;;  %v6140_v16 = vadd.f32 1.0, %v2948_v20  ;;  %v2259_v6 = vmul.f32 %v2946_v17, %v2258_v41 }
 0x525   :  { %v6142_v45 = vpop.eup %2951  ;;  %v2084_v13 = vmul.f32 %v2950_v53, %v2081_v59  ;;  %vm2089_vm13 = vweird.f32 %v2950_v53 }
 0x526   :  { %2953 = vrcp.f32 %v6140_v16  ;;  %v2260_v42 = vadd.f32 %v2946_v17, %v2259_v6  ;;  %v2099_v26 = vmul.f32 %v6142_v45, %v6137_v55  ;;  %v2070_v6 = vpop.f32.mrf.mxu0  ;;  %vm2090_vm15 = vmor %vm2088_vm14, %vm2089_vm13  ;;  %vm2104_vm1 = vweird.f32 %v6142_v45 }
 0x527   :  { %v2085_v29 = vsub.f32 1.0, %v2084_v13  ;;  %v2282_v43 = vand.u32 2147483648, %v6140_v16  ;;  %vm2276_vm4 = vweird.f32 %v6140_v16  ;;  %v2280_v11 = vand.u32 2147483647, %v6140_v16  ;;  %vm2105_vm5 = vmor %vm2103_vm3, %vm2104_vm1 }
 0x528   :  { %v2177_v62 = vpop.f32.mrf.mxu3  ;;  %v2264_v38 = vsel %vm2263_vm12, %v2946_v17, %v2260_v42  ;;  %v2100_v33 = vsub.f32 1.0, %v2099_v26 }
 0x529   :  { %v2286_v41 = vadd.f32 %v5791_v30, %v2177_v62  ;;  %v2086_v20 = vmul.f32 %v2950_v53, %v2085_v29  ;;  %v2269_v3 = vsel %vm2266_vm11, %v2268_v35, %v2264_v38  ;;  %v2071_v38 = vadd.f32 %v2070_v6, %v7100_v48 }
 0x52a   :  { %v2101_v35 = vmul.f32 %v6142_v45, %v2100_v33  ;;  %vm2281_vm8 = vcmp.eq.f32.partialorder %v2280_v11, 8.507059e+37  ;;  %v7284_v11 = vld [vmem:[#allocation39_spill] sm:$0xff] }
 0x52b   :  { %v2288_v58 = vrot.slane %v2286_v41, 4  ;;  %v2087_v7 = vadd.f32 %v2950_v53, %v2086_v20 }
 0x52c   :  { %v2954_v13 = vpop.eup %2953 }
 0x52d   :  { %v2290_v46 = vmul.f32 %v2288_v58, %v2269_v3  ;;  %v2272_v61 = vmul.f32 %v2954_v13, %v6140_v16  ;;  %v2091_v29 = vsel %vm2090_vm15, %v2950_v53, %v2087_v7  ;;  %v2102_v58 = vadd.f32 %v6142_v45, %v2101_v35  ;;  %v7276_v35 = vld [vmem:[#allocation86_spill] sm:$0xff] }
 0x52e   :  { %v2096_v17 = vsel %vm2093_vm0, %v2095_v25, %v2091_v29  ;;  %vm2277_vm2 = vweird.f32 %v2954_v13  ;;  %v2109_v7 = vand.u32 2147483648, %v6137_v55 }
 0x52f   :  { %v2291_v62 = vadd.f32 %v2290_v46, %v5533_v36  ;;  %v2273_v42 = vsub.f32 1.0, %v2272_v61  ;;  %v2114_v59 = vmul.f32 %v2113_v15, %v2096_v17  ;;  %v2107_v15 = vand.u32 2147483647, %v6137_v55  ;;  %vm2278_vm6 = vmor %vm2276_vm4, %vm2277_vm2 }
 0x530   :  { %v2106_v41 = vsel %vm2105_vm5, %v6142_v45, %v2102_v58  ;;  %v2110_v33 = vor.u32 1.1754944e-38, %v2109_v7  ;;  %v2283_v61 = vor.u32 1.1754944e-38, %v2282_v43  ;;  %v7274_v45 = vld [vmem:[#allocation29_spill] sm:$0xff]  ;;  %v7278_v58 = vld [vmem:[#allocation36_spill] sm:$0xff]  ;;  %v3409_v43 = vld [vmem:[#allocation8 + $0x38] sm:$0xff] }
 0x531   :  { %2955 = vtanh.f32 %v2291_v62  ;;  %v2274_v9 = vmul.f32 %v2954_v13, %v2273_v42  ;;  %v2115_v26 = vadd.f32 %v2114_v59, %v2071_v38  ;;  %vm2108_vm7 = vcmp.eq.f32.partialorder %v2107_v15, 8.507059e+37  ;;  %v3408_v7 = vld [vmem:[#allocation8 + $0x50] sm:$0xff]  ;;  %v7283_v15 = vld [vmem:[#allocation52_spill] sm:$0xff] }
 0x532   :  { %v2111_v62 = vsel %vm2108_vm7, %v2110_v33, %v2106_v41  ;;  %v3412_v41 = vld [vmem:[#allocation7 + $0x178] sm:$0xff] }
 0x533   :  { %2957 = vtanh.f32 %v2115_v26  ;;  %v2275_v3 = vadd.f32 %v2954_v13, %v2274_v9  ;;  %v7277_v9 = vld [vmem:[#allocation45_spill] sm:$0xff]  ;;  %v7290_v33 = vld [vmem:[#allocation43_spill] sm:$0xff] }
 0x534   :  { %v3407_v26 = vld [vmem:[#allocation8 + $0x68] sm:$0xff] }
 0x535   :  { %v2279_v6 = vsel %vm2278_vm6, %v2954_v13, %v2275_v3  ;;  %v7275_v13 = vld [vmem:[#allocation44_spill] sm:$0xff]  ;;  %v7279_v3 = vld [vmem:[#allocation33_spill] sm:$0xff] }
 0x536   :  { %v2284_v17 = vsel %vm2281_vm8, %v2283_v61, %v2279_v6  ;;  %v7288_v6 = vld [vmem:[#allocation56_spill] sm:$0xff] }
 0x537   :  { %v2956_v46 = vpop.eup %2955  ;;  %v7291_v61 = vld [vmem:[#allocation64_spill] sm:$0xff] }
 0x538   :  { %v2294_v53 = vrot.slane %v2956_v46, 2 }
 0x539   :  { %v2958_v20 = vpop.eup %2957 }
 0x53a   :  { %v2296_v25 = vsub.f32 %v5834_v54, %v2294_v53  ;;  %v2117_v29 = vsub.f32 %v5809_v21, %v2958_v20  ;;  %v7254_v21 = vld [vmem:[#allocation23_spill] sm:$0xff]  ;;  %v7285_v53 = vld [vmem:[#allocation60_spill] sm:$0xff] }
 0x53c   :  { %v2298_v55 = vrot.slane %v2296_v25, 6  ;;  %v2118_v38 = vmul.f32 %v2117_v29, %v2111_v62  ;;  %v7289_v25 = vld [vmem:[#allocation57_spill] sm:$0xff] }
 0x53d   :  { %v3415_v29 = vld [vmem:[#allocation8 + $0x10] sm:$0xff] }
 0x53e   :  { %v2300_v16 = vmul.f32 %v2298_v55, %v2284_v17  ;;  %v6165_v42 = vadd.f32 %v2958_v20, %v2118_v38  ;;  %v3413_v20 = vld [vmem:[#allocation7 + $0x160] sm:$0xff]  ;;  %v3416_v55 = vld [vmem:[#allocation7 + $0x130] sm:$0xff] }
 0x53f   :  { %v7292_v62 = vld [vmem:[#allocation61_spill] sm:$0xff]  ;;  %v7293_v17 = vld [vmem:[#allocation68_spill] sm:$0xff] }
 0x540   :  { %v6167_v59 = vadd.f32 %v2956_v46, %v2300_v16  ;;  %2196 = vmatmul.f32.vlgmr.msrb.gmra.mxu0 %v6165_v42  ;;  %2216 = vmatmul.f32.vlgmr.msrb.gmra.mxu1 %v6165_v42  ;;  %v7281_v46 = vld [vmem:[#allocation48_spill] sm:$0xff] }
 0x541   :  { %2236 = vmatmul.f32.vlgmr.msrb.gmra.mxu2 %v6165_v42  ;;  %2452 = vmatpush.msrb.mxu0 %v5816_v10  ;;  %v7255_v10 = vld [vmem:[#allocation95_spill] sm:$0xff]  ;;  %v7294_v38 = vld [vmem:[#allocation16_spill] sm:$0xff] }
 0x542   :  { %v6172_v54 = vrot.slane %v6167_v59, 4  ;;  %2472 = vmatpush.msrb.mxu1 %v5819_v47  ;;  %2492 = vmatpush.msrb.mxu2 %v5822_v32  ;;  %v7256_v47 = vld [vmem:[#allocation58_spill] sm:$0xff]  ;;  %v7257_v32 = vld [vmem:[#allocation99_spill] sm:$0xff]  ;;  %v3419_v16 = vld [vmem:[#allocation7 + $0xe8] sm:$0xff] }
 0x543   :  { %2453 = vmatpush.msrb.mxu0 %v5825_v4  ;;  %v7258_v4 = vld [vmem:[#allocation37_spill] sm:$0xff] }
 0x544   :  { %2321 = vmatmul.f32.vlgmr.msrb.gmra.mxu3 %v6172_v54  ;;  %2473 = vmatpush.msrb.mxu1 %v5828_v27  ;;  %v7259_v27 = vld [vmem:[#allocation87_spill] sm:$0xff] }
 0x545   :  { %2493 = vmatpush.msrb.mxu2 %v5831_v34  ;;  %2454 = vmatpush.msrb.mxu0 %v5836_v49  ;;  %v7260_v34 = vld [vmem:[#allocation66_spill] sm:$0xff]  ;;  %v7261_v49 = vld [vmem:[#allocation27_spill] sm:$0xff] }
 0x546   :  { %2512 = vmatpush.msrb.mxu3 %v5867_v60  ;;  %2474 = vmatpush.msrb.mxu1 %v5839_v14  ;;  %v7262_v14 = vld [vmem:[#allocation41_spill] sm:$0xff]  ;;  %v7269_v60 = vld [vmem:[#allocation78_spill] sm:$0xff] }
 0x547   :  { %2494 = vmatpush.msrb.mxu2 %v5842_v12  ;;  %2455 = vmatpush.msrb.mxu0 %v5848_v5  ;;  %v7263_v12 = vld [vmem:[#allocation62_spill] sm:$0xff] }
 0x548   :  { %2513 = vmatpush.msrb.mxu3 %v5879_v52  ;;  %2341 = vmatmul.f32.vlgmr.msra.gmra.mxu0 %v6172_v54  ;;  %v7264_v5 = vld [vmem:[#allocation34_spill] sm:$0xff] }
 0x549   :  { %2361 = vmatmul.f32.vlgmr.msra.gmra.mxu1 %v6172_v54  ;;  %2428 = vmatmul.f32.vlgmr.msra.gmra.mxu2 %v6172_v54  ;;  %v7272_v52 = vld [vmem:[#allocation82_spill] sm:$0xff] }
 0x54a   :  { %2456 = vmatpush.msrb.mxu0 %v5861_v44  ;;  %2475 = vmatpush.msrb.mxu1 %v5851_v56  ;;  %v7265_v56 = vld [vmem:[#allocation70_spill] sm:$0xff] }
 0x54b   :  { %2495 = vmatpush.msrb.mxu2 %v5854_v8  ;;  %2514 = vmatpush.msrb.mxu3 %v7254_v21  ;;  %v7266_v8 = vld [vmem:[#allocation40_spill] sm:$0xff]  ;;  %v7267_v44 = vld [vmem:[#allocation30_spill] sm:$0xff]  ;;  %v7296_v21 = vld [vmem:[#allocation51_spill] sm:$0xff] }
 0x54c   :  { %2448 = vmatmul.f32.vlgmr.msra.gmra.mxu3 %v6172_v54  ;;  %2457 = vmatpush.msrb.mxu0 %v5873_v23  ;;  %v7271_v23 = vld [vmem:[#allocation74_spill] sm:$0xff] }
 0x54d   :  { %2476 = vmatpush.msrb.mxu1 %v5864_v40  ;;  %2496 = vmatpush.msrb.mxu2 %v5870_v22  ;;  %v7268_v40 = vld [vmem:[#allocation28_spill] sm:$0xff]  ;;  %v7270_v22 = vld [vmem:[#allocation31_spill] sm:$0xff] }
 0x54e   :  { %2458 = vmatpush.msrb.mxu0 %v5885_v18  ;;  %2515 = vmatpush.msrb.mxu3 %v7258_v4  ;;  %v7273_v18 = vld [vmem:[#allocation32_spill] sm:$0xff] }
 0x54f   :  { %2477 = vmatpush.msrb.mxu1 %v7255_v10  ;;  %2497 = vmatpush.msrb.mxu2 %v7256_v47  ;;  %v3420_v10 = vld [vmem:[#allocation7 + $0xd0] sm:$0xff]  ;;  %v7300_v4 = vld [vmem:[#allocation72_spill] sm:$0xff] }
 0x550   :  { %2459 = vmatpush.msrb.mxu0 %v7257_v32  ;;  %2516 = vmatpush.msrb.mxu3 %v7262_v14  ;;  %v7298_v47 = vld [vmem:[#allocation17_spill] sm:$0xff]  ;;  %v3421_v32 = vld [vmem:[#allocation7 + $0xb8] sm:$0xff] }
 0x551   :  { %2478 = vmatpush.msrb.mxu1 %v7259_v27  ;;  %2498 = vmatpush.msrb.mxu2 %v7260_v34  ;;  %v3422_v27 = vld [vmem:[#allocation7 + $0xa0] sm:$0xff]  ;;  %v7302_v34 = vld [vmem:[#allocation69_spill] sm:$0xff] }
 0x552   :  { %2460 = vmatpush.msrb.mxu0 %v7261_v49  ;;  %2517 = vmatpush.msrb.mxu3 %v7266_v8  ;;  %v3423_v49 = vld [vmem:[#allocation7 + $0x88] sm:$0xff]  ;;  %v7303_v14 = vld [vmem:[#allocation59_spill] sm:$0xff] }
 0x553   :  { %2479 = vmatpush.msrb.mxu1 %v7263_v12  ;;  %2499 = vmatpush.msrb.mxu2 %v7264_v5  ;;  %v7304_v12 = vld [vmem:[#allocation63_spill] sm:$0xff]  ;;  %v3424_v5 = vld [vmem:[#allocation7 + $0x70] sm:$0xff] }
 0x554   :  { %2461 = vmatpush.msrb.mxu0 %v7265_v56  ;;  %2518 = vmatpush.msrb.mxu3 %v7270_v22  ;;  %v7305_v56 = vld [vmem:[#allocation19_spill] sm:$0xff]  ;;  %v7306_v8 = vld [vmem:[#allocation73_spill] sm:$0xff] }
 0x555   :  { %2480 = vmatpush.msrb.mxu1 %v7267_v44  ;;  %2500 = vmatpush.msrb.mxu2 %v7268_v40  ;;  %v3425_v44 = vld [vmem:[#allocation7 + $0x58] sm:$0xff]  ;;  %v7307_v40 = vld [vmem:[#allocation77_spill] sm:$0xff]  ;;  %v3426_v22 = vld [vmem:[#allocation7 + $0x40] sm:$0xff] }
 0x556   :  { %2462 = vmatpush.msrb.mxu0 %v7269_v60  ;;  %2519 = vmatpush.msrb.mxu3 %v5952_v1  ;;  %v7280_v1 = vld [vmem:[#allocation90_spill] sm:$0xff]  ;;  %v7308_v60 = vld [vmem:[#allocation20_spill] sm:$0xff] }
 0x557   :  { %2481 = vmatpush.msrb.mxu1 %v7271_v23  ;;  %2501 = vmatpush.msrb.mxu2 %v7272_v52  ;;  %v7309_v23 = vld [vmem:[#allocation80_spill] sm:$0xff]  ;;  %v7310_v52 = vld [vmem:[#allocation67_spill] sm:$0xff] }
 0x558   :  { %2463 = vmatpush.msrb.mxu0 %v7273_v18  ;;  %2520 = vmatpush.msrb.mxu3 %v5962_v39  ;;  %v7282_v39 = vld [vmem:[#allocation49_spill] sm:$0xff] }
 0x559   :  { %2482 = vmatpush.msrb.mxu1 %v7274_v45  ;;  %2502 = vmatpush.msrb.mxu2 %v7275_v13  ;;  %v3427_v18 = vld [vmem:[#allocation7 + $0x28] sm:$0xff]  ;;  %v7312_v13 = vld [vmem:[#allocation71_spill] sm:$0xff] }
 0x55a   :  { %2464 = vmatpush.msrb.mxu0 %v7276_v35  ;;  %2521 = vmatpush.msrb.mxu3 %v5972_v37  ;;  %v3410_v37 = vld [vmem:[#allocation8 + $0x20] sm:$0xff]  ;;  %v7311_v45 = vld [vmem:[#allocation21_spill] sm:$0xff] }
 0x55b   :  { %2483 = vmatpush.msrb.mxu1 %v7277_v9  ;;  %2503 = vmatpush.msrb.mxu2 %v3407_v26  ;;  %v3428_v35 = vld [vmem:[#allocation7 + $0x10] sm:$0xff] }
 0x55c   :  { %2465 = vmatpush.msrb.mxu0 %v7278_v58  ;;  %2522 = vmatpush.msrb.mxu3 %v7280_v1 }
 0x55d   :  { %2484 = vmatpush.msrb.mxu1 %v7279_v3  ;;  %2504 = vmatpush.msrb.mxu2 %v3408_v7  ;;  %v7313_v7 = vld [vmem:[#allocation25_spill] sm:$0xff] }
 0x55e   :  { %2466 = vmatpush.msrb.mxu0 %v5975_v63  ;;  %2523 = vmatpush.msrb.mxu3 %v5996_v57  ;;  %v3411_v63 = vld [vmem:[#allocation8 + $0x8] sm:$0xff]  ;;  %v7287_v57 = vld [vmem:[#allocation47_spill] sm:$0xff] }
 0x55f   :  { %2485 = vmatpush.msrb.mxu1 %v7281_v46  ;;  %2505 = vmatpush.msrb.mxu2 %v3409_v43  ;;  %v7314_v43 = vld [vmem:[#allocation54_spill] sm:$0xff] }
 0x560   :  { %2467 = vmatpush.msrb.mxu0 %v5985_v28  ;;  %2524 = vmatpush.msrb.mxu3 %v6006_v31  ;;  %v7286_v28 = vld [vmem:[#allocation53_spill] sm:$0xff] }
 0x561   :  { %2468 = vmatmul.f32.vlgmr.msrb.gmra.mxu0 %v6172_v54  ;;  %2486 = vmatpush.msrb.mxu1 %v7282_v39  ;;  %v3414_v31 = vld [vmem:[#allocation7 + $0x148] sm:$0xff]  ;;  %v7295_v54 = vld [vmem:[#allocation18_spill] sm:$0xff] }
 0x562   :  { %2506 = vmatpush.msrb.mxu2 %v3410_v37  ;;  %2597 = vmatpush.msra.mxu0 %v7283_v15 }
 0x563   :  { %2487 = vmatpush.msrb.mxu1 %v7284_v11  ;;  %2525 = vmatpush.msrb.mxu3 %v6016_v0  ;;  %v3417_v0 = vld [vmem:[#allocation7 + $0x118] sm:$0xff] }
 0x564   :  { %2507 = vmatpush.msrb.mxu2 %v3411_v63  ;;  %2598 = vmatpush.msra.mxu0 %v7286_v28 }
 0x565   :  { %2617 = vmatpush.msra.mxu1 %v7285_v53  ;;  %2526 = vmatpush.msrb.mxu3 %v6026_v50  ;;  %v3418_v50 = vld [vmem:[#allocation7 + $0x100] sm:$0xff] }
 0x566   :  { %2637 = vmatpush.msra.mxu2 %v3412_v41  ;;  %2599 = vmatpush.msra.mxu0 %v7288_v6 }
 0x567   :  { %2618 = vmatpush.msra.mxu1 %v7287_v57  ;;  %2527 = vmatpush.msrb.mxu3 %v3415_v29  ;;  %v7315_v57 = vld [vmem:[#allocation93_spill] sm:$0xff] }
 0x568   :  { %2638 = vmatpush.msra.mxu2 %v3413_v20  ;;  %2600 = vmatpush.msra.mxu0 %v7290_v33 }
 0x569   :  { %2619 = vmatpush.msra.mxu1 %v7289_v25 }
 0x56a   :  { %2639 = vmatpush.msra.mxu2 %v3414_v31  ;;  %2601 = vmatpush.msra.mxu0 %v7292_v62  ;;  %v7316_v31 = vld [vmem:[#allocation94_spill] sm:$0xff] }
 0x56b   :  { %2620 = vmatpush.msra.mxu1 %v7291_v61 }
 0x56c   :  { %2640 = vmatpush.msra.mxu2 %v3416_v55  ;;  %2602 = vmatpush.msra.mxu0 %v7293_v17 }
 0x56d   :  { %2621 = vmatpush.msra.mxu1 %v6037_v51  ;;  %v7297_v51 = vld [vmem:[#allocation55_spill] sm:$0xff] }
 0x56e   :  { %2641 = vmatpush.msra.mxu2 %v3417_v0  ;;  %2603 = vmatpush.msra.mxu0 %v7294_v38 }
 0x56f   :  { %2622 = vmatpush.msra.mxu1 %v6044_v24  ;;  %v7299_v24 = vld [vmem:[#allocation65_spill] sm:$0xff] }
 0x570   :  { %2642 = vmatpush.msra.mxu2 %v3418_v50  ;;  %2604 = vmatpush.msra.mxu0 %v7295_v54 }
 0x571   :  { %2623 = vmatpush.msra.mxu1 %v6051_v19  ;;  %v7301_v19 = vld [vmem:[#allocation76_spill] sm:$0xff] }
 0x572   :  { %2643 = vmatpush.msra.mxu2 %v3419_v16  ;;  %2605 = vmatpush.msra.mxu0 %v7297_v51 }
 0x573   :  { %2624 = vmatpush.msra.mxu1 %v7296_v21 }
 0x574   :  { %2644 = vmatpush.msra.mxu2 %v3420_v10  ;;  %2606 = vmatpush.msra.mxu0 %v7299_v24 }
 0x575   :  { %2625 = vmatpush.msra.mxu1 %v7298_v47 }
 0x576   :  { %2645 = vmatpush.msra.mxu2 %v3421_v32  ;;  %2607 = vmatpush.msra.mxu0 %v7301_v19 }
 0x577   :  { %2626 = vmatpush.msra.mxu1 %v7300_v4 }
 0x578   :  { %2646 = vmatpush.msra.mxu2 %v3422_v27  ;;  %2608 = vmatpush.msra.mxu0 %v7303_v14 }
 0x579   :  { %2627 = vmatpush.msra.mxu1 %v7302_v34 }
 0x57a   :  { %2647 = vmatpush.msra.mxu2 %v3423_v49  ;;  %2609 = vmatpush.msra.mxu0 %v7305_v56 }
 0x57b   :  { %2628 = vmatpush.msra.mxu1 %v7304_v12 }
 0x57c   :  { %2648 = vmatpush.msra.mxu2 %v3424_v5  ;;  %2610 = vmatpush.msra.mxu0 %v7307_v40 }
 0x57d   :  { %2629 = vmatpush.msra.mxu1 %v7306_v8 }
 0x57e   :  { %2649 = vmatpush.msra.mxu2 %v3425_v44  ;;  %2611 = vmatpush.msra.mxu0 %v7309_v23 }
 0x57f   :  { %2630 = vmatpush.msra.mxu1 %v7308_v60 }
 0x580   :  { %2650 = vmatpush.msra.mxu2 %v3426_v22  ;;  %2612 = vmatpush.msra.mxu0 %v7311_v45 }
 0x581   :  { %2631 = vmatpush.msra.mxu1 %v7310_v52 }
 0x582   :  { %2651 = vmatpush.msra.mxu2 %v3427_v18 }
 0x583   :  { %2632 = vmatpush.msra.mxu1 %v7312_v13 }
 0x584   :  { %2652 = vmatpush.msra.mxu2 %v3428_v35 }
 0x5bd   :  { %v2197_v9 = vpop.f32.mrf.mxu0  ;;  %v2217_v46 = vpop.f32.mrf.mxu1 }
 0x5c4   :  { %v2237_v26 = vpop.f32.mrf.mxu2 }
 0x5c5   :  { %v2342_v58 = vpop.f32.mrf.mxu0  ;;  %v2405_v56 = vadd.f32 %v7253_v2, %v2237_v26 }
 0x5c6   :  { %v2343_v1 = vadd.f32 %v2342_v58, %v7313_v7  ;;  %v2362_v19 = vpop.f32.mrf.mxu1 }
 0x5c7   :  { %v2322_v3 = vpop.f32.mrf.mxu3  ;;  %v2363_v40 = vadd.f32 %v2362_v19, %v7100_v48 }
 0x5c8   :  { %v2323_v39 = vadd.f32 %v2322_v3, %v7314_v43  ;;  %v2366_v37 = vadd.f32 %v2343_v1, %v2217_v46 }
 0x5ca   :  { %v2365_v15 = vadd.f32 %v2323_v39, %v2197_v9  ;;  %v2810_v11 = vmul.f32 -1.442695, %v2366_v37 }
 0x5cc   :  { %v2809_v63 = vmul.f32 -1.442695, %v2365_v15  ;;  %2959 = vpow2.f32 %v2810_v11  ;;  %v2429_v53 = vpop.f32.mrf.mxu2 }
 0x5cd   :  { %v2534_v41 = vrot.slane %v2429_v53, 2 }
 0x5ce   :  { %2961 = vpow2.f32 %v2809_v63 }
 0x5cf   :  { %v2449_v28 = vpop.f32.mrf.mxu3  ;;  %v2538_v20 = vadd.f32 %v2534_v41, %v7315_v57 }
 0x5d0   :  { %v2535_v6 = vrot.slane %v2449_v28, 2 }
 0x5d1   :  { %v2811_v25 = vmul.f32 -1.442695, %v2538_v20 }
 0x5d2   :  { %v2539_v33 = vadd.f32 %v2535_v6, %v7316_v31  ;;  %v2960_v61 = vpop.eup %2959 }
 0x5d3   :  { %v6275_v55 = vadd.f32 1.0, %v2960_v61  ;;  %2963 = vpow2.f32 %v2811_v25 }
 0x5d4   :  { %v2962_v29 = vpop.eup %2961  ;;  %v2812_v62 = vmul.f32 -1.442695, %v2539_v33 }
 0x5d5   :  { %v2373_v0 = vadd.f32 1.0, %v2962_v29  ;;  %2965 = vrcp.f32 %v6275_v55  ;;  %vm2395_vm2 = vweird.f32 %v6275_v55  ;;  %v2399_v11 = vand.u32 2147483647, %v6275_v55 }
 0x5d7   :  { %2967 = vrcp.f32 %v2373_v0  ;;  %v2386_v32 = vand.u32 2147483648, %v2373_v0  ;;  %v2384_v4 = vand.u32 2147483647, %v2373_v0  ;;  %vm2380_vm10 = vweird.f32 %v2373_v0 }
 0x5d8   :  { %2969 = vpow2.f32 %v2812_v62  ;;  %vm2400_vm4 = vcmp.eq.f32.partialorder %v2399_v11, 8.507059e+37 }
 0x5d9   :  { %v2964_v17 = vpop.eup %2963  ;;  %v2387_v12 = vor.u32 1.1754944e-38, %v2386_v32  ;;  %vm2385_vm12 = vcmp.eq.f32.partialorder %v2384_v4, 8.507059e+37  ;;  %v2716_v32 = vld [vmem:[#allocation10 + $0x60] sm:$0xff] }
 0x5da   :  { %v2546_v50 = vadd.f32 1.0, %v2964_v17 }
 0x5db   :  { %v6278_v38 = vpop.eup %2965 }
 0x5dc   :  { %2971 = vrcp.f32 %v2546_v50  ;;  %v2391_v47 = vmul.f32 %v6278_v38, %v6275_v55  ;;  %v2557_v22 = vand.u32 2147483647, %v2546_v50  ;;  %v2559_v23 = vand.u32 2147483648, %v2546_v50 }
 0x5dd   :  { %v2968_v16 = vpop.eup %2967  ;;  %vm2553_vm14 = vweird.f32 %v2546_v50  ;;  %vm2396_vm1 = vweird.f32 %v6278_v38 }
 0x5de   :  { %v2970_v54 = vpop.eup %2969  ;;  %v2376_v21 = vmul.f32 %v2968_v16, %v2373_v0  ;;  %vm2381_vm9 = vweird.f32 %v2968_v16  ;;  %v2392_v14 = vsub.f32 1.0, %v2391_v47  ;;  %v2469_v5 = vpop.f32.mrf.mxu0  ;;  %v2560_v26 = vor.u32 1.1754944e-38, %v2559_v23  ;;  %vm2397_vm3 = vmor %vm2395_vm2, %vm2396_vm1  ;;  %v2717_v47 = vld [vmem:[#allocation10 + $0x68] sm:$0xff] }
 0x5df   :  { %v6280_v10 = vadd.f32 1.0, %v2970_v54  ;;  %vm2382_vm11 = vmor %vm2380_vm10, %vm2381_vm9  ;;  %v2578_v13 = vadd.f32 %v5791_v30, %v2469_v5  ;;  %vm2558_vm0 = vcmp.eq.f32.partialorder %v2557_v22, 8.507059e+37  ;;  %v2401_v30 = vand.u32 2147483648, %v6275_v55  ;;  %v2709_v22 = vld [vmem:[#allocation10 + $0x28] sm:$0xff] }
 0x5e0   :  { %v2377_v51 = vsub.f32 1.0, %v2376_v21  ;;  %v2393_v35 = vmul.f32 %v6278_v38, %v2392_v14  ;;  %v2719_v21 = vld [vmem:[#allocation10 + $0x78] sm:$0xff]  ;;  %v2713_v14 = vld [vmem:[#allocation10 + $0x48] sm:$0xff]  ;;  %vm2744_vm1 = vcmask 1041408  }
 0x5e1   :  { %2973 = vrcp.f32 %v6280_v10  ;;  %v2580_v1 = vrot.slane %v2578_v13, 2  ;;  %v2402_v28 = vor.u32 1.1754944e-38, %v2401_v30  ;;  %v2574_v29 = vand.u32 2147483648, %v6280_v10  ;;  %2724 = vmatpush.msra.mxu3 %v2719_v21 }
 0x5e2   :  { %v2378_v24 = vmul.f32 %v2968_v16, %v2377_v51  ;;  %v2972_v27 = vpop.eup %2971  ;;  %v2394_v39 = vadd.f32 %v6278_v38, %v2393_v35  ;;  %vm2568_vm6 = vweird.f32 %v6280_v10  ;;  %v2705_v35 = vld [vmem:[#allocation10 + $0x8] sm:$0xff] }
 0x5e3   :  { %v2549_v49 = vmul.f32 %v2972_v27, %v2546_v50  ;;  %vm2554_vm13 = vweird.f32 %v2972_v27  ;;  %v2575_v0 = vor.u32 1.1754944e-38, %v2574_v29 }
 0x5e4   :  { %v2379_v34 = vadd.f32 %v2968_v16, %v2378_v24  ;;  %vm2555_vm15 = vmor %vm2553_vm14, %vm2554_vm13  ;;  %v2398_v53 = vsel %vm2397_vm3, %v6278_v38, %v2394_v39 }
 0x5e5   :  { %v2550_v44 = vsub.f32 1.0, %v2549_v49  ;;  %v2403_v6 = vsel %vm2400_vm4, %v2402_v28, %v2398_v53 }
 0x5e6   :  { %v2383_v8 = vsel %vm2382_vm11, %v2968_v16, %v2379_v34 }
 0x5e7   :  { %v2388_v60 = vsel %vm2385_vm12, %v2387_v12, %v2383_v8  ;;  %v2974_v52 = vpop.eup %2973  ;;  %v2551_v45 = vmul.f32 %v2972_v27, %v2550_v44 }
 0x5e8   :  { %v2406_v18 = vmul.f32 %v2405_v56, %v2388_v60  ;;  %v2564_v2 = vmul.f32 %v2974_v52, %v6280_v10  ;;  %vm2569_vm5 = vweird.f32 %v2974_v52  ;;  %v2712_v56 = vld [vmem:[#allocation10 + $0x40] sm:$0xff]  ;;  %v2710_v60 = vld [vmem:[#allocation10 + $0x30] sm:$0xff] }
 0x5e9   :  { %v2552_v58 = vadd.f32 %v2972_v27, %v2551_v45  ;;  %vm2570_vm7 = vmor %vm2568_vm6, %vm2569_vm5  ;;  %v2706_v45 = vld [vmem:[#allocation10 + $0x10] sm:$0xff] }
 0x5ea   :  { %v2407_v9 = vadd.f32 %v2406_v18, %v2363_v40  ;;  %v2565_v15 = vsub.f32 1.0, %v2564_v2  ;;  %v2711_v40 = vld [vmem:[#allocation10 + $0x38] sm:$0xff] }
 0x5eb   :  { %v2556_v3 = vsel %vm2555_vm15, %v2972_v27, %v2552_v58  ;;  %v2714_v27 = vld [vmem:[#allocation10 + $0x50] sm:$0xff] }
 0x5ec   :  { %2975 = vtanh.f32 %v2407_v9  ;;  %v2561_v46 = vsel %vm2558_vm0, %v2560_v26, %v2556_v3  ;;  %v2566_v20 = vmul.f32 %v2974_v52, %v2565_v15  ;;  %v2704_v9 = vld [vmem:[#allocation10] sm:$0xff] }
 0x5ed   :  { %v2582_v37 = vmul.f32 %v2580_v1, %v2561_v46 }
 0x5ee   :  { %v2567_v33 = vadd.f32 %v2974_v52, %v2566_v20 }
 0x5ef   :  { %v2583_v63 = vadd.f32 %v2582_v37, %v5533_v36 }
 0x5f0   :  { %v2571_v55 = vsel %vm2570_vm7, %v2974_v52, %v2567_v33 }
 0x5f1   :  { %2977 = vtanh.f32 %v2583_v63 }
 0x5f2   :  { %v2976_v41 = vpop.eup %2975 }
 0x5f3   :  { %v2409_v57 = vsub.f32 %v6165_v42, %v2976_v41  ;;  %v2572_v42 = vand.u32 2147483647, %v6280_v10  ;;  %v2718_v10 = vld [vmem:[#allocation10 + $0x70] sm:$0xff] }
 0x5f4   :  { %2725 = vmatpush.msra.mxu3 %v2718_v10 }
 0x5f5   :  { %v2410_v25 = vmul.f32 %v2409_v57, %v2403_v6  ;;  %vm2573_vm8 = vcmp.eq.f32.partialorder %v2572_v42, 8.507059e+37 }
 0x5f6   :  { %v2576_v50 = vsel %vm2573_vm8, %v2575_v0, %v2571_v55  ;;  %2726 = vmatpush.msra.mxu3 %v2717_v47 }
 0x5f7   :  { %v6298_v31 = vadd.f32 %v2976_v41, %v2410_v25  ;;  %v2978_v61 = vpop.eup %2977  ;;  %v3429_v41 = vld [vmem:[%s6328_s8] ss:$0 sm:$0xff] }
 0x5f8   :  { %v2586_v36 = vrot.slane %v2978_v61, 2  ;;  %2727 = vmatpush.msra.mxu3 %v2716_v32 }
 0x5f9   :  { %2488 = vmatmul.f32.vlgmr.msrb.gmra.mxu1 %v6298_v31  ;;  %2508 = vmatmul.f32.vlgmr.msrb.gmra.mxu2 %v6298_v31 }
 0x5fa   :  { %2528 = vmatmul.f32.vlgmr.msrb.gmra.mxu3 %v6298_v31  ;;  %v2588_v62 = vsub.f32 %v6167_v59, %v2586_v36  ;;  %v2715_v59 = vld [vmem:[#allocation10 + $0x58] sm:$0xff] }
 0x5fb   :  { %2728 = vmatpush.msra.mxu3 %v2715_v59 }
 0x5fc   :  { %v2590_v17 = vrot.slane %v2588_v62, 6 }
 0x5fd   :  { %2729 = vmatpush.msra.mxu3 %v2714_v27 }
 0x5fe   :  { %v2592_v38 = vmul.f32 %v2590_v17, %v2576_v50 }
 0x5ff   :  { %2730 = vmatpush.msra.mxu3 %v2713_v14 }
 0x600   :  { %v2593_v16 = vadd.f32 %v2978_v61, %v2592_v38 }
 0x601   :  { %2731 = vmatpush.msra.mxu3 %v2712_v56 }
 0x602   :  { %v2595_v54 = vrot.slane %v2593_v16, 6 }
 0x603   :  { %2732 = vmatpush.msra.mxu3 %v2711_v40 }
 0x604   :  { %2613 = vmatmul.f32.vlgmr.msra.gmra.mxu0 %v2595_v54  ;;  %2633 = vmatmul.f32.vlgmr.msra.gmra.mxu1 %v2595_v54 }
 0x605   :  { %2653 = vmatmul.f32.vlgmr.msra.gmra.mxu2 %v2595_v54  ;;  %2733 = vmatpush.msra.mxu3 %v2710_v60 }
 0x607   :  { %2734 = vmatpush.msra.mxu3 %v2709_v22 }
 0x676   :  { %v2489_v51 = vpop.f32.mrf.mxu1 }
 0x67c   :  { %v2509_v49 = vpop.f32.mrf.mxu2 }
 0x67d   :  { %v2529_v30 = vpop.f32.mrf.mxu3 }
 0x67e   :  { %v2697_v28 = vadd.f32 %v3429_v41, %v2529_v30 }
 0x681   :  { %v2614_v24 = vpop.f32.mrf.mxu0  ;;  %v2634_v4 = vpop.f32.mrf.mxu1 }
 0x682   :  { %v2615_v19 = vadd.f32 %v2614_v24, %v7314_v43  ;;  %v2635_v34 = vadd.f32 %v2634_v4, %v7313_v7  ;;  %v2708_v43 = vld [vmem:[#allocation10 + $0x20] sm:$0xff]  ;;  %v2707_v7 = vld [vmem:[#allocation10 + $0x18] sm:$0xff] }
 0x683   :  { %2735 = vmatpush.msra.mxu3 %v2708_v43 }
 0x684   :  { %v2657_v12 = vadd.f32 %v2615_v19, %v2489_v51  ;;  %v2658_v5 = vadd.f32 %v2635_v34, %v2509_v49 }
 0x685   :  { %2736 = vmatpush.msra.mxu3 %v2707_v7 }
 0x686   :  { %v2813_v8 = vmul.f32 -1.442695, %v2657_v12  ;;  %v2814_v44 = vmul.f32 -1.442695, %v2658_v5 }
 0x687   :  { %2737 = vmatpush.msra.mxu3 %v2706_v45 }
 0x688   :  { %2979 = vpow2.f32 %v2813_v8  ;;  %v2654_v63 = vpop.f32.mrf.mxu2 }
 0x689   :  { %2981 = vpow2.f32 %v2814_v44  ;;  %2738 = vmatpush.msra.mxu3 %v2705_v35  ;;  %v2655_v6 = vadd.f32 %v2654_v63, %v7100_v48  ;;  %v2828_v48 = vld [vmem:[%s6330_s10] ss:$0 sm:$0xff]  ;;  %s2765_s10 = sshll.u32 %s6331_s11, 4  ;;  %s2766_s10 = int_to_ptr.hbm [resolvable:$true] %s2765_s10 }
 0x68b   :  { %2739 = vmatpush.msra.mxu3 %v2704_v9 }
 0x68e   :  { %v2980_v23 = vpop.eup %2979 }
 0x68f   :  { %v2982_v52 = vpop.eup %2981  ;;  %v2665_v18 = vadd.f32 1.0, %v2980_v23 }
 0x690   :  { %v2666_v13 = vadd.f32 1.0, %v2982_v52 }
 0x691   :  { %2983 = vrcp.f32 %v2665_v18  ;;  %v2678_v46 = vand.u32 2147483648, %v2665_v18  ;;  %v2676_v37 = vand.u32 2147483647, %v2665_v18  ;;  %vm2672_vm10 = vweird.f32 %v2665_v18 }
 0x692   :  { %2985 = vrcp.f32 %v2666_v13  ;;  %v2693_v36 = vand.u32 2147483648, %v2666_v13  ;;  %vm2687_vm14 = vweird.f32 %v2666_v13  ;;  %v2691_v42 = vand.u32 2147483647, %v2666_v13 }
 0x693   :  { %v2679_v53 = vor.u32 1.1754944e-38, %v2678_v46  ;;  %vm2677_vm12 = vcmp.eq.f32.partialorder %v2676_v37, 8.507059e+37 }
 0x694   :  { %v2694_v0 = vor.u32 1.1754944e-38, %v2693_v36  ;;  %vm2692_vm0 = vcmp.eq.f32.partialorder %v2691_v42, 8.507059e+37 }
 0x697   :  { %v2984_v58 = vpop.eup %2983 }
 0x698   :  { %v2986_v2 = vpop.eup %2985  ;;  %v2668_v26 = vmul.f32 %v2984_v58, %v2665_v18  ;;  %vm2673_vm9 = vweird.f32 %v2984_v58 }
 0x699   :  { %v2683_v1 = vmul.f32 %v2986_v2, %v2666_v13  ;;  %vm2674_vm11 = vmor %vm2672_vm10, %vm2673_vm9  ;;  %vm2688_vm13 = vweird.f32 %v2986_v2 }
 0x69a   :  { %v2669_v3 = vsub.f32 1.0, %v2668_v26  ;;  %vm2689_vm15 = vmor %vm2687_vm14, %vm2688_vm13 }
 0x69b   :  { %v2684_v11 = vsub.f32 1.0, %v2683_v1 }
 0x69c   :  { %v2670_v39 = vmul.f32 %v2984_v58, %v2669_v3 }
 0x69d   :  { %v2685_v33 = vmul.f32 %v2986_v2, %v2684_v11 }
 0x69e   :  { %v2671_v15 = vadd.f32 %v2984_v58, %v2670_v39 }
 0x69f   :  { %v2686_v29 = vadd.f32 %v2986_v2, %v2685_v33 }
 0x6a0   :  { %v2675_v57 = vsel %vm2674_vm11, %v2984_v58, %v2671_v15 }
 0x6a1   :  { %v2680_v20 = vsel %vm2677_vm12, %v2679_v53, %v2675_v57  ;;  %v2690_v55 = vsel %vm2689_vm15, %v2986_v2, %v2686_v29 }
 0x6a2   :  { %v2698_v25 = vmul.f32 %v2697_v28, %v2680_v20  ;;  %v2695_v50 = vsel %vm2692_vm0, %v2694_v0, %v2690_v55 }
 0x6a4   :  { %v2699_v61 = vadd.f32 %v2698_v25, %v2655_v6 }
 0x6a6   :  { %2987 = vtanh.f32 %v2699_v61 }
 0x6ac   :  { %v2988_v62 = vpop.eup %2987 }
 0x6ad   :  { %v2701_v17 = vsub.f32 %v6298_v31, %v2988_v62 }
 0x6af   :  { %v2702_v38 = vmul.f32 %v2701_v17, %v2695_v50 }
 0x6b1   :  { %v2703_v16 = vadd.f32 %v2988_v62, %v2702_v38 }
 0x6b3   :  { %2740 = vmatmul.f32.vlgmr.msra.gmra.mxu3 %v2703_v16 }
 0x736   :  { %v2741_v54 = vpop.f32.mrf.mxu3 }
 0x737   :  { %v2742_v21 = vadd.f32 %v2828_v48, %v2741_v54 }
 0x739   :  { %v2745_v51 = vsel %vm2744_vm1, %v2742_v21, -inf }
 0x73a   :  { %2746 = vmax.xlane.f32.xlu0 %v2745_v51 }
 0x7ad   :  { %v2747_v10 = vpop.xlane.xlu0 %2746 }
 0x7ae   :  { %v2748_v47 = vsub.f32 %v2742_v21, %v2747_v10 }
 0x7b0   :  { %v2749_v32 = vmul.f32 1.442695, %v2748_v47 }
 0x7b2   :  { %2989 = vpow2.f32 %v2749_v32 }
 0x7b8   :  { %v2990_v59 = vpop.eup %2989 }
 0x7b9   :  { %v2751_v31 = vsel %vm2744_vm1, %v2990_v59, 0.0 }
 0x7ba   :  { %2752 = vadd.xlane.f32.xlu0 %v2751_v31 }
 0x82d   :  { %v2753_v24 = vpop.xlane.xlu0 %2752 }
 0x82e   :  { %2991 = vlog2.f32 %v2753_v24 }
 0x834   :  { %v2992_v4 = vpop.eup %2991 }
 0x835   :  { %v2755_v27 = vmul.f32 0.6931472, %v2992_v4 }
 0x837   :  { %v2756_v19 = vsub.f32 %v2748_v47, %v2755_v27 }
 0x839   :  { %2757 = vst [vmem:[#allocation11] sm:$0x3] %v2756_v19 }
 0x83a   :  { %2768 = dma.vmem_to_hbm [thread:$0]  %s2764_s30, 32, %s2766_s10, [#allocation4]  }
 0x83b   :  { %3580 = dma.done.wait [#allocation4], 32  }
 0x83c   :  { %3581 = vsyncadd [#allocation4], 4294967264 }
 0x83d   :  { %2773 = vsyncpa [#allocation3], 1 }
 0x83e   :  { %2774 = vsyncpa [#allocation6], 1 }
 0x83f   :  { %2775 = vsyncpa [#allocation9], 1 }
 0x840   :  { %2776 = vsyncpa [#allocation4], 1 }

</bundles_post_ra>
